<compile_context>
chip_gen: v7x
topology: tpu7x:2x2x1
jax: 0.10.0
libtpu: 0.0.40
codegen_flags: <defaults>
</compile_context>

<pallas_src>
import math

import jax
import jax.numpy as jnp
from jax import lax
from jax.experimental import pallas as pl
from jax.experimental.pallas import tpu as pltpu


LANE = 128


def _round_up(x, m):
    return ((x + m - 1) // m) * m


def _full_spec(shape):
    """Whole-array BlockSpec (no grid)."""
    zeros = (0,) * len(shape)
    return pl.BlockSpec(shape, lambda: zeros)


# ----------------------------------------------------------------------------
# Fused kernel: n_layers x GRU (PyTorch gate order r, z, n) + ReLU + Linear.
# ----------------------------------------------------------------------------
def _make_fused_kernel(*, T, B, D, Hp, n_layers):
    n_in = 1 + 4 * n_layers + 2  # x, per-layer (w_ih, w_hh, b_ih, b_hh), w_fc, b_fc

    def kernel(*refs):
        x_ref = refs[0]                                   # (B*T, D), rows b*T + t
        layer_refs = refs[1:1 + 4 * n_layers]
        wfc_ref = refs[1 + 4 * n_layers]                  # (Hp, O)
        bfc_ref = refs[2 + 4 * n_layers]                  # (1, O)
        out_ref = refs[n_in]                              # (B, O)
        gi_scr = refs[n_in + 1]                           # (B, T, 3*Hp) VMEM
        seq_scr = refs[n_in + 2] if n_layers > 1 else None  # (B, T, Hp) VMEM

        h = None
        for layer in range(n_layers):
            wih_ref, whh_ref, bih_ref, bhh_ref = layer_refs[4 * layer: 4 * layer + 4]

            if layer == 0:
                seq2d = x_ref[...]                        # (B*T, D)
            else:
                seq2d = seq_scr[...].reshape(B * T, Hp)   # (B*T, Hp), rows b*T + t

            # Hoisted, time-parallel input projection: ONE large MXU matmul per
            # layer instead of T tiny per-timestep matmuls.
            gi_all = (
                jnp.dot(seq2d, wih_ref[...], preferred_element_type=jnp.float32)
                + bih_ref[...]
            )                                             # (B*T, 3*Hp)
            gi_scr[...] = gi_all.reshape(B, T, 3 * Hp)

            # Hoist per-layer loop invariants (no per-iteration broadcasts).
            whh = whh_ref[...]                            # (Hp, 3*Hp)
            bhh_b = jnp.broadcast_to(bhh_ref[...], (B, 3 * Hp))

            last_layer = layer == n_layers - 1
            h = jnp.zeros((B, Hp), jnp.float32)

            # Statically unrolled recurrence: only the hidden-state matmul and
            # the gate math are sequential.
            for t in range(T):
                gi = gi_scr[:, t, :]                      # (B, 3*Hp)
                gh = (
                    jnp.dot(h, whh, preferred_element_type=jnp.float32)
                    + bhh_b
                )                                         # (B, 3*Hp)
                # Gate slices are 128-lane aligned (each gate owns an Hp span).
                r = jax.nn.sigmoid(gi[:, 0 * Hp:1 * Hp] + gh[:, 0 * Hp:1 * Hp])
                z = jax.nn.sigmoid(gi[:, 1 * Hp:2 * Hp] + gh[:, 1 * Hp:2 * Hp])
                n = jnp.tanh(gi[:, 2 * Hp:3 * Hp] + r * gh[:, 2 * Hp:3 * Hp])
                h = n + z * (h - n)                       # == (1 - z) * n + z * h
                if not last_layer:
                    seq_scr[:, t, :] = h                  # feed next layer

        # Fused head: ReLU(last hidden) @ W_fc^T + b_fc — one small dense store.
        hr = jnp.maximum(h, 0.0)
        out_ref[...] = (
            jnp.dot(hr, wfc_ref[...], preferred_element_type=jnp.float32)
            + bfc_ref[...]
        ).astype(out_ref.dtype)

    return kernel


# ----------------------------------------------------------------------------
# Forward wrapper (single pallas_call, no grid).
# ----------------------------------------------------------------------------
@jax.jit
def gru_net_forward(x_btd, kparams):
    B, T, D = x_btd.shape
    layers = kparams["layers"]
    n_layers = len(layers)
    Hp = layers[0]["w_hh_t"].shape[0]
    O = kparams["w_fc_t"].shape[1]

    # batch_first (B, T, D) -> (B*T, D) is a free view (no transpose, no copy).
    x2d = x_btd.astype(jnp.float32).reshape(B * T, D)

    inputs = [x2d]
    in_specs = [_full_spec((B * T, D))]
    for lp in layers:
        for name in ("w_ih_t", "w_hh_t", "b_ih", "b_hh"):
            arr = lp[name]
            inputs.append(arr)
            in_specs.append(_full_spec(arr.shape))
    inputs += [kparams["w_fc_t"], kparams["b_fc"]]
    in_specs += [_full_spec(kparams["w_fc_t"].shape), _full_spec(kparams["b_fc"].shape)]

    scratch_shapes = [pltpu.VMEM((B, T, 3 * Hp), jnp.float32)]
    if n_layers > 1:
        scratch_shapes.append(pltpu.VMEM((B, T, Hp), jnp.float32))

    kernel = _make_fused_kernel(T=T, B=B, D=D, Hp=Hp, n_layers=n_layers)

    return pl.pallas_call(
        kernel,
        out_shape=jax.ShapeDtypeStruct((B, O), jnp.float32),
        in_specs=in_specs,
        out_specs=_full_spec((B, O)),
        scratch_shapes=scratch_shapes,
        compiler_params=pltpu.CompilerParams(vmem_limit_bytes=32 * 1024 * 1024),
    )(*inputs)


# ----------------------------------------------------------------------------
# Parameters: raw (PyTorch layout) + packed (transposed, 128-lane-padded gates).
# ----------------------------------------------------------------------------
def init_raw_params(key, input_dim, hidden_dim, output_dim, n_layers):
    raw = {"layers": []}
    bound = 1.0 / math.sqrt(hidden_dim)
    for layer in range(n_layers):
        d_in = input_dim if layer == 0 else hidden_dim
        key, k1, k2, k3, k4 = jax.random.split(key, 5)
        raw["layers"].append(dict(
            w_ih=jax.random.uniform(k1, (3 * hidden_dim, d_in), jnp.float32, -bound, bound),
            w_hh=jax.random.uniform(k2, (3 * hidden_dim, hidden_dim), jnp.float32, -bound, bound),
            b_ih=jax.random.uniform(k3, (3 * hidden_dim,), jnp.float32, -bound, bound),
            b_hh=jax.random.uniform(k4, (3 * hidden_dim,), jnp.float32, -bound, bound),
        ))
    key, k5, k6 = jax.random.split(key, 3)
    raw["w_fc"] = jax.random.uniform(k5, (output_dim, hidden_dim), jnp.float32, -bound, bound)
    raw["b_fc"] = jax.random.uniform(k6, (output_dim,), jnp.float32, -bound, bound)
    return raw


def pack_params(raw, hidden_dim):
    """Transpose weights and pad each gate to its own 128-lane span."""
    H = hidden_dim
    Hp = _round_up(H, LANE)

    def pad_gate_cols(w_t):  # (Din, 3H) -> (Din, 3Hp); gate g lives at [g*Hp, g*Hp+H)
        d_in = w_t.shape[0]
        out = jnp.zeros((d_in, 3 * Hp), jnp.float32)
        for g in range(3):
            out = out.at[:, g * Hp: g * Hp + H].set(w_t[:, g * H: (g + 1) * H])
        return out

    def pad_rows(w, rows_to):  # (r, C) -> (rows_to, C), zero-filled
        return jnp.zeros((rows_to, w.shape[1]), jnp.float32).at[: w.shape[0], :].set(w)

    layers = []
    for i, lp in enumerate(raw["layers"]):
        w_ih_t = pad_gate_cols(lp["w_ih"].T)                # (Din, 3Hp)
        if i > 0:
            w_ih_t = pad_rows(w_ih_t, Hp)                   # input of layer>0 is padded hidden
        w_hh_t = pad_rows(pad_gate_cols(lp["w_hh"].T), Hp)  # (Hp, 3Hp)
        b_ih = pad_gate_cols(lp["b_ih"][None, :])           # (1, 3Hp)
        b_hh = pad_gate_cols(lp["b_hh"][None, :])           # (1, 3Hp)
        layers.append(dict(w_ih_t=w_ih_t, w_hh_t=w_hh_t, b_ih=b_ih, b_hh=b_hh))

    return {
        "layers": layers,
        "w_fc_t": pad_rows(raw["w_fc"].T, Hp),              # (Hp, O)
        "b_fc": raw["b_fc"][None, :],                       # (1, O)
    }


# ----------------------------------------------------------------------------
# Pure-JAX reference (unpadded weights, mirrors PyTorch nn.GRU math).
# ----------------------------------------------------------------------------
def gru_net_reference(x_btd, raw):
    x = jnp.transpose(x_btd, (1, 0, 2)).astype(jnp.float32)  # (T, B, D)
    B = x.shape[1]
    seq = x
    for lp in raw["layers"]:
        H = lp["w_hh"].shape[1]
        w_ih_t, w_hh_t = lp["w_ih"].T, lp["w_hh"].T
        b_ih, b_hh = lp["b_ih"], lp["b_hh"]

        def step(h, x_t, w_ih_t=w_ih_t, w_hh_t=w_hh_t, b_ih=b_ih, b_hh=b_hh, H=H):
            gi = x_t @ w_ih_t + b_ih
            gh = h @ w_hh_t + b_hh
            i_r, i_z, i_n = gi[:, :H], gi[:, H:2 * H], gi[:, 2 * H:]
            h_r, h_z, h_n = gh[:, :H], gh[:, H:2 * H], gh[:, 2 * H:]
            r = jax.nn.sigmoid(i_r + h_r)
            z = jax.nn.sigmoid(i_z + h_z)
            n = jnp.tanh(i_n + r * h_n)
            h_new = (1.0 - z) * n + z * h
            return h_new, h_new

        h0 = jnp.zeros((B, H), jnp.float32)
        _, seq = lax.scan(step, h0, seq)
    h_last = seq[-1]
    return jnp.maximum(h_last, 0.0) @ raw["w_fc"].T + raw["b_fc"]


if __name__ == "__main__":
    BATCH, SEQ, INPUT_DIM, HIDDEN_DIM, OUTPUT_DIM, N_LAYERS = 2, 8, 16, 32, 8, 2

    key = jax.random.PRNGKey(0)
    key, xkey = jax.random.split(key)
    x = jax.random.normal(xkey, (BATCH, SEQ, INPUT_DIM), jnp.float32)

    raw = init_raw_params(key, INPUT_DIM, HIDDEN_DIM, OUTPUT_DIM, N_LAYERS)
    kparams = pack_params(raw, HIDDEN_DIM)

    out = gru_net_forward(x, kparams)
    out = jax.block_until_ready(out)

    ref = gru_net_reference(x, raw)
    assert out.shape == (BATCH, OUTPUT_DIM), out.shape
    assert jnp.allclose(out, ref, atol=2e-5, rtol=2e-5), (out, ref)

    print("KERNEL_OK")
</pallas_src>

<mosaic_0001>
module attributes {stable_mosaic.version = 11 : i64} {
  func.func @kernel(%arg0: memref<16x16xf32, #tpu.memory_space<vmem>>, %arg1: memref<16x384xf32, #tpu.memory_space<vmem>>, %arg2: memref<128x384xf32, #tpu.memory_space<vmem>>, %arg3: memref<1x384xf32, #tpu.memory_space<vmem>>, %arg4: memref<1x384xf32, #tpu.memory_space<vmem>>, %arg5: memref<128x384xf32, #tpu.memory_space<vmem>>, %arg6: memref<128x384xf32, #tpu.memory_space<vmem>>, %arg7: memref<1x384xf32, #tpu.memory_space<vmem>>, %arg8: memref<1x384xf32, #tpu.memory_space<vmem>>, %arg9: memref<128x8xf32, #tpu.memory_space<vmem>>, %arg10: memref<1x8xf32, #tpu.memory_space<vmem>>, %arg11: memref<2x8xf32, #tpu.memory_space<vmem>>, %arg12: memref<2x8x384xf32, #tpu.memory_space<vmem>>, %arg13: memref<2x8x128xf32, #tpu.memory_space<vmem>>) attributes {dimension_semantics = [], scalar_prefetch = 0 : i64, scratch_operands = 2 : i64, tpu.core_type = #tpu.core_type<tc>} {
    %c0 = arith.constant 0 : index
    %c0_0 = arith.constant 0 : index
    %0 = vector.load %arg0[%c0, %c0_0] : memref<16x16xf32, #tpu.memory_space<vmem>>, vector<16x16xf32>
    %c0_1 = arith.constant 0 : index
    %c0_2 = arith.constant 0 : index
    %1 = vector.load %arg1[%c0_1, %c0_2] : memref<16x384xf32, #tpu.memory_space<vmem>>, vector<16x384xf32>
    %cst = arith.constant dense<0.000000e+00> : vector<16x384xf32>
    %2 = tpu.matmul %0, %1, %cst {dimension_numbers = #tpu.dot_dimension_numbers<[1], [0], [0], [1], [0, 0, 1, 1], [], []>} : vector<16x16xf32>, vector<16x384xf32>, vector<16x384xf32> -> vector<16x384xf32>
    %c0_3 = arith.constant 0 : index
    %c0_4 = arith.constant 0 : index
    %3 = vector.load %arg3[%c0_3, %c0_4] : memref<1x384xf32, #tpu.memory_space<vmem>>, vector<1x384xf32>
    %4 = vector.broadcast %3 : vector<1x384xf32> to vector<16x384xf32>
    %5 = arith.addf %2, %4 : vector<16x384xf32>
    %6 = vector.shape_cast %5 : vector<16x384xf32> to vector<2x8x384xf32>
    %c0_5 = arith.constant 0 : index
    %c0_6 = arith.constant 0 : index
    %c0_7 = arith.constant 0 : index
    %7 = vector.load %arg12[%c0_5, %c0_6, %c0_7] : memref<2x8x384xf32, #tpu.memory_space<vmem>>, vector<2x8x384xf32>
    tpu.vector_store %arg12[%c0_5, %c0_6, %c0_7], %6 {strides = array<i32>} : memref<2x8x384xf32, #tpu.memory_space<vmem>>, vector<2x8x384xf32>,
    %c0_8 = arith.constant 0 : index
    %c0_9 = arith.constant 0 : index
    %8 = vector.load %arg2[%c0_8, %c0_9] : memref<128x384xf32, #tpu.memory_space<vmem>>, vector<128x384xf32>
    %c0_10 = arith.constant 0 : index
    %c0_11 = arith.constant 0 : index
    %9 = vector.load %arg4[%c0_10, %c0_11] : memref<1x384xf32, #tpu.memory_space<vmem>>, vector<1x384xf32>
    %10 = vector.shape_cast %9 : vector<1x384xf32> to vector<1x384xf32>
    %11 = vector.broadcast %10 : vector<1x384xf32> to vector<2x384xf32>
    %cst_12 = arith.constant 0.000000e+00 : f32
    %12 = vector.broadcast %cst_12 : f32 to vector<2x128xf32>
    %c0_13 = arith.constant 0 : index
    %c0_14 = arith.constant 0 : index
    %c0_15 = arith.constant 0 : index
    %13 = vector.load %arg12[%c0_13, %c0_14, %c0_15] : memref<2x8x384xf32, #tpu.memory_space<vmem>>, vector<2x1x384xf32>
    %14 = vector.shape_cast %13 : vector<2x1x384xf32> to vector<2x384xf32>
    %cst_16 = arith.constant dense<0.000000e+00> : vector<2x384xf32>
    %15 = tpu.matmul %12, %8, %cst_16 {dimension_numbers = #tpu.dot_dimension_numbers<[1], [0], [0], [1], [0, 0, 1, 1], [], []>} : vector<2x128xf32>, vector<128x384xf32>, vector<2x384xf32> -> vector<2x384xf32>
    %16 = arith.addf %15, %11 : vector<2x384xf32>
    %17 = vector.extract_strided_slice %14 {offsets = [0, 0], sizes = [2, 128], strides = [1, 1]} : vector<2x384xf32> to vector<2x128xf32>
    %18 = vector.extract_strided_slice %16 {offsets = [0, 0], sizes = [2, 128], strides = [1, 1]} : vector<2x384xf32> to vector<2x128xf32>
    %19 = arith.addf %17, %18 : vector<2x128xf32>
    %20 = arith.negf %19 : vector<2x128xf32>
    %21 = math.exp %20 : vector<2x128xf32>
    %cst_17 = arith.constant 1.000000e+00 : f32
    %22 = vector.broadcast %cst_17 : f32 to vector<2x128xf32>
    %23 = arith.addf %22, %21 : vector<2x128xf32>
    %24 = arith.divf %22, %23 : vector<2x128xf32>
    %25 = vector.extract_strided_slice %14 {offsets = [0, 128], sizes = [2, 128], strides = [1, 1]} : vector<2x384xf32> to vector<2x128xf32>
    %26 = vector.extract_strided_slice %16 {offsets = [0, 128], sizes = [2, 128], strides = [1, 1]} : vector<2x384xf32> to vector<2x128xf32>
    %27 = arith.addf %25, %26 : vector<2x128xf32>
    %28 = arith.negf %27 : vector<2x128xf32>
    %29 = math.exp %28 : vector<2x128xf32>
    %cst_18 = arith.constant 1.000000e+00 : f32
    %30 = vector.broadcast %cst_18 : f32 to vector<2x128xf32>
    %31 = arith.addf %30, %29 : vector<2x128xf32>
    %32 = arith.divf %30, %31 : vector<2x128xf32>
    %33 = vector.extract_strided_slice %14 {offsets = [0, 256], sizes = [2, 128], strides = [1, 1]} : vector<2x384xf32> to vector<2x128xf32>
    %34 = vector.extract_strided_slice %16 {offsets = [0, 256], sizes = [2, 128], strides = [1, 1]} : vector<2x384xf32> to vector<2x128xf32>
    %35 = arith.mulf %24, %34 : vector<2x128xf32>
    %36 = arith.addf %33, %35 : vector<2x128xf32>
    %37 = math.tanh %36 : vector<2x128xf32>
    %38 = arith.subf %12, %37 : vector<2x128xf32>
    %39 = arith.mulf %32, %38 : vector<2x128xf32>
    %40 = arith.addf %37, %39 : vector<2x128xf32>
    %c0_19 = arith.constant 0 : index
    %c0_20 = arith.constant 0 : index
    %c0_21 = arith.constant 0 : index
    %41 = vector.load %arg13[%c0_19, %c0_20, %c0_21] : memref<2x8x128xf32, #tpu.memory_space<vmem>>, vector<2x1x128xf32>
    %42 = vector.shape_cast %41 : vector<2x1x128xf32> to vector<2x128xf32>
    %43 = vector.shape_cast %40 : vector<2x128xf32> to vector<2x1x128xf32>
    tpu.vector_store %arg13[%c0_19, %c0_20, %c0_21], %43 {strides = array<i32>} : memref<2x8x128xf32, #tpu.memory_space<vmem>>, vector<2x1x128xf32>,
    %c0_22 = arith.constant 0 : index
    %c1 = arith.constant 1 : index
    %c0_23 = arith.constant 0 : index
    %44 = vector.load %arg12[%c0_22, %c1, %c0_23] : memref<2x8x384xf32, #tpu.memory_space<vmem>>, vector<2x1x384xf32>
    %45 = vector.shape_cast %44 : vector<2x1x384xf32> to vector<2x384xf32>
    %cst_24 = arith.constant dense<0.000000e+00> : vector<2x384xf32>
    %46 = tpu.matmul %40, %8, %cst_24 {dimension_numbers = #tpu.dot_dimension_numbers<[1], [0], [0], [1], [0, 0, 1, 1], [], []>} : vector<2x128xf32>, vector<128x384xf32>, vector<2x384xf32> -> vector<2x384xf32>
    %47 = arith.addf %46, %11 : vector<2x384xf32>
    %48 = vector.extract_strided_slice %45 {offsets = [0, 0], sizes = [2, 128], strides = [1, 1]} : vector<2x384xf32> to vector<2x128xf32>
    %49 = vector.extract_strided_slice %47 {offsets = [0, 0], sizes = [2, 128], strides = [1, 1]} : vector<2x384xf32> to vector<2x128xf32>
    %50 = arith.addf %48, %49 : vector<2x128xf32>
    %51 = arith.negf %50 : vector<2x128xf32>
    %52 = math.exp %51 : vector<2x128xf32>
    %cst_25 = arith.constant 1.000000e+00 : f32
    %53 = vector.broadcast %cst_25 : f32 to vector<2x128xf32>
    %54 = arith.addf %53, %52 : vector<2x128xf32>
    %55 = arith.divf %53, %54 : vector<2x128xf32>
    %56 = vector.extract_strided_slice %45 {offsets = [0, 128], sizes = [2, 128], strides = [1, 1]} : vector<2x384xf32> to vector<2x128xf32>
    %57 = vector.extract_strided_slice %47 {offsets = [0, 128], sizes = [2, 128], strides = [1, 1]} : vector<2x384xf32> to vector<2x128xf32>
    %58 = arith.addf %56, %57 : vector<2x128xf32>
    %59 = arith.negf %58 : vector<2x128xf32>
    %60 = math.exp %59 : vector<2x128xf32>
    %cst_26 = arith.constant 1.000000e+00 : f32
    %61 = vector.broadcast %cst_26 : f32 to vector<2x128xf32>
    %62 = arith.addf %61, %60 : vector<2x128xf32>
    %63 = arith.divf %61, %62 : vector<2x128xf32>
    %64 = vector.extract_strided_slice %45 {offsets = [0, 256], sizes = [2, 128], strides = [1, 1]} : vector<2x384xf32> to vector<2x128xf32>
    %65 = vector.extract_strided_slice %47 {offsets = [0, 256], sizes = [2, 128], strides = [1, 1]} : vector<2x384xf32> to vector<2x128xf32>
    %66 = arith.mulf %55, %65 : vector<2x128xf32>
    %67 = arith.addf %64, %66 : vector<2x128xf32>
    %68 = math.tanh %67 : vector<2x128xf32>
    %69 = arith.subf %40, %68 : vector<2x128xf32>
    %70 = arith.mulf %63, %69 : vector<2x128xf32>
    %71 = arith.addf %68, %70 : vector<2x128xf32>
    %c0_27 = arith.constant 0 : index
    %c1_28 = arith.constant 1 : index
    %c0_29 = arith.constant 0 : index
    %72 = vector.load %arg13[%c0_27, %c1_28, %c0_29] : memref<2x8x128xf32, #tpu.memory_space<vmem>>, vector<2x1x128xf32>
    %73 = vector.shape_cast %72 : vector<2x1x128xf32> to vector<2x128xf32>
    %74 = vector.shape_cast %71 : vector<2x128xf32> to vector<2x1x128xf32>
    tpu.vector_store %arg13[%c0_27, %c1_28, %c0_29], %74 {strides = array<i32>} : memref<2x8x128xf32, #tpu.memory_space<vmem>>, vector<2x1x128xf32>,
    %c0_30 = arith.constant 0 : index
    %c2 = arith.constant 2 : index
    %c0_31 = arith.constant 0 : index
    %75 = vector.load %arg12[%c0_30, %c2, %c0_31] : memref<2x8x384xf32, #tpu.memory_space<vmem>>, vector<2x1x384xf32>
    %76 = vector.shape_cast %75 : vector<2x1x384xf32> to vector<2x384xf32>
    %cst_32 = arith.constant dense<0.000000e+00> : vector<2x384xf32>
    %77 = tpu.matmul %71, %8, %cst_32 {dimension_numbers = #tpu.dot_dimension_numbers<[1], [0], [0], [1], [0, 0, 1, 1], [], []>} : vector<2x128xf32>, vector<128x384xf32>, vector<2x384xf32> -> vector<2x384xf32>
    %78 = arith.addf %77, %11 : vector<2x384xf32>
    %79 = vector.extract_strided_slice %76 {offsets = [0, 0], sizes = [2, 128], strides = [1, 1]} : vector<2x384xf32> to vector<2x128xf32>
    %80 = vector.extract_strided_slice %78 {offsets = [0, 0], sizes = [2, 128], strides = [1, 1]} : vector<2x384xf32> to vector<2x128xf32>
    %81 = arith.addf %79, %80 : vector<2x128xf32>
    %82 = arith.negf %81 : vector<2x128xf32>
    %83 = math.exp %82 : vector<2x128xf32>
    %cst_33 = arith.constant 1.000000e+00 : f32
    %84 = vector.broadcast %cst_33 : f32 to vector<2x128xf32>
    %85 = arith.addf %84, %83 : vector<2x128xf32>
    %86 = arith.divf %84, %85 : vector<2x128xf32>
    %87 = vector.extract_strided_slice %76 {offsets = [0, 128], sizes = [2, 128], strides = [1, 1]} : vector<2x384xf32> to vector<2x128xf32>
    %88 = vector.extract_strided_slice %78 {offsets = [0, 128], sizes = [2, 128], strides = [1, 1]} : vector<2x384xf32> to vector<2x128xf32>
    %89 = arith.addf %87, %88 : vector<2x128xf32>
    %90 = arith.negf %89 : vector<2x128xf32>
    %91 = math.exp %90 : vector<2x128xf32>
    %cst_34 = arith.constant 1.000000e+00 : f32
    %92 = vector.broadcast %cst_34 : f32 to vector<2x128xf32>
    %93 = arith.addf %92, %91 : vector<2x128xf32>
    %94 = arith.divf %92, %93 : vector<2x128xf32>
    %95 = vector.extract_strided_slice %76 {offsets = [0, 256], sizes = [2, 128], strides = [1, 1]} : vector<2x384xf32> to vector<2x128xf32>
    %96 = vector.extract_strided_slice %78 {offsets = [0, 256], sizes = [2, 128], strides = [1, 1]} : vector<2x384xf32> to vector<2x128xf32>
    %97 = arith.mulf %86, %96 : vector<2x128xf32>
    %98 = arith.addf %95, %97 : vector<2x128xf32>
    %99 = math.tanh %98 : vector<2x128xf32>
    %100 = arith.subf %71, %99 : vector<2x128xf32>
    %101 = arith.mulf %94, %100 : vector<2x128xf32>
    %102 = arith.addf %99, %101 : vector<2x128xf32>
    %c0_35 = arith.constant 0 : index
    %c2_36 = arith.constant 2 : index
    %c0_37 = arith.constant 0 : index
    %103 = vector.load %arg13[%c0_35, %c2_36, %c0_37] : memref<2x8x128xf32, #tpu.memory_space<vmem>>, vector<2x1x128xf32>
    %104 = vector.shape_cast %103 : vector<2x1x128xf32> to vector<2x128xf32>
    %105 = vector.shape_cast %102 : vector<2x128xf32> to vector<2x1x128xf32>
    tpu.vector_store %arg13[%c0_35, %c2_36, %c0_37], %105 {strides = array<i32>} : memref<2x8x128xf32, #tpu.memory_space<vmem>>, vector<2x1x128xf32>,
    %c0_38 = arith.constant 0 : index
    %c3 = arith.constant 3 : index
    %c0_39 = arith.constant 0 : index
    %106 = vector.load %arg12[%c0_38, %c3, %c0_39] : memref<2x8x384xf32, #tpu.memory_space<vmem>>, vector<2x1x384xf32>
    %107 = vector.shape_cast %106 : vector<2x1x384xf32> to vector<2x384xf32>
    %cst_40 = arith.constant dense<0.000000e+00> : vector<2x384xf32>
    %108 = tpu.matmul %102, %8, %cst_40 {dimension_numbers = #tpu.dot_dimension_numbers<[1], [0], [0], [1], [0, 0, 1, 1], [], []>} : vector<2x128xf32>, vector<128x384xf32>, vector<2x384xf32> -> vector<2x384xf32>
    %109 = arith.addf %108, %11 : vector<2x384xf32>
    %110 = vector.extract_strided_slice %107 {offsets = [0, 0], sizes = [2, 128], strides = [1, 1]} : vector<2x384xf32> to vector<2x128xf32>
    %111 = vector.extract_strided_slice %109 {offsets = [0, 0], sizes = [2, 128], strides = [1, 1]} : vector<2x384xf32> to vector<2x128xf32>
    %112 = arith.addf %110, %111 : vector<2x128xf32>
    %113 = arith.negf %112 : vector<2x128xf32>
    %114 = math.exp %113 : vector<2x128xf32>
    %cst_41 = arith.constant 1.000000e+00 : f32
    %115 = vector.broadcast %cst_41 : f32 to vector<2x128xf32>
    %116 = arith.addf %115, %114 : vector<2x128xf32>
    %117 = arith.divf %115, %116 : vector<2x128xf32>
    %118 = vector.extract_strided_slice %107 {offsets = [0, 128], sizes = [2, 128], strides = [1, 1]} : vector<2x384xf32> to vector<2x128xf32>
    %119 = vector.extract_strided_slice %109 {offsets = [0, 128], sizes = [2, 128], strides = [1, 1]} : vector<2x384xf32> to vector<2x128xf32>
    %120 = arith.addf %118, %119 : vector<2x128xf32>
    %121 = arith.negf %120 : vector<2x128xf32>
    %122 = math.exp %121 : vector<2x128xf32>
    %cst_42 = arith.constant 1.000000e+00 : f32
    %123 = vector.broadcast %cst_42 : f32 to vector<2x128xf32>
    %124 = arith.addf %123, %122 : vector<2x128xf32>
    %125 = arith.divf %123, %124 : vector<2x128xf32>
    %126 = vector.extract_strided_slice %107 {offsets = [0, 256], sizes = [2, 128], strides = [1, 1]} : vector<2x384xf32> to vector<2x128xf32>
    %127 = vector.extract_strided_slice %109 {offsets = [0, 256], sizes = [2, 128], strides = [1, 1]} : vector<2x384xf32> to vector<2x128xf32>
    %128 = arith.mulf %117, %127 : vector<2x128xf32>
    %129 = arith.addf %126, %128 : vector<2x128xf32>
    %130 = math.tanh %129 : vector<2x128xf32>
    %131 = arith.subf %102, %130 : vector<2x128xf32>
    %132 = arith.mulf %125, %131 : vector<2x128xf32>
    %133 = arith.addf %130, %132 : vector<2x128xf32>
    %c0_43 = arith.constant 0 : index
    %c3_44 = arith.constant 3 : index
    %c0_45 = arith.constant 0 : index
    %134 = vector.load %arg13[%c0_43, %c3_44, %c0_45] : memref<2x8x128xf32, #tpu.memory_space<vmem>>, vector<2x1x128xf32>
    %135 = vector.shape_cast %134 : vector<2x1x128xf32> to vector<2x128xf32>
    %136 = vector.shape_cast %133 : vector<2x128xf32> to vector<2x1x128xf32>
    tpu.vector_store %arg13[%c0_43, %c3_44, %c0_45], %136 {strides = array<i32>} : memref<2x8x128xf32, #tpu.memory_space<vmem>>, vector<2x1x128xf32>,
    %c0_46 = arith.constant 0 : index
    %c4 = arith.constant 4 : index
    %c0_47 = arith.constant 0 : index
    %137 = vector.load %arg12[%c0_46, %c4, %c0_47] : memref<2x8x384xf32, #tpu.memory_space<vmem>>, vector<2x1x384xf32>
    %138 = vector.shape_cast %137 : vector<2x1x384xf32> to vector<2x384xf32>
    %cst_48 = arith.constant dense<0.000000e+00> : vector<2x384xf32>
    %139 = tpu.matmul %133, %8, %cst_48 {dimension_numbers = #tpu.dot_dimension_numbers<[1], [0], [0], [1], [0, 0, 1, 1], [], []>} : vector<2x128xf32>, vector<128x384xf32>, vector<2x384xf32> -> vector<2x384xf32>
    %140 = arith.addf %139, %11 : vector<2x384xf32>
    %141 = vector.extract_strided_slice %138 {offsets = [0, 0], sizes = [2, 128], strides = [1, 1]} : vector<2x384xf32> to vector<2x128xf32>
    %142 = vector.extract_strided_slice %140 {offsets = [0, 0], sizes = [2, 128], strides = [1, 1]} : vector<2x384xf32> to vector<2x128xf32>
    %143 = arith.addf %141, %142 : vector<2x128xf32>
    %144 = arith.negf %143 : vector<2x128xf32>
    %145 = math.exp %144 : vector<2x128xf32>
    %cst_49 = arith.constant 1.000000e+00 : f32
    %146 = vector.broadcast %cst_49 : f32 to vector<2x128xf32>
    %147 = arith.addf %146, %145 : vector<2x128xf32>
    %148 = arith.divf %146, %147 : vector<2x128xf32>
    %149 = vector.extract_strided_slice %138 {offsets = [0, 128], sizes = [2, 128], strides = [1, 1]} : vector<2x384xf32> to vector<2x128xf32>
    %150 = vector.extract_strided_slice %140 {offsets = [0, 128], sizes = [2, 128], strides = [1, 1]} : vector<2x384xf32> to vector<2x128xf32>
    %151 = arith.addf %149, %150 : vector<2x128xf32>
    %152 = arith.negf %151 : vector<2x128xf32>
    %153 = math.exp %152 : vector<2x128xf32>
    %cst_50 = arith.constant 1.000000e+00 : f32
    %154 = vector.broadcast %cst_50 : f32 to vector<2x128xf32>
    %155 = arith.addf %154, %153 : vector<2x128xf32>
    %156 = arith.divf %154, %155 : vector<2x128xf32>
    %157 = vector.extract_strided_slice %138 {offsets = [0, 256], sizes = [2, 128], strides = [1, 1]} : vector<2x384xf32> to vector<2x128xf32>
    %158 = vector.extract_strided_slice %140 {offsets = [0, 256], sizes = [2, 128], strides = [1, 1]} : vector<2x384xf32> to vector<2x128xf32>
    %159 = arith.mulf %148, %158 : vector<2x128xf32>
    %160 = arith.addf %157, %159 : vector<2x128xf32>
    %161 = math.tanh %160 : vector<2x128xf32>
    %162 = arith.subf %133, %161 : vector<2x128xf32>
    %163 = arith.mulf %156, %162 : vector<2x128xf32>
    %164 = arith.addf %161, %163 : vector<2x128xf32>
    %c0_51 = arith.constant 0 : index
    %c4_52 = arith.constant 4 : index
    %c0_53 = arith.constant 0 : index
    %165 = vector.load %arg13[%c0_51, %c4_52, %c0_53] : memref<2x8x128xf32, #tpu.memory_space<vmem>>, vector<2x1x128xf32>
    %166 = vector.shape_cast %165 : vector<2x1x128xf32> to vector<2x128xf32>
    %167 = vector.shape_cast %164 : vector<2x128xf32> to vector<2x1x128xf32>
    tpu.vector_store %arg13[%c0_51, %c4_52, %c0_53], %167 {strides = array<i32>} : memref<2x8x128xf32, #tpu.memory_space<vmem>>, vector<2x1x128xf32>,
    %c0_54 = arith.constant 0 : index
    %c5 = arith.constant 5 : index
    %c0_55 = arith.constant 0 : index
    %168 = vector.load %arg12[%c0_54, %c5, %c0_55] : memref<2x8x384xf32, #tpu.memory_space<vmem>>, vector<2x1x384xf32>
    %169 = vector.shape_cast %168 : vector<2x1x384xf32> to vector<2x384xf32>
    %cst_56 = arith.constant dense<0.000000e+00> : vector<2x384xf32>
    %170 = tpu.matmul %164, %8, %cst_56 {dimension_numbers = #tpu.dot_dimension_numbers<[1], [0], [0], [1], [0, 0, 1, 1], [], []>} : vector<2x128xf32>, vector<128x384xf32>, vector<2x384xf32> -> vector<2x384xf32>
    %171 = arith.addf %170, %11 : vector<2x384xf32>
    %172 = vector.extract_strided_slice %169 {offsets = [0, 0], sizes = [2, 128], strides = [1, 1]} : vector<2x384xf32> to vector<2x128xf32>
    %173 = vector.extract_strided_slice %171 {offsets = [0, 0], sizes = [2, 128], strides = [1, 1]} : vector<2x384xf32> to vector<2x128xf32>
    %174 = arith.addf %172, %173 : vector<2x128xf32>
    %175 = arith.negf %174 : vector<2x128xf32>
    %176 = math.exp %175 : vector<2x128xf32>
    %cst_57 = arith.constant 1.000000e+00 : f32
    %177 = vector.broadcast %cst_57 : f32 to vector<2x128xf32>
    %178 = arith.addf %177, %176 : vector<2x128xf32>
    %179 = arith.divf %177, %178 : vector<2x128xf32>
    %180 = vector.extract_strided_slice %169 {offsets = [0, 128], sizes = [2, 128], strides = [1, 1]} : vector<2x384xf32> to vector<2x128xf32>
    %181 = vector.extract_strided_slice %171 {offsets = [0, 128], sizes = [2, 128], strides = [1, 1]} : vector<2x384xf32> to vector<2x128xf32>
    %182 = arith.addf %180, %181 : vector<2x128xf32>
    %183 = arith.negf %182 : vector<2x128xf32>
    %184 = math.exp %183 : vector<2x128xf32>
    %cst_58 = arith.constant 1.000000e+00 : f32
    %185 = vector.broadcast %cst_58 : f32 to vector<2x128xf32>
    %186 = arith.addf %185, %184 : vector<2x128xf32>
    %187 = arith.divf %185, %186 : vector<2x128xf32>
    %188 = vector.extract_strided_slice %169 {offsets = [0, 256], sizes = [2, 128], strides = [1, 1]} : vector<2x384xf32> to vector<2x128xf32>
    %189 = vector.extract_strided_slice %171 {offsets = [0, 256], sizes = [2, 128], strides = [1, 1]} : vector<2x384xf32> to vector<2x128xf32>
    %190 = arith.mulf %179, %189 : vector<2x128xf32>
    %191 = arith.addf %188, %190 : vector<2x128xf32>
    %192 = math.tanh %191 : vector<2x128xf32>
    %193 = arith.subf %164, %192 : vector<2x128xf32>
    %194 = arith.mulf %187, %193 : vector<2x128xf32>
    %195 = arith.addf %192, %194 : vector<2x128xf32>
    %c0_59 = arith.constant 0 : index
    %c5_60 = arith.constant 5 : index
    %c0_61 = arith.constant 0 : index
    %196 = vector.load %arg13[%c0_59, %c5_60, %c0_61] : memref<2x8x128xf32, #tpu.memory_space<vmem>>, vector<2x1x128xf32>
    %197 = vector.shape_cast %196 : vector<2x1x128xf32> to vector<2x128xf32>
    %198 = vector.shape_cast %195 : vector<2x128xf32> to vector<2x1x128xf32>
    tpu.vector_store %arg13[%c0_59, %c5_60, %c0_61], %198 {strides = array<i32>} : memref<2x8x128xf32, #tpu.memory_space<vmem>>, vector<2x1x128xf32>,
    %c0_62 = arith.constant 0 : index
    %c6 = arith.constant 6 : index
    %c0_63 = arith.constant 0 : index
    %199 = vector.load %arg12[%c0_62, %c6, %c0_63] : memref<2x8x384xf32, #tpu.memory_space<vmem>>, vector<2x1x384xf32>
    %200 = vector.shape_cast %199 : vector<2x1x384xf32> to vector<2x384xf32>
    %cst_64 = arith.constant dense<0.000000e+00> : vector<2x384xf32>
    %201 = tpu.matmul %195, %8, %cst_64 {dimension_numbers = #tpu.dot_dimension_numbers<[1], [0], [0], [1], [0, 0, 1, 1], [], []>} : vector<2x128xf32>, vector<128x384xf32>, vector<2x384xf32> -> vector<2x384xf32>
    %202 = arith.addf %201, %11 : vector<2x384xf32>
    %203 = vector.extract_strided_slice %200 {offsets = [0, 0], sizes = [2, 128], strides = [1, 1]} : vector<2x384xf32> to vector<2x128xf32>
    %204 = vector.extract_strided_slice %202 {offsets = [0, 0], sizes = [2, 128], strides = [1, 1]} : vector<2x384xf32> to vector<2x128xf32>
    %205 = arith.addf %203, %204 : vector<2x128xf32>
    %206 = arith.negf %205 : vector<2x128xf32>
    %207 = math.exp %206 : vector<2x128xf32>
    %cst_65 = arith.constant 1.000000e+00 : f32
    %208 = vector.broadcast %cst_65 : f32 to vector<2x128xf32>
    %209 = arith.addf %208, %207 : vector<2x128xf32>
    %210 = arith.divf %208, %209 : vector<2x128xf32>
    %211 = vector.extract_strided_slice %200 {offsets = [0, 128], sizes = [2, 128], strides = [1, 1]} : vector<2x384xf32> to vector<2x128xf32>
    %212 = vector.extract_strided_slice %202 {offsets = [0, 128], sizes = [2, 128], strides = [1, 1]} : vector<2x384xf32> to vector<2x128xf32>
    %213 = arith.addf %211, %212 : vector<2x128xf32>
    %214 = arith.negf %213 : vector<2x128xf32>
    %215 = math.exp %214 : vector<2x128xf32>
    %cst_66 = arith.constant 1.000000e+00 : f32
    %216 = vector.broadcast %cst_66 : f32 to vector<2x128xf32>
    %217 = arith.addf %216, %215 : vector<2x128xf32>
    %218 = arith.divf %216, %217 : vector<2x128xf32>
    %219 = vector.extract_strided_slice %200 {offsets = [0, 256], sizes = [2, 128], strides = [1, 1]} : vector<2x384xf32> to vector<2x128xf32>
    %220 = vector.extract_strided_slice %202 {offsets = [0, 256], sizes = [2, 128], strides = [1, 1]} : vector<2x384xf32> to vector<2x128xf32>
    %221 = arith.mulf %210, %220 : vector<2x128xf32>
    %222 = arith.addf %219, %221 : vector<2x128xf32>
    %223 = math.tanh %222 : vector<2x128xf32>
    %224 = arith.subf %195, %223 : vector<2x128xf32>
    %225 = arith.mulf %218, %224 : vector<2x128xf32>
    %226 = arith.addf %223, %225 : vector<2x128xf32>
    %c0_67 = arith.constant 0 : index
    %c6_68 = arith.constant 6 : index
    %c0_69 = arith.constant 0 : index
    %227 = vector.load %arg13[%c0_67, %c6_68, %c0_69] : memref<2x8x128xf32, #tpu.memory_space<vmem>>, vector<2x1x128xf32>
    %228 = vector.shape_cast %227 : vector<2x1x128xf32> to vector<2x128xf32>
    %229 = vector.shape_cast %226 : vector<2x128xf32> to vector<2x1x128xf32>
    tpu.vector_store %arg13[%c0_67, %c6_68, %c0_69], %229 {strides = array<i32>} : memref<2x8x128xf32, #tpu.memory_space<vmem>>, vector<2x1x128xf32>,
    %c0_70 = arith.constant 0 : index
    %c7 = arith.constant 7 : index
    %c0_71 = arith.constant 0 : index
    %230 = vector.load %arg12[%c0_70, %c7, %c0_71] : memref<2x8x384xf32, #tpu.memory_space<vmem>>, vector<2x1x384xf32>
    %231 = vector.shape_cast %230 : vector<2x1x384xf32> to vector<2x384xf32>
    %cst_72 = arith.constant dense<0.000000e+00> : vector<2x384xf32>
    %232 = tpu.matmul %226, %8, %cst_72 {dimension_numbers = #tpu.dot_dimension_numbers<[1], [0], [0], [1], [0, 0, 1, 1], [], []>} : vector<2x128xf32>, vector<128x384xf32>, vector<2x384xf32> -> vector<2x384xf32>
    %233 = arith.addf %232, %11 : vector<2x384xf32>
    %234 = vector.extract_strided_slice %231 {offsets = [0, 0], sizes = [2, 128], strides = [1, 1]} : vector<2x384xf32> to vector<2x128xf32>
    %235 = vector.extract_strided_slice %233 {offsets = [0, 0], sizes = [2, 128], strides = [1, 1]} : vector<2x384xf32> to vector<2x128xf32>
    %236 = arith.addf %234, %235 : vector<2x128xf32>
    %237 = arith.negf %236 : vector<2x128xf32>
    %238 = math.exp %237 : vector<2x128xf32>
    %cst_73 = arith.constant 1.000000e+00 : f32
    %239 = vector.broadcast %cst_73 : f32 to vector<2x128xf32>
    %240 = arith.addf %239, %238 : vector<2x128xf32>
    %241 = arith.divf %239, %240 : vector<2x128xf32>
    %242 = vector.extract_strided_slice %231 {offsets = [0, 128], sizes = [2, 128], strides = [1, 1]} : vector<2x384xf32> to vector<2x128xf32>
    %243 = vector.extract_strided_slice %233 {offsets = [0, 128], sizes = [2, 128], strides = [1, 1]} : vector<2x384xf32> to vector<2x128xf32>
    %244 = arith.addf %242, %243 : vector<2x128xf32>
    %245 = arith.negf %244 : vector<2x128xf32>
    %246 = math.exp %245 : vector<2x128xf32>
    %cst_74 = arith.constant 1.000000e+00 : f32
    %247 = vector.broadcast %cst_74 : f32 to vector<2x128xf32>
    %248 = arith.addf %247, %246 : vector<2x128xf32>
    %249 = arith.divf %247, %248 : vector<2x128xf32>
    %250 = vector.extract_strided_slice %231 {offsets = [0, 256], sizes = [2, 128], strides = [1, 1]} : vector<2x384xf32> to vector<2x128xf32>
    %251 = vector.extract_strided_slice %233 {offsets = [0, 256], sizes = [2, 128], strides = [1, 1]} : vector<2x384xf32> to vector<2x128xf32>
    %252 = arith.mulf %241, %251 : vector<2x128xf32>
    %253 = arith.addf %250, %252 : vector<2x128xf32>
    %254 = math.tanh %253 : vector<2x128xf32>
    %255 = arith.subf %226, %254 : vector<2x128xf32>
    %256 = arith.mulf %249, %255 : vector<2x128xf32>
    %257 = arith.addf %254, %256 : vector<2x128xf32>
    %c0_75 = arith.constant 0 : index
    %c7_76 = arith.constant 7 : index
    %c0_77 = arith.constant 0 : index
    %258 = vector.load %arg13[%c0_75, %c7_76, %c0_77] : memref<2x8x128xf32, #tpu.memory_space<vmem>>, vector<2x1x128xf32>
    %259 = vector.shape_cast %258 : vector<2x1x128xf32> to vector<2x128xf32>
    %260 = vector.shape_cast %257 : vector<2x128xf32> to vector<2x1x128xf32>
    tpu.vector_store %arg13[%c0_75, %c7_76, %c0_77], %260 {strides = array<i32>} : memref<2x8x128xf32, #tpu.memory_space<vmem>>, vector<2x1x128xf32>,
    %c0_78 = arith.constant 0 : index
    %c0_79 = arith.constant 0 : index
    %c0_80 = arith.constant 0 : index
    %261 = vector.load %arg13[%c0_78, %c0_79, %c0_80] : memref<2x8x128xf32, #tpu.memory_space<vmem>>, vector<2x8x128xf32>
    %262 = vector.shape_cast %261 : vector<2x8x128xf32> to vector<16x128xf32>
    %c0_81 = arith.constant 0 : index
    %c0_82 = arith.constant 0 : index
    %263 = vector.load %arg5[%c0_81, %c0_82] : memref<128x384xf32, #tpu.memory_space<vmem>>, vector<128x384xf32>
    %cst_83 = arith.constant dense<0.000000e+00> : vector<16x384xf32>
    %264 = tpu.matmul %262, %263, %cst_83 {dimension_numbers = #tpu.dot_dimension_numbers<[1], [0], [0], [1], [0, 0, 1, 1], [], []>} : vector<16x128xf32>, vector<128x384xf32>, vector<16x384xf32> -> vector<16x384xf32>
    %c0_84 = arith.constant 0 : index
    %c0_85 = arith.constant 0 : index
    %265 = vector.load %arg7[%c0_84, %c0_85] : memref<1x384xf32, #tpu.memory_space<vmem>>, vector<1x384xf32>
    %266 = vector.broadcast %265 : vector<1x384xf32> to vector<16x384xf32>
    %267 = arith.addf %264, %266 : vector<16x384xf32>
    %268 = vector.shape_cast %267 : vector<16x384xf32> to vector<2x8x384xf32>
    %c0_86 = arith.constant 0 : index
    %c0_87 = arith.constant 0 : index
    %c0_88 = arith.constant 0 : index
    %269 = vector.load %arg12[%c0_86, %c0_87, %c0_88] : memref<2x8x384xf32, #tpu.memory_space<vmem>>, vector<2x8x384xf32>
    tpu.vector_store %arg12[%c0_86, %c0_87, %c0_88], %268 {strides = array<i32>} : memref<2x8x384xf32, #tpu.memory_space<vmem>>, vector<2x8x384xf32>,
    %c0_89 = arith.constant 0 : index
    %c0_90 = arith.constant 0 : index
    %270 = vector.load %arg6[%c0_89, %c0_90] : memref<128x384xf32, #tpu.memory_space<vmem>>, vector<128x384xf32>
    %c0_91 = arith.constant 0 : index
    %c0_92 = arith.constant 0 : index
    %271 = vector.load %arg8[%c0_91, %c0_92] : memref<1x384xf32, #tpu.memory_space<vmem>>, vector<1x384xf32>
    %272 = vector.shape_cast %271 : vector<1x384xf32> to vector<1x384xf32>
    %273 = vector.broadcast %272 : vector<1x384xf32> to vector<2x384xf32>
    %cst_93 = arith.constant 0.000000e+00 : f32
    %274 = vector.broadcast %cst_93 : f32 to vector<2x128xf32>
    %c0_94 = arith.constant 0 : index
    %c0_95 = arith.constant 0 : index
    %c0_96 = arith.constant 0 : index
    %275 = vector.load %arg12[%c0_94, %c0_95, %c0_96] : memref<2x8x384xf32, #tpu.memory_space<vmem>>, vector<2x1x384xf32>
    %276 = vector.shape_cast %275 : vector<2x1x384xf32> to vector<2x384xf32>
    %cst_97 = arith.constant dense<0.000000e+00> : vector<2x384xf32>
    %277 = tpu.matmul %274, %270, %cst_97 {dimension_numbers = #tpu.dot_dimension_numbers<[1], [0], [0], [1], [0, 0, 1, 1], [], []>} : vector<2x128xf32>, vector<128x384xf32>, vector<2x384xf32> -> vector<2x384xf32>
    %278 = arith.addf %277, %273 : vector<2x384xf32>
    %279 = vector.extract_strided_slice %276 {offsets = [0, 0], sizes = [2, 128], strides = [1, 1]} : vector<2x384xf32> to vector<2x128xf32>
    %280 = vector.extract_strided_slice %278 {offsets = [0, 0], sizes = [2, 128], strides = [1, 1]} : vector<2x384xf32> to vector<2x128xf32>
    %281 = arith.addf %279, %280 : vector<2x128xf32>
    %282 = arith.negf %281 : vector<2x128xf32>
    %283 = math.exp %282 : vector<2x128xf32>
    %cst_98 = arith.constant 1.000000e+00 : f32
    %284 = vector.broadcast %cst_98 : f32 to vector<2x128xf32>
    %285 = arith.addf %284, %283 : vector<2x128xf32>
    %286 = arith.divf %284, %285 : vector<2x128xf32>
    %287 = vector.extract_strided_slice %276 {offsets = [0, 128], sizes = [2, 128], strides = [1, 1]} : vector<2x384xf32> to vector<2x128xf32>
    %288 = vector.extract_strided_slice %278 {offsets = [0, 128], sizes = [2, 128], strides = [1, 1]} : vector<2x384xf32> to vector<2x128xf32>
    %289 = arith.addf %287, %288 : vector<2x128xf32>
    %290 = arith.negf %289 : vector<2x128xf32>
    %291 = math.exp %290 : vector<2x128xf32>
    %cst_99 = arith.constant 1.000000e+00 : f32
    %292 = vector.broadcast %cst_99 : f32 to vector<2x128xf32>
    %293 = arith.addf %292, %291 : vector<2x128xf32>
    %294 = arith.divf %292, %293 : vector<2x128xf32>
    %295 = vector.extract_strided_slice %276 {offsets = [0, 256], sizes = [2, 128], strides = [1, 1]} : vector<2x384xf32> to vector<2x128xf32>
    %296 = vector.extract_strided_slice %278 {offsets = [0, 256], sizes = [2, 128], strides = [1, 1]} : vector<2x384xf32> to vector<2x128xf32>
    %297 = arith.mulf %286, %296 : vector<2x128xf32>
    %298 = arith.addf %295, %297 : vector<2x128xf32>
    %299 = math.tanh %298 : vector<2x128xf32>
    %300 = arith.subf %274, %299 : vector<2x128xf32>
    %301 = arith.mulf %294, %300 : vector<2x128xf32>
    %302 = arith.addf %299, %301 : vector<2x128xf32>
    %c0_100 = arith.constant 0 : index
    %c1_101 = arith.constant 1 : index
    %c0_102 = arith.constant 0 : index
    %303 = vector.load %arg12[%c0_100, %c1_101, %c0_102] : memref<2x8x384xf32, #tpu.memory_space<vmem>>, vector<2x1x384xf32>
    %304 = vector.shape_cast %303 : vector<2x1x384xf32> to vector<2x384xf32>
    %cst_103 = arith.constant dense<0.000000e+00> : vector<2x384xf32>
    %305 = tpu.matmul %302, %270, %cst_103 {dimension_numbers = #tpu.dot_dimension_numbers<[1], [0], [0], [1], [0, 0, 1, 1], [], []>} : vector<2x128xf32>, vector<128x384xf32>, vector<2x384xf32> -> vector<2x384xf32>
    %306 = arith.addf %305, %273 : vector<2x384xf32>
    %307 = vector.extract_strided_slice %304 {offsets = [0, 0], sizes = [2, 128], strides = [1, 1]} : vector<2x384xf32> to vector<2x128xf32>
    %308 = vector.extract_strided_slice %306 {offsets = [0, 0], sizes = [2, 128], strides = [1, 1]} : vector<2x384xf32> to vector<2x128xf32>
    %309 = arith.addf %307, %308 : vector<2x128xf32>
    %310 = arith.negf %309 : vector<2x128xf32>
    %311 = math.exp %310 : vector<2x128xf32>
    %cst_104 = arith.constant 1.000000e+00 : f32
    %312 = vector.broadcast %cst_104 : f32 to vector<2x128xf32>
    %313 = arith.addf %312, %311 : vector<2x128xf32>
    %314 = arith.divf %312, %313 : vector<2x128xf32>
    %315 = vector.extract_strided_slice %304 {offsets = [0, 128], sizes = [2, 128], strides = [1, 1]} : vector<2x384xf32> to vector<2x128xf32>
    %316 = vector.extract_strided_slice %306 {offsets = [0, 128], sizes = [2, 128], strides = [1, 1]} : vector<2x384xf32> to vector<2x128xf32>
    %317 = arith.addf %315, %316 : vector<2x128xf32>
    %318 = arith.negf %317 : vector<2x128xf32>
    %319 = math.exp %318 : vector<2x128xf32>
    %cst_105 = arith.constant 1.000000e+00 : f32
    %320 = vector.broadcast %cst_105 : f32 to vector<2x128xf32>
    %321 = arith.addf %320, %319 : vector<2x128xf32>
    %322 = arith.divf %320, %321 : vector<2x128xf32>
    %323 = vector.extract_strided_slice %304 {offsets = [0, 256], sizes = [2, 128], strides = [1, 1]} : vector<2x384xf32> to vector<2x128xf32>
    %324 = vector.extract_strided_slice %306 {offsets = [0, 256], sizes = [2, 128], strides = [1, 1]} : vector<2x384xf32> to vector<2x128xf32>
    %325 = arith.mulf %314, %324 : vector<2x128xf32>
    %326 = arith.addf %323, %325 : vector<2x128xf32>
    %327 = math.tanh %326 : vector<2x128xf32>
    %328 = arith.subf %302, %327 : vector<2x128xf32>
    %329 = arith.mulf %322, %328 : vector<2x128xf32>
    %330 = arith.addf %327, %329 : vector<2x128xf32>
    %c0_106 = arith.constant 0 : index
    %c2_107 = arith.constant 2 : index
    %c0_108 = arith.constant 0 : index
    %331 = vector.load %arg12[%c0_106, %c2_107, %c0_108] : memref<2x8x384xf32, #tpu.memory_space<vmem>>, vector<2x1x384xf32>
    %332 = vector.shape_cast %331 : vector<2x1x384xf32> to vector<2x384xf32>
    %cst_109 = arith.constant dense<0.000000e+00> : vector<2x384xf32>
    %333 = tpu.matmul %330, %270, %cst_109 {dimension_numbers = #tpu.dot_dimension_numbers<[1], [0], [0], [1], [0, 0, 1, 1], [], []>} : vector<2x128xf32>, vector<128x384xf32>, vector<2x384xf32> -> vector<2x384xf32>
    %334 = arith.addf %333, %273 : vector<2x384xf32>
    %335 = vector.extract_strided_slice %332 {offsets = [0, 0], sizes = [2, 128], strides = [1, 1]} : vector<2x384xf32> to vector<2x128xf32>
    %336 = vector.extract_strided_slice %334 {offsets = [0, 0], sizes = [2, 128], strides = [1, 1]} : vector<2x384xf32> to vector<2x128xf32>
    %337 = arith.addf %335, %336 : vector<2x128xf32>
    %338 = arith.negf %337 : vector<2x128xf32>
    %339 = math.exp %338 : vector<2x128xf32>
    %cst_110 = arith.constant 1.000000e+00 : f32
    %340 = vector.broadcast %cst_110 : f32 to vector<2x128xf32>
    %341 = arith.addf %340, %339 : vector<2x128xf32>
    %342 = arith.divf %340, %341 : vector<2x128xf32>
    %343 = vector.extract_strided_slice %332 {offsets = [0, 128], sizes = [2, 128], strides = [1, 1]} : vector<2x384xf32> to vector<2x128xf32>
    %344 = vector.extract_strided_slice %334 {offsets = [0, 128], sizes = [2, 128], strides = [1, 1]} : vector<2x384xf32> to vector<2x128xf32>
    %345 = arith.addf %343, %344 : vector<2x128xf32>
    %346 = arith.negf %345 : vector<2x128xf32>
    %347 = math.exp %346 : vector<2x128xf32>
    %cst_111 = arith.constant 1.000000e+00 : f32
    %348 = vector.broadcast %cst_111 : f32 to vector<2x128xf32>
    %349 = arith.addf %348, %347 : vector<2x128xf32>
    %350 = arith.divf %348, %349 : vector<2x128xf32>
    %351 = vector.extract_strided_slice %332 {offsets = [0, 256], sizes = [2, 128], strides = [1, 1]} : vector<2x384xf32> to vector<2x128xf32>
    %352 = vector.extract_strided_slice %334 {offsets = [0, 256], sizes = [2, 128], strides = [1, 1]} : vector<2x384xf32> to vector<2x128xf32>
    %353 = arith.mulf %342, %352 : vector<2x128xf32>
    %354 = arith.addf %351, %353 : vector<2x128xf32>
    %355 = math.tanh %354 : vector<2x128xf32>
    %356 = arith.subf %330, %355 : vector<2x128xf32>
    %357 = arith.mulf %350, %356 : vector<2x128xf32>
    %358 = arith.addf %355, %357 : vector<2x128xf32>
    %c0_112 = arith.constant 0 : index
    %c3_113 = arith.constant 3 : index
    %c0_114 = arith.constant 0 : index
    %359 = vector.load %arg12[%c0_112, %c3_113, %c0_114] : memref<2x8x384xf32, #tpu.memory_space<vmem>>, vector<2x1x384xf32>
    %360 = vector.shape_cast %359 : vector<2x1x384xf32> to vector<2x384xf32>
    %cst_115 = arith.constant dense<0.000000e+00> : vector<2x384xf32>
    %361 = tpu.matmul %358, %270, %cst_115 {dimension_numbers = #tpu.dot_dimension_numbers<[1], [0], [0], [1], [0, 0, 1, 1], [], []>} : vector<2x128xf32>, vector<128x384xf32>, vector<2x384xf32> -> vector<2x384xf32>
    %362 = arith.addf %361, %273 : vector<2x384xf32>
    %363 = vector.extract_strided_slice %360 {offsets = [0, 0], sizes = [2, 128], strides = [1, 1]} : vector<2x384xf32> to vector<2x128xf32>
    %364 = vector.extract_strided_slice %362 {offsets = [0, 0], sizes = [2, 128], strides = [1, 1]} : vector<2x384xf32> to vector<2x128xf32>
    %365 = arith.addf %363, %364 : vector<2x128xf32>
    %366 = arith.negf %365 : vector<2x128xf32>
    %367 = math.exp %366 : vector<2x128xf32>
    %cst_116 = arith.constant 1.000000e+00 : f32
    %368 = vector.broadcast %cst_116 : f32 to vector<2x128xf32>
    %369 = arith.addf %368, %367 : vector<2x128xf32>
    %370 = arith.divf %368, %369 : vector<2x128xf32>
    %371 = vector.extract_strided_slice %360 {offsets = [0, 128], sizes = [2, 128], strides = [1, 1]} : vector<2x384xf32> to vector<2x128xf32>
    %372 = vector.extract_strided_slice %362 {offsets = [0, 128], sizes = [2, 128], strides = [1, 1]} : vector<2x384xf32> to vector<2x128xf32>
    %373 = arith.addf %371, %372 : vector<2x128xf32>
    %374 = arith.negf %373 : vector<2x128xf32>
    %375 = math.exp %374 : vector<2x128xf32>
    %cst_117 = arith.constant 1.000000e+00 : f32
    %376 = vector.broadcast %cst_117 : f32 to vector<2x128xf32>
    %377 = arith.addf %376, %375 : vector<2x128xf32>
    %378 = arith.divf %376, %377 : vector<2x128xf32>
    %379 = vector.extract_strided_slice %360 {offsets = [0, 256], sizes = [2, 128], strides = [1, 1]} : vector<2x384xf32> to vector<2x128xf32>
    %380 = vector.extract_strided_slice %362 {offsets = [0, 256], sizes = [2, 128], strides = [1, 1]} : vector<2x384xf32> to vector<2x128xf32>
    %381 = arith.mulf %370, %380 : vector<2x128xf32>
    %382 = arith.addf %379, %381 : vector<2x128xf32>
    %383 = math.tanh %382 : vector<2x128xf32>
    %384 = arith.subf %358, %383 : vector<2x128xf32>
    %385 = arith.mulf %378, %384 : vector<2x128xf32>
    %386 = arith.addf %383, %385 : vector<2x128xf32>
    %c0_118 = arith.constant 0 : index
    %c4_119 = arith.constant 4 : index
    %c0_120 = arith.constant 0 : index
    %387 = vector.load %arg12[%c0_118, %c4_119, %c0_120] : memref<2x8x384xf32, #tpu.memory_space<vmem>>, vector<2x1x384xf32>
    %388 = vector.shape_cast %387 : vector<2x1x384xf32> to vector<2x384xf32>
    %cst_121 = arith.constant dense<0.000000e+00> : vector<2x384xf32>
    %389 = tpu.matmul %386, %270, %cst_121 {dimension_numbers = #tpu.dot_dimension_numbers<[1], [0], [0], [1], [0, 0, 1, 1], [], []>} : vector<2x128xf32>, vector<128x384xf32>, vector<2x384xf32> -> vector<2x384xf32>
    %390 = arith.addf %389, %273 : vector<2x384xf32>
    %391 = vector.extract_strided_slice %388 {offsets = [0, 0], sizes = [2, 128], strides = [1, 1]} : vector<2x384xf32> to vector<2x128xf32>
    %392 = vector.extract_strided_slice %390 {offsets = [0, 0], sizes = [2, 128], strides = [1, 1]} : vector<2x384xf32> to vector<2x128xf32>
    %393 = arith.addf %391, %392 : vector<2x128xf32>
    %394 = arith.negf %393 : vector<2x128xf32>
    %395 = math.exp %394 : vector<2x128xf32>
    %cst_122 = arith.constant 1.000000e+00 : f32
    %396 = vector.broadcast %cst_122 : f32 to vector<2x128xf32>
    %397 = arith.addf %396, %395 : vector<2x128xf32>
    %398 = arith.divf %396, %397 : vector<2x128xf32>
    %399 = vector.extract_strided_slice %388 {offsets = [0, 128], sizes = [2, 128], strides = [1, 1]} : vector<2x384xf32> to vector<2x128xf32>
    %400 = vector.extract_strided_slice %390 {offsets = [0, 128], sizes = [2, 128], strides = [1, 1]} : vector<2x384xf32> to vector<2x128xf32>
    %401 = arith.addf %399, %400 : vector<2x128xf32>
    %402 = arith.negf %401 : vector<2x128xf32>
    %403 = math.exp %402 : vector<2x128xf32>
    %cst_123 = arith.constant 1.000000e+00 : f32
    %404 = vector.broadcast %cst_123 : f32 to vector<2x128xf32>
    %405 = arith.addf %404, %403 : vector<2x128xf32>
    %406 = arith.divf %404, %405 : vector<2x128xf32>
    %407 = vector.extract_strided_slice %388 {offsets = [0, 256], sizes = [2, 128], strides = [1, 1]} : vector<2x384xf32> to vector<2x128xf32>
    %408 = vector.extract_strided_slice %390 {offsets = [0, 256], sizes = [2, 128], strides = [1, 1]} : vector<2x384xf32> to vector<2x128xf32>
    %409 = arith.mulf %398, %408 : vector<2x128xf32>
    %410 = arith.addf %407, %409 : vector<2x128xf32>
    %411 = math.tanh %410 : vector<2x128xf32>
    %412 = arith.subf %386, %411 : vector<2x128xf32>
    %413 = arith.mulf %406, %412 : vector<2x128xf32>
    %414 = arith.addf %411, %413 : vector<2x128xf32>
    %c0_124 = arith.constant 0 : index
    %c5_125 = arith.constant 5 : index
    %c0_126 = arith.constant 0 : index
    %415 = vector.load %arg12[%c0_124, %c5_125, %c0_126] : memref<2x8x384xf32, #tpu.memory_space<vmem>>, vector<2x1x384xf32>
    %416 = vector.shape_cast %415 : vector<2x1x384xf32> to vector<2x384xf32>
    %cst_127 = arith.constant dense<0.000000e+00> : vector<2x384xf32>
    %417 = tpu.matmul %414, %270, %cst_127 {dimension_numbers = #tpu.dot_dimension_numbers<[1], [0], [0], [1], [0, 0, 1, 1], [], []>} : vector<2x128xf32>, vector<128x384xf32>, vector<2x384xf32> -> vector<2x384xf32>
    %418 = arith.addf %417, %273 : vector<2x384xf32>
    %419 = vector.extract_strided_slice %416 {offsets = [0, 0], sizes = [2, 128], strides = [1, 1]} : vector<2x384xf32> to vector<2x128xf32>
    %420 = vector.extract_strided_slice %418 {offsets = [0, 0], sizes = [2, 128], strides = [1, 1]} : vector<2x384xf32> to vector<2x128xf32>
    %421 = arith.addf %419, %420 : vector<2x128xf32>
    %422 = arith.negf %421 : vector<2x128xf32>
    %423 = math.exp %422 : vector<2x128xf32>
    %cst_128 = arith.constant 1.000000e+00 : f32
    %424 = vector.broadcast %cst_128 : f32 to vector<2x128xf32>
    %425 = arith.addf %424, %423 : vector<2x128xf32>
    %426 = arith.divf %424, %425 : vector<2x128xf32>
    %427 = vector.extract_strided_slice %416 {offsets = [0, 128], sizes = [2, 128], strides = [1, 1]} : vector<2x384xf32> to vector<2x128xf32>
    %428 = vector.extract_strided_slice %418 {offsets = [0, 128], sizes = [2, 128], strides = [1, 1]} : vector<2x384xf32> to vector<2x128xf32>
    %429 = arith.addf %427, %428 : vector<2x128xf32>
    %430 = arith.negf %429 : vector<2x128xf32>
    %431 = math.exp %430 : vector<2x128xf32>
    %cst_129 = arith.constant 1.000000e+00 : f32
    %432 = vector.broadcast %cst_129 : f32 to vector<2x128xf32>
    %433 = arith.addf %432, %431 : vector<2x128xf32>
    %434 = arith.divf %432, %433 : vector<2x128xf32>
    %435 = vector.extract_strided_slice %416 {offsets = [0, 256], sizes = [2, 128], strides = [1, 1]} : vector<2x384xf32> to vector<2x128xf32>
    %436 = vector.extract_strided_slice %418 {offsets = [0, 256], sizes = [2, 128], strides = [1, 1]} : vector<2x384xf32> to vector<2x128xf32>
    %437 = arith.mulf %426, %436 : vector<2x128xf32>
    %438 = arith.addf %435, %437 : vector<2x128xf32>
    %439 = math.tanh %438 : vector<2x128xf32>
    %440 = arith.subf %414, %439 : vector<2x128xf32>
    %441 = arith.mulf %434, %440 : vector<2x128xf32>
    %442 = arith.addf %439, %441 : vector<2x128xf32>
    %c0_130 = arith.constant 0 : index
    %c6_131 = arith.constant 6 : index
    %c0_132 = arith.constant 0 : index
    %443 = vector.load %arg12[%c0_130, %c6_131, %c0_132] : memref<2x8x384xf32, #tpu.memory_space<vmem>>, vector<2x1x384xf32>
    %444 = vector.shape_cast %443 : vector<2x1x384xf32> to vector<2x384xf32>
    %cst_133 = arith.constant dense<0.000000e+00> : vector<2x384xf32>
    %445 = tpu.matmul %442, %270, %cst_133 {dimension_numbers = #tpu.dot_dimension_numbers<[1], [0], [0], [1], [0, 0, 1, 1], [], []>} : vector<2x128xf32>, vector<128x384xf32>, vector<2x384xf32> -> vector<2x384xf32>
    %446 = arith.addf %445, %273 : vector<2x384xf32>
    %447 = vector.extract_strided_slice %444 {offsets = [0, 0], sizes = [2, 128], strides = [1, 1]} : vector<2x384xf32> to vector<2x128xf32>
    %448 = vector.extract_strided_slice %446 {offsets = [0, 0], sizes = [2, 128], strides = [1, 1]} : vector<2x384xf32> to vector<2x128xf32>
    %449 = arith.addf %447, %448 : vector<2x128xf32>
    %450 = arith.negf %449 : vector<2x128xf32>
    %451 = math.exp %450 : vector<2x128xf32>
    %cst_134 = arith.constant 1.000000e+00 : f32
    %452 = vector.broadcast %cst_134 : f32 to vector<2x128xf32>
    %453 = arith.addf %452, %451 : vector<2x128xf32>
    %454 = arith.divf %452, %453 : vector<2x128xf32>
    %455 = vector.extract_strided_slice %444 {offsets = [0, 128], sizes = [2, 128], strides = [1, 1]} : vector<2x384xf32> to vector<2x128xf32>
    %456 = vector.extract_strided_slice %446 {offsets = [0, 128], sizes = [2, 128], strides = [1, 1]} : vector<2x384xf32> to vector<2x128xf32>
    %457 = arith.addf %455, %456 : vector<2x128xf32>
    %458 = arith.negf %457 : vector<2x128xf32>
    %459 = math.exp %458 : vector<2x128xf32>
    %cst_135 = arith.constant 1.000000e+00 : f32
    %460 = vector.broadcast %cst_135 : f32 to vector<2x128xf32>
    %461 = arith.addf %460, %459 : vector<2x128xf32>
    %462 = arith.divf %460, %461 : vector<2x128xf32>
    %463 = vector.extract_strided_slice %444 {offsets = [0, 256], sizes = [2, 128], strides = [1, 1]} : vector<2x384xf32> to vector<2x128xf32>
    %464 = vector.extract_strided_slice %446 {offsets = [0, 256], sizes = [2, 128], strides = [1, 1]} : vector<2x384xf32> to vector<2x128xf32>
    %465 = arith.mulf %454, %464 : vector<2x128xf32>
    %466 = arith.addf %463, %465 : vector<2x128xf32>
    %467 = math.tanh %466 : vector<2x128xf32>
    %468 = arith.subf %442, %467 : vector<2x128xf32>
    %469 = arith.mulf %462, %468 : vector<2x128xf32>
    %470 = arith.addf %467, %469 : vector<2x128xf32>
    %c0_136 = arith.constant 0 : index
    %c7_137 = arith.constant 7 : index
    %c0_138 = arith.constant 0 : index
    %471 = vector.load %arg12[%c0_136, %c7_137, %c0_138] : memref<2x8x384xf32, #tpu.memory_space<vmem>>, vector<2x1x384xf32>
    %472 = vector.shape_cast %471 : vector<2x1x384xf32> to vector<2x384xf32>
    %cst_139 = arith.constant dense<0.000000e+00> : vector<2x384xf32>
    %473 = tpu.matmul %470, %270, %cst_139 {dimension_numbers = #tpu.dot_dimension_numbers<[1], [0], [0], [1], [0, 0, 1, 1], [], []>} : vector<2x128xf32>, vector<128x384xf32>, vector<2x384xf32> -> vector<2x384xf32>
    %474 = arith.addf %473, %273 : vector<2x384xf32>
    %475 = vector.extract_strided_slice %472 {offsets = [0, 0], sizes = [2, 128], strides = [1, 1]} : vector<2x384xf32> to vector<2x128xf32>
    %476 = vector.extract_strided_slice %474 {offsets = [0, 0], sizes = [2, 128], strides = [1, 1]} : vector<2x384xf32> to vector<2x128xf32>
    %477 = arith.addf %475, %476 : vector<2x128xf32>
    %478 = arith.negf %477 : vector<2x128xf32>
    %479 = math.exp %478 : vector<2x128xf32>
    %cst_140 = arith.constant 1.000000e+00 : f32
    %480 = vector.broadcast %cst_140 : f32 to vector<2x128xf32>
    %481 = arith.addf %480, %479 : vector<2x128xf32>
    %482 = arith.divf %480, %481 : vector<2x128xf32>
    %483 = vector.extract_strided_slice %472 {offsets = [0, 128], sizes = [2, 128], strides = [1, 1]} : vector<2x384xf32> to vector<2x128xf32>
    %484 = vector.extract_strided_slice %474 {offsets = [0, 128], sizes = [2, 128], strides = [1, 1]} : vector<2x384xf32> to vector<2x128xf32>
    %485 = arith.addf %483, %484 : vector<2x128xf32>
    %486 = arith.negf %485 : vector<2x128xf32>
    %487 = math.exp %486 : vector<2x128xf32>
    %cst_141 = arith.constant 1.000000e+00 : f32
    %488 = vector.broadcast %cst_141 : f32 to vector<2x128xf32>
    %489 = arith.addf %488, %487 : vector<2x128xf32>
    %490 = arith.divf %488, %489 : vector<2x128xf32>
    %491 = vector.extract_strided_slice %472 {offsets = [0, 256], sizes = [2, 128], strides = [1, 1]} : vector<2x384xf32> to vector<2x128xf32>
    %492 = vector.extract_strided_slice %474 {offsets = [0, 256], sizes = [2, 128], strides = [1, 1]} : vector<2x384xf32> to vector<2x128xf32>
    %493 = arith.mulf %482, %492 : vector<2x128xf32>
    %494 = arith.addf %491, %493 : vector<2x128xf32>
    %495 = math.tanh %494 : vector<2x128xf32>
    %496 = arith.subf %470, %495 : vector<2x128xf32>
    %497 = arith.mulf %490, %496 : vector<2x128xf32>
    %498 = arith.addf %495, %497 : vector<2x128xf32>
    %cst_142 = arith.constant 0.000000e+00 : f32
    %499 = vector.broadcast %cst_142 : f32 to vector<2x128xf32>
    %500 = arith.maximumf %498, %499 : vector<2x128xf32>
    %c0_143 = arith.constant 0 : index
    %c0_144 = arith.constant 0 : index
    %501 = vector.load %arg9[%c0_143, %c0_144] : memref<128x8xf32, #tpu.memory_space<vmem>>, vector<128x8xf32>
    %cst_145 = arith.constant dense<0.000000e+00> : vector<2x8xf32>
    %502 = tpu.matmul %500, %501, %cst_145 {dimension_numbers = #tpu.dot_dimension_numbers<[1], [0], [0], [1], [0, 0, 1, 1], [], []>} : vector<2x128xf32>, vector<128x8xf32>, vector<2x8xf32> -> vector<2x8xf32>
    %c0_146 = arith.constant 0 : index
    %c0_147 = arith.constant 0 : index
    %503 = vector.load %arg10[%c0_146, %c0_147] : memref<1x8xf32, #tpu.memory_space<vmem>>, vector<1x8xf32>
    %504 = vector.broadcast %503 : vector<1x8xf32> to vector<2x8xf32>
    %505 = arith.addf %502, %504 : vector<2x8xf32>
    %c0_148 = arith.constant 0 : index
    %c0_149 = arith.constant 0 : index
    %506 = vector.load %arg11[%c0_148, %c0_149] : memref<2x8xf32, #tpu.memory_space<vmem>>, vector<2x8xf32>
    tpu.vector_store %arg11[%c0_148, %c0_149], %505 {strides = array<i32>} : memref<2x8xf32, #tpu.memory_space<vmem>>, vector<2x8xf32>,
    return
  }
}

</mosaic_0001>

<bundles_post_ra>
// kernel: gru_net_forward.1
= control target key start
LH: loop header
LB: loop body
LE: loop exit
PB: predicated region body
PF: predicated region fallthrough
CT: control target
= control target key end

     0   :  { %16 = vsyncpa [#allocation5], 0  ;;  %s9039_s0 = inlined_call_operand.vmem [shape: f32[16,16], index: 0, kind: input, shape index: {}]   ;;  %s9040_s1 = inlined_call_operand.vmem [shape: f32[16,384], index: 1, kind: input, shape index: {}]   ;;  %s9041_s2 = inlined_call_operand.hbm [shape: f32[128,384], index: 2, kind: input, shape index: {}]   ;;  %s9042_s3 = inlined_call_operand.vmem [shape: f32[1,384], index: 3, kind: input, shape index: {}]   ;;  %s9043_s4 = inlined_call_operand.vmem [shape: f32[1,384], index: 4, kind: input, shape index: {}]   ;;  %s9044_s5 = inlined_call_operand.hbm [shape: f32[128,384], index: 5, kind: input, shape index: {}]   ;;  %s9045_s6 = inlined_call_operand.hbm [shape: f32[128,384], index: 6, kind: input, shape index: {}]   ;;  %s9046_s7 = inlined_call_operand.vmem [shape: f32[1,384], index: 7, kind: input, shape index: {}]   ;;  %s9047_s8 = inlined_call_operand.vmem [shape: f32[1,384], index: 8, kind: input, shape index: {}]   ;;  %s9048_s9 = inlined_call_operand.vmem [shape: f32[128,8], index: 9, kind: input, shape index: {}]   ;;  %s9049_s10 = inlined_call_operand.vmem [shape: f32[1,8], index: 10, kind: input, shape index: {}]   ;;  %s9050_s11 = inlined_call_operand.hbm [shape: f32[2,8], index: 11, kind: output, shape index: {}]  }
   0x1   :  { %17 = vsyncpa [#allocation8], 0 }
   0x2   :  { %18 = vsyncpa [#allocation6], 0  ;;  %s7760_s17 = smov [#allocation7]   ;;  %s7761_s19 = smov [#allocation4]  }
   0x3   :  { %s44_s18 = sshll.u32 %s7760_s17, 4  ;;  %s28_s20 = sshll.u32 %s7761_s19, 4  ;;  %s45_s18 = int_to_ptr.vmem [resolvable:$true] %s44_s18  ;;  %s7830_s20 = int_to_ptr.vmem [resolvable:$true] %s28_s20 }
   0x4   :  { %s7666_s23 = scalar_lea.hbm %s9044_s5, 6144 }
   0x5   :  { %p7667_p0 = scmp.ne.s32.totalorder %s9044_s5, %s7666_s23  ;;  %p7670_p1 = scmp.lt.u32.totalorder %s7666_s23, %s9044_s5 }
   0x7   :  { %p7672_p2 = pnand %p7670_p1, %p7667_p0 }
   0x9   :  { %7675 = shalt.err (!%p7672_p2)
}
   0xa   :  { %s7676_s28 = scalar_lea.vmem %s45_s18, 6144  ;;  %p7681_p4 = scmp.lt.s32.totalorder %s45_s18, %s45_s18 }
   0xb   :  { %p7677_p3 = scmp.ne.s32.totalorder %s45_s18, %s7676_s28  ;;  %p7682_p5 = scmp.lt.s32.totalorder %s7676_s28, %s7676_s28 }
   0xd   :  { %p7683_p6 = por %p7682_p5, %p7681_p4 }
   0xf   :  { %p7684_p7 = pnand %p7683_p6, %p7677_p3 }
  0x11   :  { %7687 = shalt.err (!%p7684_p7)
}
  0x12   :  { %s7762_s29 = smov 384   ;;  %s7763_s30 = smov 24  }
  0x13   :  { %50 = dma.hbm_to_vmem [thread:$0]  %s9044_s5, 6144, %s45_s18, [#allocation8], %s7762_s29, %s7762_s29, %s7763_s30  }
  0x14   :  { %s7688_s16 = scalar_lea.hbm %s9041_s2, 6144 }
  0x15   :  { %p7689_p8 = scmp.ne.s32.totalorder %s9041_s2, %s7688_s16  ;;  %p7692_p9 = scmp.lt.u32.totalorder %s7688_s16, %s9041_s2 }
  0x17   :  { %p7694_p10 = pnand %p7692_p9, %p7689_p8 }
  0x19   :  { %7697 = shalt.err (!%p7694_p10)
}
  0x1a   :  { %s7698_s23 = scalar_lea.vmem %s7830_s20, 6144  ;;  %p7703_p12 = scmp.lt.s32.totalorder %s7830_s20, %s7830_s20 }
  0x1b   :  { %p7699_p11 = scmp.ne.s32.totalorder %s7830_s20, %s7698_s23  ;;  %p7704_p13 = scmp.lt.s32.totalorder %s7698_s23, %s7698_s23 }
  0x1d   :  { %p7705_p0 = por %p7704_p13, %p7703_p12 }
  0x1f   :  { %p7706_p1 = pnand %p7705_p0, %p7699_p11 }
  0x21   :  { %7709 = shalt.err (!%p7706_p1)
}
  0x22   :  { %34 = dma.hbm_to_vmem [thread:$0]  %s9041_s2, 6144, %s7830_s20, [#allocation5], %s7762_s29, %s7762_s29, %s7763_s30  }
  0x23   :  { %s7764_s24 = smov [#allocation9]   ;;  %s7710_s28 = scalar_lea.hbm %s9045_s6, 6144 }
  0x24   :  { %s56_s25 = sshll.u32 %s7764_s24, 4  ;;  %p7711_p2 = scmp.ne.s32.totalorder %s9045_s6, %s7710_s28  ;;  %s57_s25 = int_to_ptr.vmem [resolvable:$true] %s56_s25 }
  0x25   :  { %p7714_p3 = scmp.lt.u32.totalorder %s7710_s28, %s9045_s6 }
  0x27   :  { %p7716_p4 = pnand %p7714_p3, %p7711_p2 }
  0x29   :  { %7719 = shalt.err (!%p7716_p4)
}
  0x2a   :  { %s7720_s16 = scalar_lea.vmem %s57_s25, 6144  ;;  %p7725_p6 = scmp.lt.s32.totalorder %s57_s25, %s57_s25 }
  0x2b   :  { %p7721_p5 = scmp.ne.s32.totalorder %s57_s25, %s7720_s16  ;;  %p7726_p7 = scmp.lt.s32.totalorder %s7720_s16, %s7720_s16 }
  0x2d   :  { %p7727_p8 = por %p7726_p7, %p7725_p6 }
  0x2f   :  { %p7728_p9 = pnand %p7727_p8, %p7721_p5 }
  0x31   :  { %7731 = shalt.err (!%p7728_p9)
}
  0x32   :  { %62 = dma.hbm_to_vmem [thread:$0]  %s9045_s6, 6144, %s57_s25, [#allocation8], %s7762_s29, %s7762_s29, %s7763_s30  }
  0x33   :  { %7754 = dma.done.wait [#allocation5], 6144  }
  0x34   :  { %7755 = vsyncadd [#allocation5], 4294961152 }
  0x35   :  { %7756 = dma.done.wait [#allocation8], 12288  }
  0x36   :  { %7757 = vsyncadd [#allocation8], 4294955008  ;;  %v7765_v0 = vmov 0.0   ;;  %v271_v1 = vld [vmem:[#allocation4 + $0x8] sm:$0xff]  ;;  %v274_v2 = vld [vmem:[#allocation4 + $0x20] sm:$0xff]  ;;  %vm105_vm0 = vcmask 130048  }
  0x37   :  { %176 = vmatprep.mubr.f32.mxu1 %v7765_v0  ;;  %402 = vmatprep.mubr.f32.mxu0 %v7765_v0  ;;  %v270_v3 = vld [vmem:[#allocation4] sm:$0xff]  ;;  %v7884_v4 = vpack.c.bf16 %v274_v2, %v271_v1  ;;  %v273_v5 = vld [vmem:[#allocation4 + $0x18] sm:$0xff]  ;;  %v280_v7 = vld [vmem:[#allocation4 + $0x50] sm:$0xff]  ;;  %v7766_v38 = vmov 0.0|0.0   ;;  %vm7767_vm1 = vmmov 0   ;;  %s7769_s29 = smov [#allocation10]  }
  0x38   :  { %v277_v6 = vld [vmem:[#allocation4 + $0x38] sm:$0xff]  ;;  %v7886_v8 = vpack.c.bf16 %v273_v5, %v270_v3  ;;  %v276_v10 = vld [vmem:[#allocation4 + $0x30] sm:$0xff]  ;;  %v279_v11 = vld [vmem:[#allocation4 + $0x48] sm:$0xff]  ;;  %s5317_s30 = sshll.u32 %s7769_s29, 4  ;;  %vm5309_vm2 = vcmask 58368   ;;  %s5318_s30 = int_to_ptr.vmem [resolvable:$true] %s5317_s30 }
  0x39   :  { %v7888_v9 = vpack.c.bf16 %v280_v7, %v277_v6  ;;  %v83_v12 = vld [vmem:[%s9040_s1 + $0x8] sm:$0xff]  ;;  %6353 = vmatprep.subr.bf16.mxu0 %v7884_v4  ;;  %v86_v13 = vld [vmem:[%s9040_s1 + $0x20] sm:$0xff]  ;;  %v7898_v16 = vpack.c.bf16 %v279_v11, %v276_v10  ;;  %v85_v19 = vld [vmem:[%s9040_s1 + $0x18] sm:$0xff]  ;;  %s7732_s17 = scalar_lea.vmem %s5318_s30, 32  ;;  %p7737_p11 = scmp.lt.s32.totalorder %s5318_s30, %s5318_s30 }
  0x3a   :  { %v283_v14 = vld [vmem:[#allocation4 + $0x68] sm:$0xff]  ;;  %v286_v15 = vld [vmem:[#allocation4 + $0x80] sm:$0xff]  ;;  %6355 = vmatpush1.bf16.msra.mxu0 %v7886_v8  ;;  %v6344_v17 = vpack.c.bf16 %v86_v13, %v83_v12  ;;  %v285_v23 = vld [vmem:[#allocation4 + $0x78] sm:$0xff]  ;;  %p7733_p10 = scmp.ne.s32.totalorder %s5318_s30, %s7732_s17  ;;  %p7738_p12 = scmp.lt.s32.totalorder %s7732_s17, %s7732_s17 }
  0x3b   :  { %v82_v18 = vld [vmem:[%s9040_s1] sm:$0xff]  ;;  %6357 = vmatprep.subr.bf16.mxu0 %v7888_v9  ;;  %v7907_v20 = vpack.c.bf16 %v286_v15, %v283_v14  ;;  %v289_v24 = vld [vmem:[#allocation4 + $0x98] sm:$0xff]  ;;  %v292_v25 = vld [vmem:[#allocation4 + $0xb0] sm:$0xff] }
  0x3c   :  { %v6346_v21 = vpack.c.bf16 %v85_v19, %v82_v18  ;;  %v282_v22 = vld [vmem:[#allocation4 + $0x60] sm:$0xff]  ;;  %6345 = vmatprep.subr.bf16.mxu1 %v6344_v17  ;;  %v84_v27 = vld [vmem:[%s9040_s1 + $0x10] sm:$0xff]  ;;  %v87_v28 = vld [vmem:[%s9040_s1 + $0x28] sm:$0xff]  ;;  %v7922_v31 = vpack.c.bf16 %v292_v25, %v289_v24  ;;  %p7739_p13 = por %p7738_p12, %p7737_p11 }
  0x3d   :  { %v80_v26 = vld [vmem:[%s9039_s0] sm:$0xff]  ;;  %v7919_v29 = vpack.c.bf16 %v285_v23, %v282_v22  ;;  %v6348_v30 = vpack.c.bf16 %v87_v28, %v84_v27  ;;  %v288_v32 = vld [vmem:[#allocation4 + $0x90] sm:$0xff]  ;;  %v291_v33 = vld [vmem:[#allocation4 + $0xa8] sm:$0xff]  ;;  %v90_v27 = vlaneseq }
  0x3e   :  { %6347 = vmatpush1.bf16.msra.mxu1 %v6346_v21  ;;  %6359 = vmatpush1.bf16.msra.mxu0 %v7898_v16  ;;  %v295_v34 = vld [vmem:[#allocation4 + $0xc8] sm:$0xff]  ;;  %v298_v35 = vld [vmem:[#allocation4 + $0xe0] sm:$0xff]  ;;  %v7930_v37 = vpack.c.bf16 %v291_v33, %v288_v32  ;;  %v272_v39 = vld [vmem:[#allocation4 + $0x10] sm:$0xff]  ;;  %p7740_p0 = pnand %p7739_p13, %p7733_p10 }
  0x3f   :  { %6361 = vmatprep.subr.bf16.mxu0 %v7907_v20  ;;  %6349 = vmatprep.subr.bf16.mxu1 %v6348_v30  ;;  %v81_v36 = vld [vmem:[%s9039_s0 + $0x8] sm:$0xff]  ;;  %v7934_v40 = vpack.c.bf16 %v298_v35, %v295_v34  ;;  %v294_v41 = vld [vmem:[#allocation4 + $0xc0] sm:$0xff]  ;;  %v297_v42 = vld [vmem:[#allocation4 + $0xd8] sm:$0xff]  ;;  %v91_v28 = vshrl.u32 %v90_v27, 7 }
  0x40   :  { %v275_v43 = vld [vmem:[#allocation4 + $0x28] sm:$0xff]  ;;  %v301_v44 = vld [vmem:[#allocation4 + $0xf8] sm:$0xff]  ;;  %v304_v45 = vld [vmem:[#allocation4 + $0x110] sm:$0xff]  ;;  %v7941_v47 = vpack.c.bf16 %v297_v42, %v294_v41 }
  0x41   :  { %5327 = vmatmul.mubr.msk.f32.vlgmr.msra.gmra.mrb[0].mxu1 %vm105_vm0, %v80_v26  ;;  %v7938_v46 = vpack.c.bf16 %v275_v43, %v272_v39  ;;  %v278_v48 = vld [vmem:[#allocation4 + $0x40] sm:$0xff]  ;;  %v281_v49 = vld [vmem:[#allocation4 + $0x58] sm:$0xff]  ;;  %v7944_v50 = vpack.c.bf16 %v304_v45, %v301_v44  ;;  %v300_v51 = vld [vmem:[#allocation4 + $0xf0] sm:$0xff]  ;;  %v8039_v33 = vsub.s32 1, %v91_v28  ;;  %v8043_v43 = vsub.s32 2, %v91_v28 }
  0x42   :  { %182 = vmatprep.mubr.f32.mxu1 %v7765_v0  ;;  %6351 = vmatpush3.bf16.msra.mxu1 %v6348_v30  ;;  %v303_v52 = vld [vmem:[#allocation4 + $0x108] sm:$0xff]  ;;  %v310_v54 = vld [vmem:[#allocation4 + $0x140] sm:$0xff]  ;;  %v7948_v55 = vpack.c.bf16 %v281_v49, %v278_v48  ;;  %v284_v57 = vld [vmem:[#allocation4 + $0x70] sm:$0xff]  ;;  %v8034_v30 = vsub.s32 0, %v91_v28 }
  0x43   :  { %6363 = vmatpush1.bf16.msra.mxu0 %v7919_v29  ;;  %6384 = vmatprep.subr.bf16.mxu1 %v7766_v38  ;;  %v307_v53 = vld [vmem:[#allocation4 + $0x128] sm:$0xff]  ;;  %v7953_v56 = vpack.c.bf16 %v303_v52, %v300_v51  ;;  %v306_v60 = vld [vmem:[#allocation4 + $0x120] sm:$0xff]  ;;  %v309_v61 = vld [vmem:[#allocation4 + $0x138] sm:$0xff] }
  0x44   :  { %6365 = vmatprep.subr.bf16.mxu0 %v7922_v31  ;;  %v287_v58 = vld [vmem:[#allocation4 + $0x88] sm:$0xff]  ;;  %v7957_v59 = vpack.c.bf16 %v310_v54, %v307_v53  ;;  %v313_v62 = vld [vmem:[#allocation4 + $0x158] sm:$0xff]  ;;  %v316_v63 = vld [vmem:[#allocation4 + $0x170] sm:$0xff]  ;;  %v7963_v2 = vpack.c.bf16 %v309_v61, %v306_v60 }
  0x45   :  { %5328 = vmatmul.mubr.msk.f32.gmra.mrb[2].mxu1 %vm105_vm0, %v81_v36  ;;  %v7960_v1 = vpack.c.bf16 %v287_v58, %v284_v57  ;;  %v290_v3 = vld [vmem:[#allocation4 + $0xa0] sm:$0xff]  ;;  %v293_v5 = vld [vmem:[#allocation4 + $0xb8] sm:$0xff]  ;;  %v7967_v6 = vpack.c.bf16 %v316_v63, %v313_v62  ;;  %v312_v7 = vld [vmem:[#allocation4 + $0x150] sm:$0xff]  ;;  %v7768_v58 = vmov 1966171168  }
  0x46   :  { %5711 = vmatprep.mubr.msk.f32.mxu1 %vm105_vm0, %v80_v26  ;;  %v315_v10 = vld [vmem:[#allocation4 + $0x168] sm:$0xff]  ;;  %v7970_v11 = vpack.c.bf16 %v293_v5, %v290_v3  ;;  %v296_v13 = vld [vmem:[#allocation4 + $0xd0] sm:$0xff]  ;;  %v302_v17 = vld [vmem:[#allocation4 + $0x100] sm:$0xff]  ;;  %v481_v60 = vunpack.c.l.s4 %v7768_v58 }
  0x47   :  { %6367 = vmatpush1.bf16.msra.mxu0 %v7930_v37  ;;  %v7973_v12 = vpack.c.bf16 %v315_v10, %v312_v7  ;;  %v299_v14 = vld [vmem:[#allocation4 + $0xe8] sm:$0xff]  ;;  %v305_v18 = vld [vmem:[#allocation4 + $0x118] sm:$0xff]  ;;  %v308_v21 = vld [vmem:[#allocation4 + $0x130] sm:$0xff] }
  0x48   :  { %6369 = vmatprep.subr.bf16.mxu0 %v7934_v40  ;;  %v7978_v15 = vpack.c.bf16 %v299_v14, %v296_v13  ;;  %v7985_v19 = vpack.c.bf16 %v305_v18, %v302_v17  ;;  %v311_v22 = vld [vmem:[#allocation4 + $0x148] sm:$0xff]  ;;  %v314_v24 = vld [vmem:[#allocation4 + $0x160] sm:$0xff]  ;;  %v317_v25 = vld [vmem:[#allocation4 + $0x178] sm:$0xff]  ;;  %v482_v62 = vunpack.c.0.s8 %v481_v60 }
  0x49   :  { %5712 = vmatmul.mubr.msk.f32.vlgmr.msra.gmra.mrb[4].mxu1 %vm105_vm0, %v81_v36  ;;  %v7992_v23 = vpack.c.bf16 %v311_v22, %v308_v21  ;;  %v7998_v26 = vpack.c.bf16 %v317_v25, %v314_v24  ;;  %v88_v32 = vld [vmem:[%s9042_s3] sm:$0x7] }
  0x4a   :  { %6386 = vmatpush3.bf16.msra.mxu1 %v7938_v46  ;;  %5746 = vmatprep.mubr.msk.f32.mxu1 %vm7767_vm1, %v7765_v0  ;;  %v93_v34 = vrot.slane %v88_v32, %v8034_v30  ;;  %v97_v35 = vrot.slane %v88_v32, %v8039_v33  ;;  %v101_v51 = vrot.slane %v88_v32, %v8043_v43  ;;  %v318_v61 = vld [vmem:[%s9043_s4] sm:$0x7] }
  0x4b   :  { %6371 = vmatpush1.bf16.msra.mxu0 %v7941_v47  ;;  %6387 = vmatprep.subr.bf16.mxu1 %v7766_v38  ;;  %v8050_v63 = vrot.slane %v318_v61, %v8034_v30  ;;  %v8053_v3 = vrot.slane %v318_v61, %v8039_v33  ;;  %v8055_v5 = vsub.s32 %v482_v62, %v91_v28 }
  0x4c   :  { %6373 = vmatprep.subr.bf16.mxu0 %v7944_v50 }
  0x4e   :  { %6389 = vmatpush3.bf16.msra.mxu1 %v7948_v55 }
  0x4f   :  { %6375 = vmatpush1.bf16.msra.mxu0 %v7953_v56  ;;  %6390 = vmatprep.subr.bf16.mxu1 %v7766_v38 }
  0x50   :  { %6377 = vmatprep.subr.bf16.mxu0 %v7957_v59 }
  0x52   :  { %6392 = vmatpush3.bf16.msra.mxu1 %v7960_v1 }
  0x53   :  { %6379 = vmatpush1.bf16.msra.mxu0 %v7963_v2  ;;  %6393 = vmatprep.subr.bf16.mxu1 %v7766_v38 }
  0x54   :  { %6381 = vmatprep.subr.bf16.mxu0 %v7967_v6 }
  0x56   :  { %6395 = vmatpush3.bf16.msra.mxu1 %v7970_v11 }
  0x57   :  { %6383 = vmatpush1.bf16.msra.mxu0 %v7973_v12  ;;  %6396 = vmatprep.subr.bf16.mxu1 %v7766_v38 }
  0x58   :  { %6409 = vmatprep.subr.bf16.mxu0 %v7884_v4 }
  0x5a   :  { %403 = vmatmul.mubr.f32.vlgmr.msra.gmra.mrb[0].mxu0 %v7765_v0  ;;  %6398 = vmatpush3.bf16.msra.mxu1 %v7978_v15 }
  0x5b   :  { %6399 = vmatprep.subr.bf16.mxu1 %v7766_v38  ;;  %6411 = vmatpush1.bf16.msra.mxu0 %v7886_v8 }
  0x5c   :  { %6413 = vmatprep.subr.bf16.mxu0 %v7888_v9  ;;  %692 = vmatprep.mubr.f32.mxu0 %v7765_v0 }
  0x5e   :  { %6401 = vmatpush3.bf16.msra.mxu1 %v7985_v19 }
  0x5f   :  { %6402 = vmatprep.subr.bf16.mxu1 %v7766_v38  ;;  %6415 = vmatpush1.bf16.msra.mxu0 %v7898_v16 }
  0x60   :  { %6417 = vmatprep.subr.bf16.mxu0 %v7907_v20 }
  0x62   :  { %6404 = vmatpush3.bf16.msra.mxu1 %v7992_v23 }
  0x63   :  { %6405 = vmatprep.subr.bf16.mxu1 %v7766_v38  ;;  %6419 = vmatpush1.bf16.msra.mxu0 %v7919_v29 }
  0x64   :  { %6421 = vmatprep.subr.bf16.mxu0 %v7922_v31 }
  0x66   :  { %6407 = vmatpush3.bf16.msra.mxu1 %v7998_v26 }
  0x67   :  { %6440 = vmatprep.subr.bf16.mxu1 %v7766_v38  ;;  %6423 = vmatpush1.bf16.msra.mxu0 %v7930_v37 }
  0x68   :  { %6425 = vmatprep.subr.bf16.mxu0 %v7934_v40 }
  0x69   :  { %5747 = vmatmul.mubr.f32.vlgmr.msra.gmra.mrb[6].mxu1 %v7765_v0 }
  0x6a   :  { %6442 = vmatpush3.bf16.msra.mxu1 %v7938_v46  ;;  %5781 = vmatprep.mubr.msk.f32.mxu1 %vm7767_vm1, %v7765_v0 }
  0x6b   :  { %6443 = vmatprep.subr.bf16.mxu1 %v7766_v38  ;;  %6427 = vmatpush1.bf16.msra.mxu0 %v7941_v47 }
  0x6c   :  { %6429 = vmatprep.subr.bf16.mxu0 %v7944_v50 }
  0x6e   :  { %6445 = vmatpush3.bf16.msra.mxu1 %v7948_v55 }
  0x6f   :  { %6446 = vmatprep.subr.bf16.mxu1 %v7766_v38  ;;  %6431 = vmatpush1.bf16.msra.mxu0 %v7953_v56 }
  0x70   :  { %6433 = vmatprep.subr.bf16.mxu0 %v7957_v59 }
  0x72   :  { %6448 = vmatpush3.bf16.msra.mxu1 %v7960_v1 }
  0x73   :  { %6449 = vmatprep.subr.bf16.mxu1 %v7766_v38  ;;  %6435 = vmatpush1.bf16.msra.mxu0 %v7963_v2 }
  0x74   :  { %6437 = vmatprep.subr.bf16.mxu0 %v7967_v6 }
  0x76   :  { %6451 = vmatpush3.bf16.msra.mxu1 %v7970_v11 }
  0x77   :  { %6452 = vmatprep.subr.bf16.mxu1 %v7766_v38  ;;  %6439 = vmatpush1.bf16.msra.mxu0 %v7973_v12 }
  0x78   :  { %6465 = vmatprep.subr.bf16.mxu0 %v7884_v4 }
  0x7a   :  { %6454 = vmatpush3.bf16.msra.mxu1 %v7978_v15 }
  0x7b   :  { %6455 = vmatprep.subr.bf16.mxu1 %v7766_v38 }
  0x7e   :  { %6457 = vmatpush3.bf16.msra.mxu1 %v7985_v19 }
  0x7f   :  { %6458 = vmatprep.subr.bf16.mxu1 %v7766_v38 }
  0x82   :  { %6460 = vmatpush3.bf16.msra.mxu1 %v7992_v23 }
  0x83   :  { %6461 = vmatprep.subr.bf16.mxu1 %v7766_v38 }
  0x86   :  { %6463 = vmatpush3.bf16.msra.mxu1 %v7998_v26 }
  0x87   :  { %6496 = vmatprep.subr.bf16.mxu1 %v7766_v38 }
 0x114   :  { %v178_v36 = vpop.f32.mrb[0].mxu1 }
 0x115   :  { %v179_v39 = vadd.f32 %v178_v36, %v93_v34  ;;  %v180_v41 = vpop.f32.mrb[1].mxu1 }
 0x116   :  { %v181_v42 = vadd.f32 %v180_v41, %v97_v35 }
 0x117   :  { %264 = vst [vmem:[#allocation2] sm:$0xff] %v179_v39 }
 0x118   :  { %265 = vst [vmem:[#allocation2 + $0x8] sm:$0xff] %v181_v42  ;;  %v184_v44 = vpop.f32.mrb[2].mxu1 }
 0x119   :  { %v185_v45 = vadd.f32 %v184_v44, %v93_v34  ;;  %v186_v48 = vpop.f32.mrb[3].mxu1 }
 0x11a   :  { %v187_v49 = vadd.f32 %v186_v48, %v97_v35 }
 0x11b   :  { %267 = vst [vmem:[#allocation2 + $0x18] sm:$0xff] %v185_v45 }
 0x11c   :  { %268 = vst [vmem:[#allocation2 + $0x20] sm:$0xff] %v187_v49  ;;  %v5713_v52 = vpop.f32.mrb[4].mxu1 }
 0x11d   :  { %v261_v53 = vadd.f32 %v5713_v52, %v101_v51  ;;  %v255_v54 = vpop.f32.mrb[5].mxu1 }
 0x11e   :  { %v256_v57 = vadd.f32 %v255_v54, %v101_v51  ;;  %v8066_v51 = vrot.slane %v318_v61, %v8043_v43 }
 0x11f   :  { %269 = vst [vmem:[#allocation2 + $0x28] sm:$0xff] %v261_v53 }
 0x120   :  { %266 = vst [vmem:[#allocation2 + $0x10] sm:$0xff] %v256_v57 }
 0x126   :  { %v337_v32 = vld [vmem:[#allocation2 + $0x18] ss:$8 sm:$0x7] }
 0x127   :  { %v335_v24 = vld [vmem:[#allocation2] ss:$8 sm:$0x7]  ;;  %v521_v44 = vrot.slane %v337_v32, 1 }
 0x128   :  { %v520_v41 = vrot.slane %v335_v24, 1 }
 0x12d   :  { %v404_v7 = vpop.f32.mrb[0].mxu0 }
 0x12e   :  { %v405_v10 = vadd.f32 %v404_v7, %v8050_v63  ;;  %v406_v13 = vpop.f32.mrb[1].mxu0 }
 0x12f   :  { %v407_v14 = vadd.f32 %v406_v13, %v8053_v3 }
 0x130   :  { %v486_v17 = vrot.slane %v405_v10, %v8055_v5 }
 0x131   :  { %v531_v22 = vrot.slane %v407_v14, %v8055_v5 }
 0x132   :  { %v487_v18 = vcombine.high %v486_v17, %v486_v17  ;;  %v494_v21 = vrot.slane %v486_v17, %v8055_v5 }
 0x133   :  { %v532_v35 = vcombine.high %v531_v22, %v531_v22  ;;  %v539_v39 = vrot.slane %v531_v22, %v8055_v5 }
 0x134   :  { %v501_v25 = vrot.slane %v487_v18, %v8055_v5  ;;  %v504_v27 = vadd.f32 %v494_v21, %v335_v24 }
 0x135   :  { %v546_v42 = vrot.slane %v532_v35, %v8055_v5  ;;  %v549_v45 = vadd.f32 %v539_v39, %v520_v41  ;;  %v591_v35 = vrot.slane %v337_v32, 2 }
 0x136   :  { %v505_v28 = vadd.f32 %v501_v25, %v337_v32  ;;  %v5331_v34 = vmul.f32 -1.442695, %v504_v27  ;;  %v590_v25 = vrot.slane %v335_v24, 2 }
 0x137   :  { %v550_v52 = vadd.f32 %v546_v42, %v521_v44  ;;  %v5333_v53 = vmul.f32 -1.442695, %v549_v45 }
 0x138   :  { %7346 = vpow2.f32 %v5331_v34  ;;  %v5332_v36 = vmul.f32 -1.442695, %v505_v28 }
 0x139   :  { %v5334_v57 = vmul.f32 -1.442695, %v550_v52 }
 0x13a   :  { %7348 = vpow2.f32 %v5332_v36 }
 0x13b   :  { %7350 = vpow2.f32 %v5333_v53 }
 0x13c   :  { %v475_v48 = vpop.f32.mrb[6].mxu1 }
 0x13d   :  { %v5748_v49 = vpop.f32.mrb[7].mxu1  ;;  %v476_v58 = vadd.f32 %v475_v48, %v8066_v51 }
 0x13f   :  { %v570_v10 = vrot.slane %v476_v58, %v8055_v5 }
 0x141   :  { %v571_v13 = vcombine.high %v570_v10, %v570_v10  ;;  %v578_v14 = vrot.slane %v570_v10, %v8055_v5 }
 0x142   :  { %v7347_v54 = vpop.eup %7346 }
 0x143   :  { %v512_v60 = vadd.f32 1.0, %v7347_v54  ;;  %v585_v17 = vrot.slane %v571_v13, %v8055_v5 }
 0x144   :  { %v7349_v62 = vpop.eup %7348 }
 0x145   :  { %v513_v7 = vadd.f32 1.0, %v7349_v62  ;;  %7352 = vrcp.f32 %v512_v60  ;;  %v7351_v61 = vpop.eup %7350 }
 0x146   :  { %7354 = vpow2.f32 %v5334_v57  ;;  %v557_v28 = vadd.f32 1.0, %v7351_v61 }
 0x147   :  { %7356 = vrcp.f32 %v513_v7 }
 0x14f   :  { %v7353_v18 = vpop.eup %7352 }
 0x150   :  { %v7355_v21 = vpop.eup %7354  ;;  %v588_v22 = vmul.f32 %v7353_v18, %v578_v14 }
 0x151   :  { %v7357_v27 = vpop.eup %7356  ;;  %v558_v39 = vadd.f32 1.0, %v7355_v21 }
 0x152   :  { %v589_v34 = vmul.f32 %v7357_v27, %v585_v17  ;;  %v594_v36 = vadd.f32 %v590_v25, %v588_v22  ;;  %v607_v25 = vld [vmem:[#allocation2 + $0x1] ss:$8 sm:$0x7] }
 0x154   :  { %v595_v41 = vadd.f32 %v591_v35, %v589_v34  ;;  %7358 = vtanh.f32 %v594_v36  ;;  %v609_v34 = vld [vmem:[#allocation2 + $0x19] ss:$8 sm:$0x7] }
 0x155   :  { %7360 = vrcp.f32 %v557_v28 }
 0x156   :  { %7362 = vtanh.f32 %v595_v41 }
 0x157   :  { %7364 = vrcp.f32 %v558_v39 }
 0x15e   :  { %v7359_v42 = vpop.eup %7358 }
 0x15f   :  { %v7361_v44 = vpop.eup %7360  ;;  %v598_v45 = vsub.f32 0.0, %v7359_v42 }
 0x160   :  { %v7363_v48 = vpop.eup %7362 }
 0x161   :  { %v599_v49 = vsub.f32 0.0, %v7363_v48  ;;  %v600_v52 = vmul.f32 %v7361_v44, %v598_v45  ;;  %v7365_v53 = vpop.eup %7364  ;;  %v810_v44 = vrot.slane %v607_v25, 1 }
 0x163   :  { %v601_v54 = vmul.f32 %v7365_v53, %v599_v49  ;;  %v8072_v24 = vadd.f32 %v7359_v42, %v600_v52 }
 0x165   :  { %v8074_v57 = vadd.f32 %v7363_v48, %v601_v54  ;;  %604 = vst [vmem:[#allocation3] sm:$0x1] %v8072_v24  ;;  %v811_v48 = vrot.slane %v609_v34, 1 }
 0x167   :  { %605 = vst [vmem:[#allocation3 + $0x8] sm:$0x1] %v8074_v57  ;;  %v612_v32 = vcombine.low %v8072_v24, %v8074_v57 }
 0x169   :  { %v619_v58 = vrot.slane %v612_v32, %v8055_v5 }
 0x16b   :  { %v626_v60 = vrot.slane %v619_v58, %v8055_v5 }
 0x16d   :  { %693 = vmatmul.mubr.f32.vlgmr.msra.gmra.mrb[2].mxu0 %v626_v60  ;;  %5782 = vmatmul.mubr.f32.vlgmr.msra.gmra.mrb[8].mxu1 %v626_v60 }
 0x16e   :  { %6467 = vmatpush1.bf16.msra.mxu0 %v7886_v8  ;;  %6498 = vmatpush3.bf16.msra.mxu1 %v7938_v46 }
 0x16f   :  { %6469 = vmatprep.subr.bf16.mxu0 %v7888_v9  ;;  %6499 = vmatprep.subr.bf16.mxu1 %v7766_v38 }
 0x170   :  { %982 = vmatprep.mubr.f32.mxu0 %v7765_v0  ;;  %5816 = vmatprep.mubr.msk.f32.mxu1 %vm7767_vm1, %v7765_v0 }
 0x172   :  { %6471 = vmatpush1.bf16.msra.mxu0 %v7898_v16  ;;  %6501 = vmatpush3.bf16.msra.mxu1 %v7948_v55 }
 0x173   :  { %6473 = vmatprep.subr.bf16.mxu0 %v7907_v20  ;;  %6502 = vmatprep.subr.bf16.mxu1 %v7766_v38 }
 0x176   :  { %6475 = vmatpush1.bf16.msra.mxu0 %v7919_v29  ;;  %6504 = vmatpush3.bf16.msra.mxu1 %v7960_v1 }
 0x177   :  { %6477 = vmatprep.subr.bf16.mxu0 %v7922_v31  ;;  %6505 = vmatprep.subr.bf16.mxu1 %v7766_v38 }
 0x17a   :  { %6479 = vmatpush1.bf16.msra.mxu0 %v7930_v37  ;;  %6507 = vmatpush3.bf16.msra.mxu1 %v7970_v11 }
 0x17b   :  { %6481 = vmatprep.subr.bf16.mxu0 %v7934_v40  ;;  %6508 = vmatprep.subr.bf16.mxu1 %v7766_v38 }
 0x17e   :  { %6483 = vmatpush1.bf16.msra.mxu0 %v7941_v47  ;;  %6510 = vmatpush3.bf16.msra.mxu1 %v7978_v15 }
 0x17f   :  { %6485 = vmatprep.subr.bf16.mxu0 %v7944_v50  ;;  %6511 = vmatprep.subr.bf16.mxu1 %v7766_v38 }
 0x182   :  { %6487 = vmatpush1.bf16.msra.mxu0 %v7953_v56  ;;  %6513 = vmatpush3.bf16.msra.mxu1 %v7985_v19 }
 0x183   :  { %6489 = vmatprep.subr.bf16.mxu0 %v7957_v59  ;;  %6514 = vmatprep.subr.bf16.mxu1 %v7766_v38 }
 0x186   :  { %6491 = vmatpush1.bf16.msra.mxu0 %v7963_v2  ;;  %6516 = vmatpush3.bf16.msra.mxu1 %v7992_v23 }
 0x187   :  { %6493 = vmatprep.subr.bf16.mxu0 %v7967_v6  ;;  %6517 = vmatprep.subr.bf16.mxu1 %v7766_v38 }
 0x18a   :  { %6495 = vmatpush1.bf16.msra.mxu0 %v7973_v12  ;;  %6519 = vmatpush3.bf16.msra.mxu1 %v7998_v26 }
 0x18b   :  { %6521 = vmatprep.subr.bf16.mxu0 %v7884_v4  ;;  %6552 = vmatprep.subr.bf16.mxu1 %v7766_v38 }
 0x240   :  { %v694_v62 = vpop.f32.mrb[2].mxu0  ;;  %v765_v7 = vpop.f32.mrb[8].mxu1 }
 0x241   :  { %v695_v10 = vadd.f32 %v694_v62, %v8050_v63  ;;  %v696_v13 = vpop.f32.mrb[3].mxu0  ;;  %v5783_v14 = vpop.f32.mrb[9].mxu1  ;;  %v766_v62 = vadd.f32 %v765_v7, %v8066_v51 }
 0x242   :  { %v697_v61 = vadd.f32 %v696_v13, %v8053_v3 }
 0x243   :  { %v776_v17 = vrot.slane %v695_v10, %v8055_v5  ;;  %v860_v13 = vrot.slane %v766_v62, %v8055_v5 }
 0x244   :  { %v821_v22 = vrot.slane %v697_v61, %v8055_v5 }
 0x245   :  { %v777_v18 = vcombine.high %v776_v17, %v776_v17  ;;  %v784_v21 = vrot.slane %v776_v17, %v8055_v5  ;;  %v861_v14 = vcombine.high %v860_v13, %v860_v13  ;;  %v868_v17 = vrot.slane %v860_v13, %v8055_v5 }
 0x246   :  { %v822_v39 = vcombine.high %v821_v22, %v821_v22  ;;  %v829_v42 = vrot.slane %v821_v22, %v8055_v5 }
 0x247   :  { %v791_v27 = vrot.slane %v777_v18, %v8055_v5  ;;  %v794_v28 = vadd.f32 %v784_v21, %v607_v25  ;;  %v875_v22 = vrot.slane %v861_v14, %v8055_v5 }
 0x248   :  { %v836_v45 = vrot.slane %v822_v39, %v8055_v5  ;;  %v839_v49 = vadd.f32 %v829_v42, %v810_v44  ;;  %v881_v39 = vrot.slane %v609_v34, 2 }
 0x249   :  { %v795_v35 = vadd.f32 %v791_v27, %v609_v34  ;;  %v5335_v36 = vmul.f32 -1.442695, %v794_v28  ;;  %v880_v28 = vrot.slane %v607_v25, 2 }
 0x24a   :  { %v840_v52 = vadd.f32 %v836_v45, %v811_v48  ;;  %v5337_v53 = vmul.f32 -1.442695, %v839_v49 }
 0x24b   :  { %7366 = vpow2.f32 %v5335_v36  ;;  %v5336_v41 = vmul.f32 -1.442695, %v795_v35 }
 0x24c   :  { %v5338_v32 = vmul.f32 -1.442695, %v840_v52 }
 0x24d   :  { %7368 = vpow2.f32 %v5336_v41 }
 0x24e   :  { %7370 = vpow2.f32 %v5337_v53 }
 0x255   :  { %v7367_v54 = vpop.eup %7366 }
 0x256   :  { %v802_v58 = vadd.f32 1.0, %v7367_v54 }
 0x257   :  { %v7369_v60 = vpop.eup %7368 }
 0x258   :  { %v803_v10 = vadd.f32 1.0, %v7369_v60  ;;  %7372 = vrcp.f32 %v802_v58  ;;  %v7371_v61 = vpop.eup %7370 }
 0x259   :  { %7374 = vpow2.f32 %v5338_v32  ;;  %v847_v36 = vadd.f32 1.0, %v7371_v61 }
 0x25a   :  { %7376 = vrcp.f32 %v803_v10 }
 0x262   :  { %v7373_v18 = vpop.eup %7372 }
 0x263   :  { %v7375_v21 = vpop.eup %7374  ;;  %v878_v27 = vmul.f32 %v7373_v18, %v868_v17 }
 0x264   :  { %v7377_v35 = vpop.eup %7376  ;;  %v848_v44 = vadd.f32 1.0, %v7375_v21 }
 0x265   :  { %v879_v7 = vmul.f32 %v7377_v35, %v875_v22  ;;  %v884_v41 = vadd.f32 %v880_v28, %v878_v27  ;;  %v897_v28 = vld [vmem:[#allocation2 + $0x2] ss:$8 sm:$0x7] }
 0x267   :  { %v885_v42 = vadd.f32 %v881_v39, %v879_v7  ;;  %7378 = vtanh.f32 %v884_v41  ;;  %v899_v7 = vld [vmem:[#allocation2 + $0x1a] ss:$8 sm:$0x7] }
 0x268   :  { %7380 = vrcp.f32 %v847_v36 }
 0x269   :  { %7382 = vtanh.f32 %v885_v42 }
 0x26a   :  { %7384 = vrcp.f32 %v848_v44 }
 0x271   :  { %v7379_v45 = vpop.eup %7378 }
 0x272   :  { %v7381_v48 = vpop.eup %7380  ;;  %v888_v49 = vsub.f32 %v8072_v24, %v7379_v45 }
 0x273   :  { %v7383_v52 = vpop.eup %7382 }
 0x274   :  { %v889_v53 = vsub.f32 %v8074_v57, %v7383_v52  ;;  %v890_v54 = vmul.f32 %v7381_v48, %v888_v49  ;;  %v7385_v25 = vpop.eup %7384  ;;  %v1100_v48 = vrot.slane %v897_v28, 1 }
 0x276   :  { %v891_v32 = vmul.f32 %v7385_v25, %v889_v53  ;;  %v8131_v58 = vadd.f32 %v7379_v45, %v890_v54 }
 0x278   :  { %v8133_v34 = vadd.f32 %v7383_v52, %v891_v32  ;;  %894 = vst [vmem:[#allocation3 + $0x1] sm:$0x1] %v8131_v58  ;;  %v1101_v52 = vrot.slane %v899_v7, 1 }
 0x27a   :  { %895 = vst [vmem:[#allocation3 + $0x9] sm:$0x1] %v8133_v34  ;;  %v902_v60 = vcombine.low %v8131_v58, %v8133_v34 }
 0x27c   :  { %v909_v62 = vrot.slane %v902_v60, %v8055_v5 }
 0x27e   :  { %v916_v24 = vrot.slane %v909_v62, %v8055_v5 }
 0x280   :  { %983 = vmatmul.mubr.f32.vlgmr.msra.gmra.mrb[4].mxu0 %v916_v24  ;;  %5817 = vmatmul.mubr.f32.vlgmr.msra.gmra.mrb[10].mxu1 %v916_v24 }
 0x281   :  { %6523 = vmatpush1.bf16.msra.mxu0 %v7886_v8  ;;  %6554 = vmatpush3.bf16.msra.mxu1 %v7938_v46 }
 0x282   :  { %6525 = vmatprep.subr.bf16.mxu0 %v7888_v9  ;;  %6555 = vmatprep.subr.bf16.mxu1 %v7766_v38 }
 0x283   :  { %1272 = vmatprep.mubr.f32.mxu0 %v7765_v0  ;;  %5851 = vmatprep.mubr.msk.f32.mxu1 %vm7767_vm1, %v7765_v0 }
 0x285   :  { %6527 = vmatpush1.bf16.msra.mxu0 %v7898_v16  ;;  %6557 = vmatpush3.bf16.msra.mxu1 %v7948_v55 }
 0x286   :  { %6529 = vmatprep.subr.bf16.mxu0 %v7907_v20  ;;  %6558 = vmatprep.subr.bf16.mxu1 %v7766_v38 }
 0x289   :  { %6531 = vmatpush1.bf16.msra.mxu0 %v7919_v29  ;;  %6560 = vmatpush3.bf16.msra.mxu1 %v7960_v1 }
 0x28a   :  { %6533 = vmatprep.subr.bf16.mxu0 %v7922_v31  ;;  %6561 = vmatprep.subr.bf16.mxu1 %v7766_v38 }
 0x28d   :  { %6535 = vmatpush1.bf16.msra.mxu0 %v7930_v37  ;;  %6563 = vmatpush3.bf16.msra.mxu1 %v7970_v11 }
 0x28e   :  { %6537 = vmatprep.subr.bf16.mxu0 %v7934_v40  ;;  %6564 = vmatprep.subr.bf16.mxu1 %v7766_v38 }
 0x291   :  { %6539 = vmatpush1.bf16.msra.mxu0 %v7941_v47  ;;  %6566 = vmatpush3.bf16.msra.mxu1 %v7978_v15 }
 0x292   :  { %6541 = vmatprep.subr.bf16.mxu0 %v7944_v50  ;;  %6567 = vmatprep.subr.bf16.mxu1 %v7766_v38 }
 0x295   :  { %6543 = vmatpush1.bf16.msra.mxu0 %v7953_v56  ;;  %6569 = vmatpush3.bf16.msra.mxu1 %v7985_v19 }
 0x296   :  { %6545 = vmatprep.subr.bf16.mxu0 %v7957_v59  ;;  %6570 = vmatprep.subr.bf16.mxu1 %v7766_v38 }
 0x299   :  { %6547 = vmatpush1.bf16.msra.mxu0 %v7963_v2  ;;  %6572 = vmatpush3.bf16.msra.mxu1 %v7992_v23 }
 0x29a   :  { %6549 = vmatprep.subr.bf16.mxu0 %v7967_v6  ;;  %6573 = vmatprep.subr.bf16.mxu1 %v7766_v38 }
 0x29d   :  { %6551 = vmatpush1.bf16.msra.mxu0 %v7973_v12  ;;  %6575 = vmatpush3.bf16.msra.mxu1 %v7998_v26 }
 0x29e   :  { %6577 = vmatprep.subr.bf16.mxu0 %v7884_v4  ;;  %6608 = vmatprep.subr.bf16.mxu1 %v7766_v38 }
 0x353   :  { %v984_v57 = vpop.f32.mrb[4].mxu0  ;;  %v1055_v10 = vpop.f32.mrb[10].mxu1 }
 0x354   :  { %v985_v13 = vadd.f32 %v984_v57, %v8050_v63  ;;  %v986_v14 = vpop.f32.mrb[5].mxu0  ;;  %v5818_v61 = vpop.f32.mrb[11].mxu1  ;;  %v1056_v57 = vadd.f32 %v1055_v10, %v8066_v51 }
 0x355   :  { %v987_v17 = vadd.f32 %v986_v14, %v8053_v3 }
 0x356   :  { %v1066_v18 = vrot.slane %v985_v13, %v8055_v5  ;;  %v1150_v14 = vrot.slane %v1056_v57, %v8055_v5 }
 0x357   :  { %v1111_v27 = vrot.slane %v987_v17, %v8055_v5 }
 0x358   :  { %v1067_v21 = vcombine.high %v1066_v18, %v1066_v18  ;;  %v1074_v22 = vrot.slane %v1066_v18, %v8055_v5  ;;  %v1151_v61 = vcombine.high %v1150_v14, %v1150_v14  ;;  %v1158_v18 = vrot.slane %v1150_v14, %v8055_v5 }
 0x359   :  { %v1112_v42 = vcombine.high %v1111_v27, %v1111_v27  ;;  %v1119_v45 = vrot.slane %v1111_v27, %v8055_v5 }
 0x35a   :  { %v1081_v35 = vrot.slane %v1067_v21, %v8055_v5  ;;  %v1084_v36 = vadd.f32 %v1074_v22, %v897_v28  ;;  %v1165_v27 = vrot.slane %v1151_v61, %v8055_v5 }
 0x35b   :  { %v1126_v49 = vrot.slane %v1112_v42, %v8055_v5  ;;  %v1129_v53 = vadd.f32 %v1119_v45, %v1100_v48  ;;  %v1171_v42 = vrot.slane %v899_v7, 2 }
 0x35c   :  { %v1085_v39 = vadd.f32 %v1081_v35, %v899_v7  ;;  %v5339_v41 = vmul.f32 -1.442695, %v1084_v36  ;;  %v1170_v36 = vrot.slane %v897_v28, 2 }
 0x35d   :  { %v1130_v54 = vadd.f32 %v1126_v49, %v1101_v52  ;;  %v5341_v25 = vmul.f32 -1.442695, %v1129_v53 }
 0x35e   :  { %7386 = vpow2.f32 %v5339_v41  ;;  %v5340_v44 = vmul.f32 -1.442695, %v1085_v39 }
 0x35f   :  { %v5342_v60 = vmul.f32 -1.442695, %v1130_v54 }
 0x360   :  { %7388 = vpow2.f32 %v5340_v44 }
 0x361   :  { %7390 = vpow2.f32 %v5341_v25 }
 0x368   :  { %v7387_v32 = vpop.eup %7386 }
 0x369   :  { %v1092_v62 = vadd.f32 1.0, %v7387_v32 }
 0x36a   :  { %v7389_v24 = vpop.eup %7388 }
 0x36b   :  { %v1093_v13 = vadd.f32 1.0, %v7389_v24  ;;  %7392 = vrcp.f32 %v1092_v62  ;;  %v7391_v17 = vpop.eup %7390 }
 0x36c   :  { %7394 = vpow2.f32 %v5342_v60  ;;  %v1137_v41 = vadd.f32 1.0, %v7391_v17 }
 0x36d   :  { %7396 = vrcp.f32 %v1093_v13 }
 0x375   :  { %v7393_v21 = vpop.eup %7392 }
 0x376   :  { %v7395_v22 = vpop.eup %7394  ;;  %v1168_v35 = vmul.f32 %v7393_v21, %v1158_v18 }
 0x377   :  { %v7397_v39 = vpop.eup %7396  ;;  %v1138_v48 = vadd.f32 1.0, %v7395_v22 }
 0x378   :  { %v1169_v10 = vmul.f32 %v7397_v39, %v1165_v27  ;;  %v1174_v44 = vadd.f32 %v1170_v36, %v1168_v35  ;;  %v1187_v36 = vld [vmem:[#allocation2 + $0x3] ss:$8 sm:$0x7] }
 0x37a   :  { %v1175_v45 = vadd.f32 %v1171_v42, %v1169_v10  ;;  %7398 = vtanh.f32 %v1174_v44  ;;  %v1189_v10 = vld [vmem:[#allocation2 + $0x1b] ss:$8 sm:$0x7] }
 0x37b   :  { %7400 = vrcp.f32 %v1137_v41 }
 0x37c   :  { %7402 = vtanh.f32 %v1175_v45 }
 0x37d   :  { %7404 = vrcp.f32 %v1138_v48 }
 0x384   :  { %v7399_v49 = vpop.eup %7398 }
 0x385   :  { %v7401_v52 = vpop.eup %7400  ;;  %v1178_v53 = vsub.f32 %v8131_v58, %v7399_v49 }
 0x386   :  { %v7403_v54 = vpop.eup %7402 }
 0x387   :  { %v1179_v25 = vsub.f32 %v8133_v34, %v7403_v54  ;;  %v1180_v32 = vmul.f32 %v7401_v52, %v1178_v53  ;;  %v7405_v28 = vpop.eup %7404  ;;  %v1390_v52 = vrot.slane %v1187_v36, 1 }
 0x389   :  { %v1181_v60 = vmul.f32 %v7405_v28, %v1179_v25  ;;  %v8190_v62 = vadd.f32 %v7399_v49, %v1180_v32 }
 0x38b   :  { %v8192_v7 = vadd.f32 %v7403_v54, %v1181_v60  ;;  %1184 = vst [vmem:[#allocation3 + $0x2] sm:$0x1] %v8190_v62  ;;  %v1391_v54 = vrot.slane %v1189_v10, 1 }
 0x38d   :  { %1185 = vst [vmem:[#allocation3 + $0xa] sm:$0x1] %v8192_v7  ;;  %v1192_v24 = vcombine.low %v8190_v62, %v8192_v7 }
 0x38f   :  { %v1199_v57 = vrot.slane %v1192_v24, %v8055_v5 }
 0x391   :  { %v1206_v58 = vrot.slane %v1199_v57, %v8055_v5 }
 0x393   :  { %1273 = vmatmul.mubr.f32.vlgmr.msra.gmra.mrb[6].mxu0 %v1206_v58  ;;  %5852 = vmatmul.mubr.f32.vlgmr.msra.gmra.mrb[12].mxu1 %v1206_v58 }
 0x394   :  { %6579 = vmatpush1.bf16.msra.mxu0 %v7886_v8  ;;  %6610 = vmatpush3.bf16.msra.mxu1 %v7938_v46 }
 0x395   :  { %6581 = vmatprep.subr.bf16.mxu0 %v7888_v9  ;;  %6611 = vmatprep.subr.bf16.mxu1 %v7766_v38 }
 0x396   :  { %1562 = vmatprep.mubr.f32.mxu0 %v7765_v0  ;;  %5886 = vmatprep.mubr.msk.f32.mxu1 %vm7767_vm1, %v7765_v0 }
 0x398   :  { %6583 = vmatpush1.bf16.msra.mxu0 %v7898_v16  ;;  %6613 = vmatpush3.bf16.msra.mxu1 %v7948_v55 }
 0x399   :  { %6585 = vmatprep.subr.bf16.mxu0 %v7907_v20  ;;  %6614 = vmatprep.subr.bf16.mxu1 %v7766_v38 }
 0x39c   :  { %6587 = vmatpush1.bf16.msra.mxu0 %v7919_v29  ;;  %6616 = vmatpush3.bf16.msra.mxu1 %v7960_v1 }
 0x39d   :  { %6589 = vmatprep.subr.bf16.mxu0 %v7922_v31  ;;  %6617 = vmatprep.subr.bf16.mxu1 %v7766_v38 }
 0x3a0   :  { %6591 = vmatpush1.bf16.msra.mxu0 %v7930_v37  ;;  %6619 = vmatpush3.bf16.msra.mxu1 %v7970_v11 }
 0x3a1   :  { %6593 = vmatprep.subr.bf16.mxu0 %v7934_v40  ;;  %6620 = vmatprep.subr.bf16.mxu1 %v7766_v38 }
 0x3a4   :  { %6595 = vmatpush1.bf16.msra.mxu0 %v7941_v47  ;;  %6622 = vmatpush3.bf16.msra.mxu1 %v7978_v15 }
 0x3a5   :  { %6597 = vmatprep.subr.bf16.mxu0 %v7944_v50  ;;  %6623 = vmatprep.subr.bf16.mxu1 %v7766_v38 }
 0x3a8   :  { %6599 = vmatpush1.bf16.msra.mxu0 %v7953_v56  ;;  %6625 = vmatpush3.bf16.msra.mxu1 %v7985_v19 }
 0x3a9   :  { %6601 = vmatprep.subr.bf16.mxu0 %v7957_v59  ;;  %6626 = vmatprep.subr.bf16.mxu1 %v7766_v38 }
 0x3ac   :  { %6603 = vmatpush1.bf16.msra.mxu0 %v7963_v2  ;;  %6628 = vmatpush3.bf16.msra.mxu1 %v7992_v23 }
 0x3ad   :  { %6605 = vmatprep.subr.bf16.mxu0 %v7967_v6  ;;  %6629 = vmatprep.subr.bf16.mxu1 %v7766_v38 }
 0x3b0   :  { %6607 = vmatpush1.bf16.msra.mxu0 %v7973_v12  ;;  %6631 = vmatpush3.bf16.msra.mxu1 %v7998_v26 }
 0x3b1   :  { %6633 = vmatprep.subr.bf16.mxu0 %v7884_v4  ;;  %6664 = vmatprep.subr.bf16.mxu1 %v7766_v38 }
 0x466   :  { %v1274_v34 = vpop.f32.mrb[6].mxu0  ;;  %v1345_v13 = vpop.f32.mrb[12].mxu1 }
 0x467   :  { %v1275_v14 = vadd.f32 %v1274_v34, %v8050_v63  ;;  %v1276_v61 = vpop.f32.mrb[7].mxu0  ;;  %v5853_v17 = vpop.f32.mrb[13].mxu1  ;;  %v1346_v34 = vadd.f32 %v1345_v13, %v8066_v51 }
 0x468   :  { %v1277_v18 = vadd.f32 %v1276_v61, %v8053_v3 }
 0x469   :  { %v1356_v21 = vrot.slane %v1275_v14, %v8055_v5  ;;  %v1440_v61 = vrot.slane %v1346_v34, %v8055_v5 }
 0x46a   :  { %v1401_v35 = vrot.slane %v1277_v18, %v8055_v5 }
 0x46b   :  { %v1357_v22 = vcombine.high %v1356_v21, %v1356_v21  ;;  %v1364_v27 = vrot.slane %v1356_v21, %v8055_v5  ;;  %v1441_v17 = vcombine.high %v1440_v61, %v1440_v61  ;;  %v1448_v21 = vrot.slane %v1440_v61, %v8055_v5 }
 0x46c   :  { %v1402_v45 = vcombine.high %v1401_v35, %v1401_v35  ;;  %v1409_v49 = vrot.slane %v1401_v35, %v8055_v5 }
 0x46d   :  { %v1371_v39 = vrot.slane %v1357_v22, %v8055_v5  ;;  %v1374_v41 = vadd.f32 %v1364_v27, %v1187_v36  ;;  %v1455_v35 = vrot.slane %v1441_v17, %v8055_v5 }
 0x46e   :  { %v1416_v53 = vrot.slane %v1402_v45, %v8055_v5  ;;  %v1419_v25 = vadd.f32 %v1409_v49, %v1390_v52  ;;  %v1461_v45 = vrot.slane %v1189_v10, 2 }
 0x46f   :  { %v1375_v42 = vadd.f32 %v1371_v39, %v1189_v10  ;;  %v5343_v44 = vmul.f32 -1.442695, %v1374_v41  ;;  %v1460_v41 = vrot.slane %v1187_v36, 2 }
 0x470   :  { %v1420_v32 = vadd.f32 %v1416_v53, %v1391_v54  ;;  %v5345_v28 = vmul.f32 -1.442695, %v1419_v25 }
 0x471   :  { %7406 = vpow2.f32 %v5343_v44  ;;  %v5344_v48 = vmul.f32 -1.442695, %v1375_v42 }
 0x472   :  { %v5346_v24 = vmul.f32 -1.442695, %v1420_v32 }
 0x473   :  { %7408 = vpow2.f32 %v5344_v48 }
 0x474   :  { %7410 = vpow2.f32 %v5345_v28 }
 0x47b   :  { %v7407_v60 = vpop.eup %7406 }
 0x47c   :  { %v1382_v57 = vadd.f32 1.0, %v7407_v60 }
 0x47d   :  { %v7409_v58 = vpop.eup %7408 }
 0x47e   :  { %v1383_v14 = vadd.f32 1.0, %v7409_v58  ;;  %7412 = vrcp.f32 %v1382_v57  ;;  %v7411_v18 = vpop.eup %7410 }
 0x47f   :  { %7414 = vpow2.f32 %v5346_v24  ;;  %v1427_v44 = vadd.f32 1.0, %v7411_v18 }
 0x480   :  { %7416 = vrcp.f32 %v1383_v14 }
 0x488   :  { %v7413_v22 = vpop.eup %7412 }
 0x489   :  { %v7415_v27 = vpop.eup %7414  ;;  %v1458_v39 = vmul.f32 %v7413_v22, %v1448_v21 }
 0x48a   :  { %v7417_v42 = vpop.eup %7416  ;;  %v1428_v52 = vadd.f32 1.0, %v7415_v27 }
 0x48b   :  { %v1459_v13 = vmul.f32 %v7417_v42, %v1455_v35  ;;  %v1464_v48 = vadd.f32 %v1460_v41, %v1458_v39  ;;  %v1477_v41 = vld [vmem:[#allocation2 + $0x4] ss:$8 sm:$0x7] }
 0x48d   :  { %v1465_v49 = vadd.f32 %v1461_v45, %v1459_v13  ;;  %7418 = vtanh.f32 %v1464_v48  ;;  %v1479_v13 = vld [vmem:[#allocation2 + $0x1c] ss:$8 sm:$0x7] }
 0x48e   :  { %7420 = vrcp.f32 %v1427_v44 }
 0x48f   :  { %7422 = vtanh.f32 %v1465_v49 }
 0x490   :  { %7424 = vrcp.f32 %v1428_v52 }
 0x497   :  { %v7419_v53 = vpop.eup %7418 }
 0x498   :  { %v7421_v54 = vpop.eup %7420  ;;  %v1468_v25 = vsub.f32 %v8190_v62, %v7419_v53 }
 0x499   :  { %v7423_v32 = vpop.eup %7422 }
 0x49a   :  { %v1469_v28 = vsub.f32 %v8192_v7, %v7423_v32  ;;  %v1470_v60 = vmul.f32 %v7421_v54, %v1468_v25  ;;  %v7425_v36 = vpop.eup %7424  ;;  %v1680_v54 = vrot.slane %v1477_v41, 1 }
 0x49c   :  { %v1471_v24 = vmul.f32 %v7425_v36, %v1469_v28  ;;  %v8249_v57 = vadd.f32 %v7419_v53, %v1470_v60 }
 0x49e   :  { %v8251_v10 = vadd.f32 %v7423_v32, %v1471_v24  ;;  %1474 = vst [vmem:[#allocation3 + $0x3] sm:$0x1] %v8249_v57  ;;  %v1681_v32 = vrot.slane %v1479_v13, 1 }
 0x4a0   :  { %1475 = vst [vmem:[#allocation3 + $0xb] sm:$0x1] %v8251_v10  ;;  %v1482_v58 = vcombine.low %v8249_v57, %v8251_v10 }
 0x4a2   :  { %v1489_v34 = vrot.slane %v1482_v58, %v8055_v5 }
 0x4a4   :  { %v1496_v62 = vrot.slane %v1489_v34, %v8055_v5 }
 0x4a6   :  { %1563 = vmatmul.mubr.f32.vlgmr.msra.gmra.mrb[8].mxu0 %v1496_v62  ;;  %5887 = vmatmul.mubr.f32.vlgmr.msra.gmra.mrb[14].mxu1 %v1496_v62 }
 0x4a7   :  { %6635 = vmatpush1.bf16.msra.mxu0 %v7886_v8  ;;  %6666 = vmatpush3.bf16.msra.mxu1 %v7938_v46 }
 0x4a8   :  { %6637 = vmatprep.subr.bf16.mxu0 %v7888_v9  ;;  %6667 = vmatprep.subr.bf16.mxu1 %v7766_v38 }
 0x4a9   :  { %1852 = vmatprep.mubr.f32.mxu0 %v7765_v0  ;;  %5921 = vmatprep.mubr.msk.f32.mxu1 %vm7767_vm1, %v7765_v0 }
 0x4ab   :  { %6639 = vmatpush1.bf16.msra.mxu0 %v7898_v16  ;;  %6669 = vmatpush3.bf16.msra.mxu1 %v7948_v55 }
 0x4ac   :  { %6641 = vmatprep.subr.bf16.mxu0 %v7907_v20  ;;  %6670 = vmatprep.subr.bf16.mxu1 %v7766_v38 }
 0x4af   :  { %6643 = vmatpush1.bf16.msra.mxu0 %v7919_v29  ;;  %6672 = vmatpush3.bf16.msra.mxu1 %v7960_v1 }
 0x4b0   :  { %6645 = vmatprep.subr.bf16.mxu0 %v7922_v31  ;;  %6673 = vmatprep.subr.bf16.mxu1 %v7766_v38 }
 0x4b3   :  { %6647 = vmatpush1.bf16.msra.mxu0 %v7930_v37  ;;  %6675 = vmatpush3.bf16.msra.mxu1 %v7970_v11 }
 0x4b4   :  { %6649 = vmatprep.subr.bf16.mxu0 %v7934_v40  ;;  %6676 = vmatprep.subr.bf16.mxu1 %v7766_v38 }
 0x4b7   :  { %6651 = vmatpush1.bf16.msra.mxu0 %v7941_v47  ;;  %6678 = vmatpush3.bf16.msra.mxu1 %v7978_v15 }
 0x4b8   :  { %6653 = vmatprep.subr.bf16.mxu0 %v7944_v50  ;;  %6679 = vmatprep.subr.bf16.mxu1 %v7766_v38 }
 0x4bb   :  { %6655 = vmatpush1.bf16.msra.mxu0 %v7953_v56  ;;  %6681 = vmatpush3.bf16.msra.mxu1 %v7985_v19 }
 0x4bc   :  { %6657 = vmatprep.subr.bf16.mxu0 %v7957_v59  ;;  %6682 = vmatprep.subr.bf16.mxu1 %v7766_v38 }
 0x4bf   :  { %6659 = vmatpush1.bf16.msra.mxu0 %v7963_v2  ;;  %6684 = vmatpush3.bf16.msra.mxu1 %v7992_v23 }
 0x4c0   :  { %6661 = vmatprep.subr.bf16.mxu0 %v7967_v6  ;;  %6685 = vmatprep.subr.bf16.mxu1 %v7766_v38 }
 0x4c3   :  { %6663 = vmatpush1.bf16.msra.mxu0 %v7973_v12  ;;  %6687 = vmatpush3.bf16.msra.mxu1 %v7998_v26 }
 0x4c4   :  { %6689 = vmatprep.subr.bf16.mxu0 %v7884_v4  ;;  %6720 = vmatprep.subr.bf16.mxu1 %v7766_v38 }
 0x579   :  { %v1564_v7 = vpop.f32.mrb[8].mxu0  ;;  %v1635_v14 = vpop.f32.mrb[14].mxu1 }
 0x57a   :  { %v1565_v61 = vadd.f32 %v1564_v7, %v8050_v63  ;;  %v1566_v17 = vpop.f32.mrb[9].mxu0  ;;  %v5888_v18 = vpop.f32.mrb[15].mxu1  ;;  %v1636_v7 = vadd.f32 %v1635_v14, %v8066_v51 }
 0x57b   :  { %v1567_v21 = vadd.f32 %v1566_v17, %v8053_v3 }
 0x57c   :  { %v1646_v22 = vrot.slane %v1565_v61, %v8055_v5  ;;  %v1730_v17 = vrot.slane %v1636_v7, %v8055_v5 }
 0x57d   :  { %v1691_v39 = vrot.slane %v1567_v21, %v8055_v5 }
 0x57e   :  { %v1647_v27 = vcombine.high %v1646_v22, %v1646_v22  ;;  %v1654_v35 = vrot.slane %v1646_v22, %v8055_v5  ;;  %v1731_v18 = vcombine.high %v1730_v17, %v1730_v17  ;;  %v1738_v22 = vrot.slane %v1730_v17, %v8055_v5 }
 0x57f   :  { %v1692_v49 = vcombine.high %v1691_v39, %v1691_v39  ;;  %v1699_v53 = vrot.slane %v1691_v39, %v8055_v5 }
 0x580   :  { %v1661_v42 = vrot.slane %v1647_v27, %v8055_v5  ;;  %v1664_v44 = vadd.f32 %v1654_v35, %v1477_v41  ;;  %v1745_v39 = vrot.slane %v1731_v18, %v8055_v5 }
 0x581   :  { %v1706_v25 = vrot.slane %v1692_v49, %v8055_v5  ;;  %v1709_v28 = vadd.f32 %v1699_v53, %v1680_v54  ;;  %v1751_v49 = vrot.slane %v1479_v13, 2 }
 0x582   :  { %v1665_v45 = vadd.f32 %v1661_v42, %v1479_v13  ;;  %v5347_v48 = vmul.f32 -1.442695, %v1664_v44  ;;  %v1750_v44 = vrot.slane %v1477_v41, 2 }
 0x583   :  { %v1710_v60 = vadd.f32 %v1706_v25, %v1681_v32  ;;  %v5349_v36 = vmul.f32 -1.442695, %v1709_v28 }
 0x584   :  { %7426 = vpow2.f32 %v5347_v48  ;;  %v5348_v52 = vmul.f32 -1.442695, %v1665_v45 }
 0x585   :  { %v5350_v58 = vmul.f32 -1.442695, %v1710_v60 }
 0x586   :  { %7428 = vpow2.f32 %v5348_v52 }
 0x587   :  { %7430 = vpow2.f32 %v5349_v36 }
 0x58e   :  { %v7427_v24 = vpop.eup %7426 }
 0x58f   :  { %v1672_v34 = vadd.f32 1.0, %v7427_v24 }
 0x590   :  { %v7429_v62 = vpop.eup %7428 }
 0x591   :  { %v1673_v61 = vadd.f32 1.0, %v7429_v62  ;;  %7432 = vrcp.f32 %v1672_v34  ;;  %v7431_v21 = vpop.eup %7430 }
 0x592   :  { %7434 = vpow2.f32 %v5350_v58  ;;  %v1717_v48 = vadd.f32 1.0, %v7431_v21 }
 0x593   :  { %7436 = vrcp.f32 %v1673_v61 }
 0x59b   :  { %v7433_v27 = vpop.eup %7432 }
 0x59c   :  { %v7435_v35 = vpop.eup %7434  ;;  %v1748_v42 = vmul.f32 %v7433_v27, %v1738_v22 }
 0x59d   :  { %v7437_v45 = vpop.eup %7436  ;;  %v1718_v54 = vadd.f32 1.0, %v7435_v35 }
 0x59e   :  { %v1749_v14 = vmul.f32 %v7437_v45, %v1745_v39  ;;  %v1754_v52 = vadd.f32 %v1750_v44, %v1748_v42  ;;  %v1767_v44 = vld [vmem:[#allocation2 + $0x5] ss:$8 sm:$0x7] }
 0x5a0   :  { %v1755_v53 = vadd.f32 %v1751_v49, %v1749_v14  ;;  %7438 = vtanh.f32 %v1754_v52 }
 0x5a1   :  { %7440 = vrcp.f32 %v1717_v48  ;;  %v1769_v48 = vld [vmem:[#allocation2 + $0x1d] ss:$8 sm:$0x7] }
 0x5a2   :  { %7442 = vtanh.f32 %v1755_v53 }
 0x5a3   :  { %7444 = vrcp.f32 %v1718_v54 }
 0x5aa   :  { %v7439_v25 = vpop.eup %7438 }
 0x5ab   :  { %v7441_v32 = vpop.eup %7440  ;;  %v1758_v28 = vsub.f32 %v8249_v57, %v7439_v25 }
 0x5ac   :  { %v7443_v60 = vpop.eup %7442 }
 0x5ad   :  { %v1759_v36 = vsub.f32 %v8251_v10, %v7443_v60  ;;  %v1760_v24 = vmul.f32 %v7441_v32, %v1758_v28  ;;  %v7445_v41 = vpop.eup %7444  ;;  %v1971_v28 = vrot.slane %v1769_v48, 1 }
 0x5af   :  { %v1761_v58 = vmul.f32 %v7445_v41, %v1759_v36  ;;  %v8308_v34 = vadd.f32 %v7439_v25, %v1760_v24  ;;  %v1970_v25 = vrot.slane %v1767_v44, 1 }
 0x5b1   :  { %v8310_v13 = vadd.f32 %v7443_v60, %v1761_v58  ;;  %1764 = vst [vmem:[#allocation3 + $0x4] sm:$0x1] %v8308_v34 }
 0x5b3   :  { %1765 = vst [vmem:[#allocation3 + $0xc] sm:$0x1] %v8310_v13  ;;  %v1772_v62 = vcombine.low %v8308_v34, %v8310_v13 }
 0x5b5   :  { %v1779_v7 = vrot.slane %v1772_v62, %v8055_v5 }
 0x5b7   :  { %v1786_v57 = vrot.slane %v1779_v7, %v8055_v5 }
 0x5b9   :  { %1853 = vmatmul.mubr.f32.vlgmr.msra.gmra.mrb[10].mxu0 %v1786_v57  ;;  %5922 = vmatmul.mubr.f32.vlgmr.msra.gmra.mrb[16].mxu1 %v1786_v57 }
 0x5ba   :  { %6691 = vmatpush1.bf16.msra.mxu0 %v7886_v8  ;;  %6722 = vmatpush3.bf16.msra.mxu1 %v7938_v46 }
 0x5bb   :  { %6693 = vmatprep.subr.bf16.mxu0 %v7888_v9  ;;  %6723 = vmatprep.subr.bf16.mxu1 %v7766_v38 }
 0x5bc   :  { %2142 = vmatprep.mubr.f32.mxu0 %v7765_v0  ;;  %5956 = vmatprep.mubr.msk.f32.mxu1 %vm7767_vm1, %v7765_v0 }
 0x5be   :  { %6695 = vmatpush1.bf16.msra.mxu0 %v7898_v16  ;;  %6725 = vmatpush3.bf16.msra.mxu1 %v7948_v55 }
 0x5bf   :  { %6697 = vmatprep.subr.bf16.mxu0 %v7907_v20  ;;  %6726 = vmatprep.subr.bf16.mxu1 %v7766_v38 }
 0x5c2   :  { %6699 = vmatpush1.bf16.msra.mxu0 %v7919_v29  ;;  %6728 = vmatpush3.bf16.msra.mxu1 %v7960_v1 }
 0x5c3   :  { %6701 = vmatprep.subr.bf16.mxu0 %v7922_v31  ;;  %6729 = vmatprep.subr.bf16.mxu1 %v7766_v38 }
 0x5c6   :  { %6703 = vmatpush1.bf16.msra.mxu0 %v7930_v37  ;;  %6731 = vmatpush3.bf16.msra.mxu1 %v7970_v11 }
 0x5c7   :  { %6705 = vmatprep.subr.bf16.mxu0 %v7934_v40  ;;  %6732 = vmatprep.subr.bf16.mxu1 %v7766_v38 }
 0x5ca   :  { %6707 = vmatpush1.bf16.msra.mxu0 %v7941_v47  ;;  %6734 = vmatpush3.bf16.msra.mxu1 %v7978_v15 }
 0x5cb   :  { %6709 = vmatprep.subr.bf16.mxu0 %v7944_v50  ;;  %6735 = vmatprep.subr.bf16.mxu1 %v7766_v38 }
 0x5ce   :  { %6711 = vmatpush1.bf16.msra.mxu0 %v7953_v56  ;;  %6737 = vmatpush3.bf16.msra.mxu1 %v7985_v19 }
 0x5cf   :  { %6713 = vmatprep.subr.bf16.mxu0 %v7957_v59  ;;  %6738 = vmatprep.subr.bf16.mxu1 %v7766_v38 }
 0x5d2   :  { %6715 = vmatpush1.bf16.msra.mxu0 %v7963_v2  ;;  %6740 = vmatpush3.bf16.msra.mxu1 %v7992_v23 }
 0x5d3   :  { %6717 = vmatprep.subr.bf16.mxu0 %v7967_v6  ;;  %6741 = vmatprep.subr.bf16.mxu1 %v7766_v38 }
 0x5d6   :  { %6719 = vmatpush1.bf16.msra.mxu0 %v7973_v12  ;;  %6743 = vmatpush3.bf16.msra.mxu1 %v7998_v26 }
 0x5d7   :  { %6745 = vmatprep.subr.bf16.mxu0 %v7884_v4  ;;  %6776 = vmatprep.subr.bf16.mxu1 %v7766_v38 }
 0x68c   :  { %v1854_v10 = vpop.f32.mrb[10].mxu0  ;;  %v1925_v61 = vpop.f32.mrb[16].mxu1 }
 0x68d   :  { %v1855_v17 = vadd.f32 %v1854_v10, %v8050_v63  ;;  %v1856_v18 = vpop.f32.mrb[11].mxu0  ;;  %v5923_v21 = vpop.f32.mrb[17].mxu1  ;;  %v1926_v57 = vadd.f32 %v1925_v61, %v8066_v51 }
 0x68e   :  { %v1857_v22 = vadd.f32 %v1856_v18, %v8053_v3 }
 0x68f   :  { %v1936_v27 = vrot.slane %v1855_v17, %v8055_v5  ;;  %v2020_v17 = vrot.slane %v1926_v57, %v8055_v5 }
 0x690   :  { %v1981_v42 = vrot.slane %v1857_v22, %v8055_v5 }
 0x691   :  { %v1937_v35 = vcombine.high %v1936_v27, %v1936_v27  ;;  %v1944_v39 = vrot.slane %v1936_v27, %v8055_v5  ;;  %v2021_v18 = vcombine.high %v2020_v17, %v2020_v17  ;;  %v2028_v22 = vrot.slane %v2020_v17, %v8055_v5 }
 0x692   :  { %v1982_v52 = vcombine.high %v1981_v42, %v1981_v42  ;;  %v1989_v54 = vrot.slane %v1981_v42, %v8055_v5 }
 0x693   :  { %v1951_v4 = vrot.slane %v1937_v35, %v8055_v5  ;;  %v1954_v45 = vadd.f32 %v1944_v39, %v1767_v44  ;;  %v2035_v39 = vrot.slane %v2021_v18, %v8055_v5 }
 0x694   :  { %v1996_v32 = vrot.slane %v1982_v52, %v8055_v5  ;;  %v1999_v60 = vadd.f32 %v1989_v54, %v1970_v25 }
 0x695   :  { %v1955_v14 = vadd.f32 %v1951_v4, %v1769_v48  ;;  %v5351_v49 = vmul.f32 -1.442695, %v1954_v45  ;;  %v2040_v4 = vrot.slane %v1767_v44, 2 }
 0x696   :  { %v2000_v36 = vadd.f32 %v1996_v32, %v1971_v28  ;;  %v5353_v24 = vmul.f32 -1.442695, %v1999_v60 }
 0x697   :  { %7446 = vpow2.f32 %v5351_v49  ;;  %v5352_v53 = vmul.f32 -1.442695, %v1955_v14  ;;  %v2041_v49 = vrot.slane %v1769_v48, 2 }
 0x698   :  { %v5354_v58 = vmul.f32 -1.442695, %v2000_v36 }
 0x699   :  { %7448 = vpow2.f32 %v5352_v53 }
 0x69a   :  { %7450 = vpow2.f32 %v5353_v24 }
 0x6a1   :  { %v7447_v41 = vpop.eup %7446 }
 0x6a2   :  { %v1962_v62 = vadd.f32 1.0, %v7447_v41 }
 0x6a3   :  { %v7449_v7 = vpop.eup %7448 }
 0x6a4   :  { %v1963_v10 = vadd.f32 1.0, %v7449_v7  ;;  %7452 = vrcp.f32 %v1962_v62  ;;  %v7451_v21 = vpop.eup %7450 }
 0x6a5   :  { %7454 = vpow2.f32 %v5354_v58  ;;  %v2007_v14 = vadd.f32 1.0, %v7451_v21 }
 0x6a6   :  { %7456 = vrcp.f32 %v1963_v10 }
 0x6ae   :  { %v7453_v27 = vpop.eup %7452 }
 0x6af   :  { %v7455_v35 = vpop.eup %7454  ;;  %v2038_v42 = vmul.f32 %v7453_v27, %v2028_v22 }
 0x6b0   :  { %v7457_v45 = vpop.eup %7456  ;;  %v2008_v54 = vadd.f32 1.0, %v7455_v35 }
 0x6b1   :  { %v2039_v61 = vmul.f32 %v7457_v45, %v2035_v39  ;;  %v2044_v52 = vadd.f32 %v2040_v4, %v2038_v42 }
 0x6b3   :  { %v2045_v53 = vadd.f32 %v2041_v49, %v2039_v61  ;;  %7458 = vtanh.f32 %v2044_v52 }
 0x6b4   :  { %7460 = vrcp.f32 %v2007_v14 }
 0x6b5   :  { %7462 = vtanh.f32 %v2045_v53 }
 0x6b6   :  { %7464 = vrcp.f32 %v2008_v54 }
 0x6bd   :  { %v7459_v25 = vpop.eup %7458 }
 0x6be   :  { %v7461_v32 = vpop.eup %7460  ;;  %v2048_v28 = vsub.f32 %v8308_v34, %v7459_v25 }
 0x6bf   :  { %v7463_v60 = vpop.eup %7462 }
 0x6c0   :  { %v2049_v36 = vsub.f32 %v8310_v13, %v7463_v60  ;;  %v2050_v24 = vmul.f32 %v7461_v32, %v2048_v28  ;;  %v7465_v44 = vpop.eup %7464 }
 0x6c2   :  { %v2051_v41 = vmul.f32 %v7465_v44, %v2049_v36  ;;  %v8367_v58 = vadd.f32 %v7459_v25, %v2050_v24 }
 0x6c4   :  { %v8369_v48 = vadd.f32 %v7463_v60, %v2051_v41  ;;  %2054 = vst [vmem:[#allocation3 + $0x5] sm:$0x1] %v8367_v58 }
 0x6c6   :  { %2055 = vst [vmem:[#allocation3 + $0xd] sm:$0x1] %v8369_v48  ;;  %v2062_v62 = vcombine.low %v8367_v58, %v8369_v48 }
 0x6c8   :  { %v2069_v7 = vrot.slane %v2062_v62, %v8055_v5 }
 0x6ca   :  { %v2076_v34 = vrot.slane %v2069_v7, %v8055_v5 }
 0x6cc   :  { %2143 = vmatmul.mubr.f32.vlgmr.msra.gmra.mrb[12].mxu0 %v2076_v34  ;;  %5957 = vmatmul.mubr.f32.vlgmr.msra.gmra.mrb[18].mxu1 %v2076_v34 }
 0x6cd   :  { %6747 = vmatpush1.bf16.msra.mxu0 %v7886_v8  ;;  %6778 = vmatpush3.bf16.msra.mxu1 %v7938_v46 }
 0x6ce   :  { %6749 = vmatprep.subr.bf16.mxu0 %v7888_v9  ;;  %6779 = vmatprep.subr.bf16.mxu1 %v7766_v38 }
 0x6cf   :  { %2432 = vmatprep.mubr.f32.mxu0 %v7765_v0  ;;  %5991 = vmatprep.mubr.msk.f32.mxu1 %vm7767_vm1, %v7765_v0 }
 0x6d1   :  { %6751 = vmatpush1.bf16.msra.mxu0 %v7898_v16  ;;  %6781 = vmatpush3.bf16.msra.mxu1 %v7948_v55 }
 0x6d2   :  { %6753 = vmatprep.subr.bf16.mxu0 %v7907_v20  ;;  %6782 = vmatprep.subr.bf16.mxu1 %v7766_v38 }
 0x6d5   :  { %6755 = vmatpush1.bf16.msra.mxu0 %v7919_v29  ;;  %6784 = vmatpush3.bf16.msra.mxu1 %v7960_v1 }
 0x6d6   :  { %6757 = vmatprep.subr.bf16.mxu0 %v7922_v31  ;;  %6785 = vmatprep.subr.bf16.mxu1 %v7766_v38 }
 0x6d9   :  { %6759 = vmatpush1.bf16.msra.mxu0 %v7930_v37  ;;  %6787 = vmatpush3.bf16.msra.mxu1 %v7970_v11 }
 0x6da   :  { %6761 = vmatprep.subr.bf16.mxu0 %v7934_v40  ;;  %6788 = vmatprep.subr.bf16.mxu1 %v7766_v38 }
 0x6dd   :  { %6763 = vmatpush1.bf16.msra.mxu0 %v7941_v47  ;;  %6790 = vmatpush3.bf16.msra.mxu1 %v7978_v15 }
 0x6de   :  { %6765 = vmatprep.subr.bf16.mxu0 %v7944_v50  ;;  %6791 = vmatprep.subr.bf16.mxu1 %v7766_v38  ;;  %v2057_v50 = vld [vmem:[#allocation2 + $0x6] ss:$8 sm:$0x7] }
 0x6df   :  { %v2260_v15 = vrot.slane %v2057_v50, 1  ;;  %v2330_v52 = vrot.slane %v2057_v50, 2 }
 0x6e1   :  { %6767 = vmatpush1.bf16.msra.mxu0 %v7953_v56  ;;  %6793 = vmatpush3.bf16.msra.mxu1 %v7985_v19 }
 0x6e2   :  { %6769 = vmatprep.subr.bf16.mxu0 %v7957_v59  ;;  %6794 = vmatprep.subr.bf16.mxu1 %v7766_v38  ;;  %v2059_v59 = vld [vmem:[#allocation2 + $0x1e] ss:$8 sm:$0x7] }
 0x6e3   :  { %v2331_v32 = vrot.slane %v2059_v59, 2 }
 0x6e5   :  { %6771 = vmatpush1.bf16.msra.mxu0 %v7963_v2  ;;  %6796 = vmatpush3.bf16.msra.mxu1 %v7992_v23  ;;  %v2261_v23 = vrot.slane %v2059_v59, 1 }
 0x6e6   :  { %6773 = vmatprep.subr.bf16.mxu0 %v7967_v6  ;;  %6797 = vmatprep.subr.bf16.mxu1 %v7766_v38 }
 0x6e9   :  { %6775 = vmatpush1.bf16.msra.mxu0 %v7973_v12  ;;  %6799 = vmatpush3.bf16.msra.mxu1 %v7998_v26 }
 0x79f   :  { %v2144_v8 = vpop.f32.mrb[12].mxu0  ;;  %v2215_v9 = vpop.f32.mrb[18].mxu1 }
 0x7a0   :  { %v2145_v16 = vadd.f32 %v2144_v8, %v8050_v63  ;;  %v2146_v20 = vpop.f32.mrb[13].mxu0  ;;  %v5958_v29 = vpop.f32.mrb[19].mxu1  ;;  %v2216_v22 = vadd.f32 %v2215_v9, %v8066_v51 }
 0x7a1   :  { %v2147_v31 = vadd.f32 %v2146_v20, %v8053_v3 }
 0x7a2   :  { %v2226_v37 = vrot.slane %v2145_v16, %v8055_v5  ;;  %v2310_v35 = vrot.slane %v2216_v22, %v8055_v5  ;;  %v2652_v22 = vld [vmem:[#allocation7 + $0x70] sm:$0xff] }
 0x7a3   :  { %v2271_v47 = vrot.slane %v2147_v31, %v8055_v5 }
 0x7a4   :  { %v2227_v40 = vcombine.high %v2226_v37, %v2226_v37  ;;  %v2234_v46 = vrot.slane %v2226_v37, %v8055_v5  ;;  %v2311_v39 = vcombine.high %v2310_v35, %v2310_v35  ;;  %v2318_v4 = vrot.slane %v2310_v35, %v8055_v5  ;;  %v2642_v37 = vld [vmem:[#allocation7 + $0x20] sm:$0xff] }
 0x7a5   :  { %v2272_v6 = vcombine.high %v2271_v47, %v2271_v47  ;;  %v2279_v12 = vrot.slane %v2271_v47, %v8055_v5  ;;  %v2641_v47 = vld [vmem:[#allocation7 + $0x18] sm:$0xff] }
 0x7a6   :  { %v2241_v55 = vrot.slane %v2227_v40, %v8055_v5  ;;  %v2244_v56 = vadd.f32 %v2234_v46, %v2057_v50  ;;  %v2325_v61 = vrot.slane %v2311_v39, %v8055_v5  ;;  %v2638_v46 = vld [vmem:[#allocation7] sm:$0xff]  ;;  %v2657_v39 = vld [vmem:[#allocation7 + $0x98] sm:$0xff] }
 0x7a7   :  { %v2286_v19 = vrot.slane %v2272_v6, %v8055_v5  ;;  %v2289_v26 = vadd.f32 %v2279_v12, %v2260_v15  ;;  %v6802_v50 = vpack.c.bf16 %v2641_v47, %v2638_v46  ;;  %v2647_v12 = vld [vmem:[#allocation7 + $0x48] sm:$0xff]  ;;  %v2674_v46 = vld [vmem:[#allocation7 + $0x120] sm:$0xff]  ;;  %v2677_v47 = vld [vmem:[#allocation7 + $0x138] sm:$0xff] }
 0x7a8   :  { %v2245_v1 = vadd.f32 %v2241_v55, %v2059_v59  ;;  %v5355_v2 = vmul.f32 -1.442695, %v2244_v56  ;;  %v2640_v55 = vld [vmem:[#allocation7 + $0x10] sm:$0xff]  ;;  %v2643_v56 = vld [vmem:[#allocation7 + $0x28] sm:$0xff] }
 0x7a9   :  { %v2290_v13 = vadd.f32 %v2286_v19, %v2261_v23  ;;  %v5357_v57 = vmul.f32 -1.442695, %v2289_v26  ;;  %v6832_v59 = vpack.c.bf16 %v2643_v56, %v2640_v55  ;;  %v2646_v19 = vld [vmem:[#allocation7 + $0x40] sm:$0xff]  ;;  %v2649_v23 = vld [vmem:[#allocation7 + $0x58] sm:$0xff]  ;;  %v6826_v55 = vpack.c.bf16 %v2677_v47, %v2674_v46  ;;  %v2676_v56 = vld [vmem:[#allocation7 + $0x130] sm:$0xff] }
 0x7aa   :  { %7466 = vpow2.f32 %v5355_v2  ;;  %v5356_v11 = vmul.f32 -1.442695, %v2245_v1  ;;  %v2645_v1 = vld [vmem:[#allocation7 + $0x38] sm:$0xff]  ;;  %v2648_v2 = vld [vmem:[#allocation7 + $0x50] sm:$0xff]  ;;  %v6836_v26 = vpack.c.bf16 %v2649_v23, %v2646_v19  ;;  %v2682_v19 = vld [vmem:[#allocation7 + $0x160] sm:$0xff] }
 0x7ab   :  { %v5358_v17 = vmul.f32 -1.442695, %v2290_v13  ;;  %v6804_v6 = vpack.c.bf16 %v2648_v2, %v2645_v1  ;;  %6833 = vmatprep.subr.bf16.mxu1 %v6832_v59  ;;  %v2651_v13 = vld [vmem:[#allocation7 + $0x68] sm:$0xff]  ;;  %v2681_v1 = vld [vmem:[#allocation7 + $0x158] sm:$0xff] }
 0x7ac   :  { %7468 = vpow2.f32 %v5356_v11  ;;  %v2644_v11 = vld [vmem:[#allocation7 + $0x30] sm:$0xff]  ;;  %v2685_v23 = vld [vmem:[#allocation7 + $0x178] sm:$0xff] }
 0x7ad   :  { %7470 = vpow2.f32 %v5357_v57  ;;  %v6806_v15 = vpack.c.bf16 %v2647_v12, %v2644_v11  ;;  %v2654_v57 = vld [vmem:[#allocation7 + $0x80] sm:$0xff]  ;;  %v2680_v11 = vld [vmem:[#allocation7 + $0x150] sm:$0xff]  ;;  %v2683_v12 = vld [vmem:[#allocation7 + $0x168] sm:$0xff] }
 0x7b4   :  { %v7467_v10 = vpop.eup %7466 }
 0x7b5   :  { %v2252_v18 = vadd.f32 1.0, %v7467_v10  ;;  %v6808_v10 = vpack.c.bf16 %v2654_v57, %v2651_v13  ;;  %v6830_v13 = vpack.c.bf16 %v2683_v12, %v2680_v11  ;;  %v6860_v57 = vpack.c.bf16 %v2685_v23, %v2682_v19 }
 0x7b6   :  { %v7469_v21 = vpop.eup %7468 }
 0x7b7   :  { %v2253_v27 = vadd.f32 1.0, %v7469_v21  ;;  %7472 = vrcp.f32 %v2252_v18  ;;  %v7471_v42 = vpop.eup %7470  ;;  %v2653_v18 = vld [vmem:[#allocation7 + $0x78] sm:$0xff] }
 0x7b8   :  { %7474 = vpow2.f32 %v5358_v17  ;;  %v2297_v54 = vadd.f32 1.0, %v7471_v42  ;;  %v2650_v17 = vld [vmem:[#allocation7 + $0x60] sm:$0xff]  ;;  %v2660_v42 = vld [vmem:[#allocation7 + $0xb0] sm:$0xff] }
 0x7b9   :  { %7476 = vrcp.f32 %v2253_v27  ;;  %v6810_v21 = vpack.c.bf16 %v2653_v18, %v2650_v17  ;;  %v2655_v27 = vld [vmem:[#allocation7 + $0x88] sm:$0xff] }
 0x7ba   :  { %v6840_v35 = vpack.c.bf16 %v2655_v27, %v2652_v22 }
 0x7c1   :  { %v7473_v45 = vpop.eup %7472 }
 0x7c2   :  { %v7475_v14 = vpop.eup %7474  ;;  %v2328_v49 = vmul.f32 %v7473_v45, %v2318_v4  ;;  %v6812_v4 = vpack.c.bf16 %v2660_v42, %v2657_v39  ;;  %v2656_v45 = vld [vmem:[#allocation7 + $0x90] sm:$0xff] }
 0x7c3   :  { %v7477_v53 = vpop.eup %7476  ;;  %v2298_v36 = vadd.f32 1.0, %v7475_v14  ;;  %v2659_v14 = vld [vmem:[#allocation7 + $0xa8] sm:$0xff] }
 0x7c4   :  { %v2329_v25 = vmul.f32 %v7477_v53, %v2325_v61  ;;  %v2334_v28 = vadd.f32 %v2330_v52, %v2328_v49  ;;  %v6814_v61 = vpack.c.bf16 %v2659_v14, %v2656_v45  ;;  %v2658_v49 = vld [vmem:[#allocation7 + $0xa0] sm:$0xff]  ;;  %v2661_v52 = vld [vmem:[#allocation7 + $0xb8] sm:$0xff] }
 0x7c5   :  { %v6844_v53 = vpack.c.bf16 %v2661_v52, %v2658_v49 }
 0x7c6   :  { %v2335_v60 = vadd.f32 %v2331_v32, %v2329_v25  ;;  %7478 = vtanh.f32 %v2334_v28  ;;  %v2666_v25 = vld [vmem:[#allocation7 + $0xe0] sm:$0xff] }
 0x7c7   :  { %7480 = vrcp.f32 %v2297_v54  ;;  %v2663_v54 = vld [vmem:[#allocation7 + $0xc8] sm:$0xff]  ;;  %v2662_v28 = vld [vmem:[#allocation7 + $0xc0] sm:$0xff] }
 0x7c8   :  { %7482 = vtanh.f32 %v2335_v60  ;;  %v6816_v32 = vpack.c.bf16 %v2666_v25, %v2663_v54  ;;  %v2665_v60 = vld [vmem:[#allocation7 + $0xd8] sm:$0xff] }
 0x7c9   :  { %7484 = vrcp.f32 %v2298_v36  ;;  %v6818_v36 = vpack.c.bf16 %v2665_v60, %v2662_v28 }
 0x7d0   :  { %v7479_v24 = vpop.eup %7478 }
 0x7d1   :  { %v7481_v44 = vpop.eup %7480  ;;  %v2338_v41 = vsub.f32 %v8367_v58, %v7479_v24 }
 0x7d2   :  { %v7483_v62 = vpop.eup %7482 }
 0x7d3   :  { %v2339_v7 = vsub.f32 %v8369_v48, %v7483_v62  ;;  %v2340_v34 = vmul.f32 %v7481_v44, %v2338_v41  ;;  %v7485_v8 = vpop.eup %7484  ;;  %v2639_v48 = vld [vmem:[#allocation7 + $0x8] sm:$0xff] }
 0x7d4   :  { %v6800_v40 = vpack.c.bf16 %v2642_v37, %v2639_v48  ;;  %v2667_v44 = vld [vmem:[#allocation7 + $0xe8] sm:$0xff] }
 0x7d5   :  { %v2341_v9 = vmul.f32 %v7485_v8, %v2339_v7  ;;  %v8424_v16 = vadd.f32 %v7479_v24, %v2340_v34  ;;  %v2664_v24 = vld [vmem:[#allocation7 + $0xd0] sm:$0xff]  ;;  %v2675_v48 = vld [vmem:[#allocation7 + $0x128] sm:$0xff] }
 0x7d6   :  { %6801 = vmatprep.subr.bf16.mxu0 %v6800_v40  ;;  %v6848_v41 = vpack.c.bf16 %v2667_v44, %v2664_v24  ;;  %v2672_v7 = vld [vmem:[#allocation7 + $0x110] sm:$0xff]  ;;  %v2678_v40 = vld [vmem:[#allocation7 + $0x140] sm:$0xff] }
 0x7d7   :  { %v8426_v20 = vadd.f32 %v7483_v62, %v2341_v9  ;;  %2344 = vst [vmem:[#allocation3 + $0x6] sm:$0x1] %v8424_v16  ;;  %v2669_v62 = vld [vmem:[#allocation7 + $0xf8] sm:$0xff]  ;;  %v2668_v8 = vld [vmem:[#allocation7 + $0xf0] sm:$0xff]  ;;  %v2671_v9 = vld [vmem:[#allocation7 + $0x108] sm:$0xff] }
 0x7d8   :  { %v6820_v34 = vpack.c.bf16 %v2672_v7, %v2669_v62 }
 0x7d9   :  { %2345 = vst [vmem:[#allocation3 + $0xe] sm:$0x1] %v8426_v20  ;;  %v2352_v29 = vcombine.low %v8424_v16, %v8426_v20 }
 0x7db   :  { %v2359_v31 = vrot.slane %v2352_v29, %v8055_v5  ;;  %v6822_v29 = vpack.c.bf16 %v2671_v9, %v2668_v8 }
 0x7dd   :  { %v2366_v58 = vrot.slane %v2359_v31, %v8055_v5  ;;  %v2670_v31 = vld [vmem:[#allocation7 + $0x100] sm:$0xff] }
 0x7df   :  { %2433 = vmatmul.mubr.f32.vlgmr.msra.gmra.mrb[14].mxu0 %v2366_v58  ;;  %5992 = vmatmul.mubr.f32.vlgmr.msra.gmra.mrb[20].mxu1 %v2366_v58  ;;  %v2673_v58 = vld [vmem:[#allocation7 + $0x118] sm:$0xff] }
 0x7e0   :  { %2767 = vmatprep.mubr.f32.mxu0 %v7765_v0  ;;  %6803 = vmatpush1.bf16.msra.mxu0 %v6802_v50  ;;  %v6852_v37 = vpack.c.bf16 %v2673_v58, %v2670_v31  ;;  %v6824_v50 = vpack.c.bf16 %v2678_v40, %v2675_v48 }
 0x7e1   :  { %6805 = vmatprep.subr.bf16.mxu0 %v6804_v6  ;;  %6835 = vmatpush3.bf16.msra.mxu1 %v6832_v59  ;;  %v2679_v59 = vld [vmem:[#allocation7 + $0x148] sm:$0xff]  ;;  %v2684_v6 = vld [vmem:[#allocation7 + $0x170] sm:$0xff] }
 0x7e2   :  { %6837 = vmatprep.subr.bf16.mxu1 %v6836_v26  ;;  %v6856_v2 = vpack.c.bf16 %v2679_v59, %v2676_v56 }
 0x7e4   :  { %6807 = vmatpush1.bf16.msra.mxu0 %v6806_v15  ;;  %v6828_v15 = vpack.c.bf16 %v2684_v6, %v2681_v1 }
 0x7e5   :  { %6809 = vmatprep.subr.bf16.mxu0 %v6808_v10  ;;  %6839 = vmatpush3.bf16.msra.mxu1 %v6836_v26  ;;  %v2862_v26 = vld [vmem:[#allocation9 + $0x8] sm:$0xff]  ;;  %v2865_v10 = vld [vmem:[#allocation9 + $0x20] sm:$0xff] }
 0x7e6   :  { %6841 = vmatprep.subr.bf16.mxu1 %v6840_v35  ;;  %v8435_v17 = vpack.c.bf16 %v2865_v10, %v2862_v26 }
 0x7e8   :  { %6811 = vmatpush1.bf16.msra.mxu0 %v6810_v21 }
 0x7e9   :  { %6813 = vmatprep.subr.bf16.mxu0 %v6812_v4  ;;  %6843 = vmatpush3.bf16.msra.mxu1 %v6840_v35 }
 0x7ea   :  { %6845 = vmatprep.subr.bf16.mxu1 %v6844_v53 }
 0x7ec   :  { %6815 = vmatpush1.bf16.msra.mxu0 %v6814_v61  ;;  %v2347_v61 = vld [vmem:[#allocation2 + $0x7] ss:$8 sm:$0x7] }
 0x7ed   :  { %6817 = vmatprep.subr.bf16.mxu0 %v6816_v32  ;;  %6847 = vmatpush3.bf16.msra.mxu1 %v6844_v53  ;;  %v2349_v53 = vld [vmem:[#allocation2 + $0x1f] ss:$8 sm:$0x7] }
 0x7ee   :  { %6849 = vmatprep.subr.bf16.mxu1 %v6848_v41  ;;  %v2621_v1 = vrot.slane %v2349_v53, 2 }
 0x7f0   :  { %6819 = vmatpush1.bf16.msra.mxu0 %v6818_v36  ;;  %v2551_v36 = vrot.slane %v2349_v53, 1 }
 0x7f1   :  { %6821 = vmatprep.subr.bf16.mxu0 %v6820_v34  ;;  %6851 = vmatpush3.bf16.msra.mxu1 %v6848_v41 }
 0x7f2   :  { %6853 = vmatprep.subr.bf16.mxu1 %v6852_v37 }
 0x7f4   :  { %6823 = vmatpush1.bf16.msra.mxu0 %v6822_v29 }
 0x7f5   :  { %6825 = vmatprep.subr.bf16.mxu0 %v6824_v50  ;;  %6855 = vmatpush3.bf16.msra.mxu1 %v6852_v37 }
 0x7f6   :  { %6857 = vmatprep.subr.bf16.mxu1 %v6856_v2 }
 0x7f8   :  { %6827 = vmatpush1.bf16.msra.mxu0 %v6826_v55  ;;  %v2620_v55 = vrot.slane %v2347_v61, 2 }
 0x7f9   :  { %6829 = vmatprep.subr.bf16.mxu0 %v6828_v15  ;;  %6859 = vmatpush3.bf16.msra.mxu1 %v6856_v2 }
 0x7fa   :  { %6861 = vmatprep.subr.bf16.mxu1 %v6860_v57 }
 0x7fc   :  { %6831 = vmatpush1.bf16.msra.mxu0 %v6830_v13 }
 0x7fd   :  { %6865 = vmatprep.subr.bf16.mxu0 %v8435_v17  ;;  %6863 = vmatpush3.bf16.msra.mxu1 %v6860_v57 }
 0x7fe   :  { %6896 = vmatprep.subr.bf16.mxu1 %v7766_v38 }
 0x8b2   :  { %v2434_v18 = vpop.f32.mrb[14].mxu0  ;;  %v2505_v21 = vpop.f32.mrb[20].mxu1 }
 0x8b3   :  { %v2435_v22 = vadd.f32 %v2434_v18, %v8050_v63  ;;  %v2436_v27 = vpop.f32.mrb[15].mxu0  ;;  %v5993_v35 = vpop.f32.mrb[21].mxu1  ;;  %v2506_v9 = vadd.f32 %v2505_v21, %v8066_v51 }
 0x8b4   :  { %v2437_v39 = vadd.f32 %v2436_v27, %v8053_v3  ;;  %v2550_v3 = vrot.slane %v2347_v61, 1  ;;  %v2864_v27 = vld [vmem:[#allocation9 + $0x18] sm:$0xff] }
 0x8b5   :  { %v2516_v42 = vrot.slane %v2435_v22, %v8055_v5  ;;  %v2600_v31 = vrot.slane %v2506_v9, %v8055_v5  ;;  %v2861_v22 = vld [vmem:[#allocation9] sm:$0xff]  ;;  %v2868_v35 = vld [vmem:[#allocation9 + $0x38] sm:$0xff]  ;;  %v2882_v9 = vld [vmem:[#allocation9 + $0xa8] sm:$0xff] }
 0x8b6   :  { %v2561_v14 = vrot.slane %v2437_v39, %v8055_v5  ;;  %v2871_v39 = vld [vmem:[#allocation9 + $0x50] sm:$0xff] }
 0x8b7   :  { %v2517_v4 = vcombine.high %v2516_v42, %v2516_v42  ;;  %v2524_v45 = vrot.slane %v2516_v42, %v8055_v5  ;;  %v2601_v58 = vcombine.high %v2600_v31, %v2600_v31  ;;  %v2608_v37 = vrot.slane %v2600_v31, %v8055_v5  ;;  %v2863_v42 = vld [vmem:[#allocation9 + $0x10] sm:$0xff]  ;;  %v2889_v31 = vld [vmem:[#allocation9 + $0xe0] sm:$0xff] }
 0x8b8   :  { %v2562_v32 = vcombine.high %v2561_v14, %v2561_v14  ;;  %v2569_v28 = vrot.slane %v2561_v14, %v8055_v5  ;;  %v8455_v14 = vpack.c.bf16 %v2871_v39, %v2868_v35  ;;  %v2899_v39 = vld [vmem:[#allocation9 + $0x130] sm:$0xff] }
 0x8b9   :  { %v2531_v49 = vrot.slane %v2517_v4, %v8055_v5  ;;  %v2534_v52 = vadd.f32 %v2524_v45, %v2347_v61  ;;  %v2615_v47 = vrot.slane %v2601_v58, %v8055_v5  ;;  %v2866_v4 = vld [vmem:[#allocation9 + $0x28] sm:$0xff]  ;;  %v8453_v45 = vpack.c.bf16 %v2864_v27, %v2861_v22  ;;  %v2904_v22 = vld [vmem:[#allocation9 + $0x158] sm:$0xff]  ;;  %v2907_v27 = vld [vmem:[#allocation9 + $0x170] sm:$0xff] }
 0x8ba   :  { %v2576_v60 = vrot.slane %v2562_v32, %v8055_v5  ;;  %v2579_v24 = vadd.f32 %v2569_v28, %v2550_v3  ;;  %v2870_v61 = vld [vmem:[#allocation9 + $0x48] sm:$0xff]  ;;  %v2873_v3 = vld [vmem:[#allocation9 + $0x60] sm:$0xff] }
 0x8bb   :  { %v2535_v54 = vadd.f32 %v2531_v49, %v2349_v53  ;;  %v5359_v25 = vmul.f32 -1.442695, %v2534_v52  ;;  %v2874_v49 = vld [vmem:[#allocation9 + $0x68] sm:$0xff]  ;;  %v2877_v52 = vld [vmem:[#allocation9 + $0x80] sm:$0xff]  ;;  %v8457_v53 = vpack.c.bf16 %v2866_v4, %v2863_v42 }
 0x8bc   :  { %v2580_v44 = vadd.f32 %v2576_v60, %v2551_v36  ;;  %v5361_v41 = vmul.f32 -1.442695, %v2579_v24  ;;  %v8464_v28 = vpack.c.bf16 %v2877_v52, %v2874_v49  ;;  %v2876_v60 = vld [vmem:[#allocation9 + $0x78] sm:$0xff]  ;;  %v2883_v24 = vld [vmem:[#allocation9 + $0xb0] sm:$0xff]  ;;  %v2902_v42 = vld [vmem:[#allocation9 + $0x148] sm:$0xff] }
 0x8bd   :  { %7486 = vpow2.f32 %v5359_v25  ;;  %v5360_v63 = vmul.f32 -1.442695, %v2535_v54  ;;  %v2869_v54 = vld [vmem:[#allocation9 + $0x40] sm:$0xff]  ;;  %v2872_v25 = vld [vmem:[#allocation9 + $0x58] sm:$0xff]  ;;  %v8520_v49 = vpack.c.bf16 %v2902_v42, %v2899_v39 }
 0x8be   :  { %v5362_v7 = vmul.f32 -1.442695, %v2580_v44  ;;  %v2880_v36 = vld [vmem:[#allocation9 + $0x98] sm:$0xff]  ;;  %v8467_v44 = vpack.c.bf16 %v2872_v25, %v2869_v54  ;;  %v2905_v52 = vld [vmem:[#allocation9 + $0x160] sm:$0xff] }
 0x8bf   :  { %7488 = vpow2.f32 %v5360_v63  ;;  %v2908_v54 = vld [vmem:[#allocation9 + $0x178] sm:$0xff] }
 0x8c0   :  { %7490 = vpow2.f32 %v5361_v41  ;;  %v2875_v41 = vld [vmem:[#allocation9 + $0x70] sm:$0xff] }
 0x8c7   :  { %v7487_v62 = vpop.eup %7486 }
 0x8c8   :  { %v2542_v34 = vadd.f32 1.0, %v7487_v62  ;;  %v2878_v62 = vld [vmem:[#allocation9 + $0x88] sm:$0xff] }
 0x8c9   :  { %v7489_v8 = vpop.eup %7488  ;;  %v8480_v58 = vpack.c.bf16 %v2878_v62, %v2875_v41 }
 0x8ca   :  { %v2543_v29 = vadd.f32 1.0, %v7489_v8  ;;  %7492 = vrcp.f32 %v2542_v34  ;;  %v7491_v48 = vpop.eup %7490  ;;  %v8477_v34 = vpack.c.bf16 %v2883_v24, %v2880_v36  ;;  %v2879_v8 = vld [vmem:[#allocation9 + $0x90] sm:$0xff] }
 0x8cb   :  { %7494 = vpow2.f32 %v5362_v7  ;;  %v2587_v59 = vadd.f32 1.0, %v7491_v48  ;;  %v8473_v7 = vpack.c.bf16 %v2876_v60, %v2873_v3  ;;  %v2881_v48 = vld [vmem:[#allocation9 + $0xa0] sm:$0xff] }
 0x8cc   :  { %7496 = vrcp.f32 %v2543_v29  ;;  %v2886_v29 = vld [vmem:[#allocation9 + $0xc8] sm:$0xff]  ;;  %v2686_v3 = vld [vmem:[%s9046_s7] sm:$0x7] }
 0x8cd   :  { %v2691_v60 = vrot.slane %v2686_v3, %v8034_v30  ;;  %v2695_v36 = vrot.slane %v2686_v3, %v8039_v33  ;;  %v2699_v24 = vrot.slane %v2686_v3, %v8043_v43 }
 0x8d4   :  { %v7493_v40 = vpop.eup %7492 }
 0x8d5   :  { %v7495_v46 = vpop.eup %7494  ;;  %v2618_v50 = vmul.f32 %v7493_v40, %v2608_v37  ;;  %v2884_v37 = vld [vmem:[#allocation9 + $0xb8] sm:$0xff]  ;;  %v8484_v40 = vpack.c.bf16 %v2882_v9, %v2879_v8 }
 0x8d6   :  { %v7497_v56 = vpop.eup %7496  ;;  %v2588_v11 = vadd.f32 1.0, %v7495_v46  ;;  %v8487_v46 = vpack.c.bf16 %v2889_v31, %v2886_v29 }
 0x8d7   :  { %v2619_v51 = vmul.f32 %v7497_v56, %v2615_v47  ;;  %v2624_v2 = vadd.f32 %v2620_v55, %v2618_v50  ;;  %v2885_v47 = vld [vmem:[#allocation9 + $0xc0] sm:$0xff]  ;;  %v2888_v50 = vld [vmem:[#allocation9 + $0xd8] sm:$0xff]  ;;  %v2895_v56 = vld [vmem:[#allocation9 + $0x110] sm:$0xff] }
 0x8d8   :  { %v2892_v55 = vld [vmem:[#allocation9 + $0xf8] sm:$0xff] }
 0x8d9   :  { %v2625_v6 = vadd.f32 %v2621_v1, %v2619_v51  ;;  %7498 = vtanh.f32 %v2624_v2  ;;  %v2887_v51 = vld [vmem:[#allocation9 + $0xd0] sm:$0xff]  ;;  %v2890_v1 = vld [vmem:[#allocation9 + $0xe8] sm:$0xff]  ;;  %v8494_v2 = vpack.c.bf16 %v2888_v50, %v2885_v47 }
 0x8da   :  { %7500 = vrcp.f32 %v2587_v59  ;;  %v8490_v59 = vpack.c.bf16 %v2884_v37, %v2881_v48 }
 0x8db   :  { %7502 = vtanh.f32 %v2625_v6  ;;  %v8497_v6 = vpack.c.bf16 %v2895_v56, %v2892_v55 }
 0x8dc   :  { %7504 = vrcp.f32 %v2588_v11  ;;  %v2891_v11 = vld [vmem:[#allocation9 + $0xf0] sm:$0xff] }
 0x8e3   :  { %v7499_v12 = vpop.eup %7498 }
 0x8e4   :  { %v7501_v15 = vpop.eup %7500  ;;  %v2628_v19 = vsub.f32 %v8424_v16, %v7499_v12  ;;  %v2867_v16 = vld [vmem:[#allocation9 + $0x30] sm:$0xff] }
 0x8e5   :  { %v7503_v23 = vpop.eup %7502  ;;  %v8461_v63 = vpack.c.bf16 %v2870_v61, %v2867_v16  ;;  %v8517_v16 = vpack.c.bf16 %v2907_v27, %v2904_v22  ;;  %v2903_v61 = vld [vmem:[#allocation9 + $0x150] sm:$0xff] }
 0x8e6   :  { %v2629_v26 = vsub.f32 %v8426_v20, %v7503_v23  ;;  %v2630_v13 = vmul.f32 %v7501_v15, %v2628_v19  ;;  %v7505_v57 = vpop.eup %7504  ;;  %v2898_v15 = vld [vmem:[#allocation9 + $0x128] sm:$0xff]  ;;  %v2901_v19 = vld [vmem:[#allocation9 + $0x140] sm:$0xff] }
 0x8e8   :  { %v2631_v10 = vmul.f32 %v7505_v57, %v2629_v26  ;;  %v2632_v18 = vadd.f32 %v7499_v12, %v2630_v13  ;;  %v2894_v12 = vld [vmem:[#allocation9 + $0x108] sm:$0xff]  ;;  %v2893_v26 = vld [vmem:[#allocation9 + $0x100] sm:$0xff]  ;;  %v2896_v13 = vld [vmem:[#allocation9 + $0x118] sm:$0xff] }
 0x8e9   :  { %v8504_v57 = vpack.c.bf16 %v2894_v12, %v2891_v11  ;;  %v8510_v35 = vpack.c.bf16 %v2896_v13, %v2893_v26 }
 0x8ea   :  { %v2633_v21 = vadd.f32 %v7503_v23, %v2631_v10  ;;  %2634 = vst [vmem:[#allocation3 + $0x7] sm:$0x1] %v2632_v18  ;;  %v8500_v23 = vpack.c.bf16 %v2890_v1, %v2887_v51  ;;  %v8507_v10 = vpack.c.bf16 %v2901_v19, %v2898_v15  ;;  %v2897_v18 = vld [vmem:[#allocation9 + $0x120] sm:$0xff] }
 0x8eb   :  { %v2909_v51 = vld [vmem:[%s9047_s8] sm:$0x7] }
 0x8ec   :  { %2635 = vst [vmem:[#allocation3 + $0xf] sm:$0x1] %v2633_v21  ;;  %v2900_v21 = vld [vmem:[#allocation9 + $0x138] sm:$0xff]  ;;  %v8582_v1 = vrot.slane %v2909_v51, %v8034_v30  ;;  %v8585_v11 = vrot.slane %v2909_v51, %v8039_v33 }
 0x8ed   :  { %v8514_v4 = vpack.c.bf16 %v2900_v21, %v2897_v18 }
 0x8f1   :  { %v2636_v20 = vld [vmem:[#allocation3] sm:$0xff] }
 0x8f2   :  { %2768 = vmatmul.mubr.f32.vlgmr.msra.gmra.mrb[16].mxu0 %v2636_v20  ;;  %6026 = vmatprep.mubr.f32.mxu1 %v2636_v20  ;;  %v2906_v20 = vld [vmem:[#allocation9 + $0x168] sm:$0xff] }
 0x8f3   :  { %6867 = vmatpush1.bf16.msra.mxu0 %v8453_v45  ;;  %v2637_v32 = vld [vmem:[#allocation3 + $0x8] sm:$0xff]  ;;  %2773 = vmatprep.mubr.f32.mxu0 %v7765_v0  ;;  %v8524_v25 = vpack.c.bf16 %v2906_v20, %v2903_v61 }
 0x8f4   :  { %6027 = vmatmul.mubr.f32.vlgmr.msra.gmra.mrb[22].mxu1 %v2637_v32  ;;  %6869 = vmatprep.subr.bf16.mxu0 %v8455_v14 }
 0x8f5   :  { %6898 = vmatpush3.bf16.msra.mxu1 %v8457_v53  ;;  %6061 = vmatprep.mubr.msk.f32.mxu1 %vm7767_vm1, %v7765_v0 }
 0x8f6   :  { %2774 = vmatmul.mubr.f32.gmra.mrb[18].mxu0 %v2637_v32  ;;  %6899 = vmatprep.subr.bf16.mxu1 %v7766_v38  ;;  %v8528_v32 = vpack.c.bf16 %v2908_v54, %v2905_v52 }
 0x8f7   :  { %6871 = vmatpush1.bf16.msra.mxu0 %v8461_v63  ;;  %2992 = vmatprep.mubr.f32.mxu0 %v7765_v0 }
 0x8f8   :  { %6873 = vmatprep.subr.bf16.mxu0 %v8464_v28 }
 0x8f9   :  { %6901 = vmatpush3.bf16.msra.mxu1 %v8467_v44 }
 0x8fa   :  { %6902 = vmatprep.subr.bf16.mxu1 %v7766_v38 }
 0x8fb   :  { %6875 = vmatpush1.bf16.msra.mxu0 %v8473_v7 }
 0x8fc   :  { %6877 = vmatprep.subr.bf16.mxu0 %v8477_v34 }
 0x8fd   :  { %6904 = vmatpush3.bf16.msra.mxu1 %v8480_v58 }
 0x8fe   :  { %6905 = vmatprep.subr.bf16.mxu1 %v7766_v38 }
 0x8ff   :  { %6879 = vmatpush1.bf16.msra.mxu0 %v8484_v40 }
 0x900   :  { %6881 = vmatprep.subr.bf16.mxu0 %v8487_v46 }
 0x901   :  { %6907 = vmatpush3.bf16.msra.mxu1 %v8490_v59 }
 0x902   :  { %6908 = vmatprep.subr.bf16.mxu1 %v7766_v38 }
 0x903   :  { %6883 = vmatpush1.bf16.msra.mxu0 %v8494_v2 }
 0x904   :  { %6885 = vmatprep.subr.bf16.mxu0 %v8497_v6 }
 0x905   :  { %6910 = vmatpush3.bf16.msra.mxu1 %v8500_v23 }
 0x906   :  { %6911 = vmatprep.subr.bf16.mxu1 %v7766_v38 }
 0x907   :  { %6887 = vmatpush1.bf16.msra.mxu0 %v8504_v57 }
 0x908   :  { %6889 = vmatprep.subr.bf16.mxu0 %v8507_v10 }
 0x909   :  { %6913 = vmatpush3.bf16.msra.mxu1 %v8510_v35 }
 0x90a   :  { %6914 = vmatprep.subr.bf16.mxu1 %v7766_v38 }
 0x90b   :  { %6891 = vmatpush1.bf16.msra.mxu0 %v8514_v4 }
 0x90c   :  { %6893 = vmatprep.subr.bf16.mxu0 %v8517_v16 }
 0x90d   :  { %6916 = vmatpush3.bf16.msra.mxu1 %v8520_v49 }
 0x90e   :  { %6917 = vmatprep.subr.bf16.mxu1 %v7766_v38 }
 0x90f   :  { %6895 = vmatpush1.bf16.msra.mxu0 %v8524_v25 }
 0x910   :  { %6921 = vmatprep.subr.bf16.mxu0 %v8435_v17 }
 0x911   :  { %6919 = vmatpush3.bf16.msra.mxu1 %v8528_v32 }
 0x912   :  { %2993 = vmatmul.mubr.f32.vlgmr.msra.gmra.mrb[20].mxu0 %v7765_v0  ;;  %6952 = vmatprep.subr.bf16.mxu1 %v7766_v38 }
 0x913   :  { %6923 = vmatpush1.bf16.msra.mxu0 %v8453_v45  ;;  %3278 = vmatprep.mubr.f32.mxu0 %v7765_v0 }
 0x914   :  { %6062 = vmatmul.mubr.f32.vlgmr.msra.gmra.mrb[24].mxu1 %v7765_v0  ;;  %6925 = vmatprep.subr.bf16.mxu0 %v8455_v14 }
 0x915   :  { %6954 = vmatpush3.bf16.msra.mxu1 %v8457_v53  ;;  %6096 = vmatprep.mubr.msk.f32.mxu1 %vm7767_vm1, %v7765_v0 }
 0x916   :  { %6955 = vmatprep.subr.bf16.mxu1 %v7766_v38 }
 0x917   :  { %6927 = vmatpush1.bf16.msra.mxu0 %v8461_v63 }
 0x918   :  { %6929 = vmatprep.subr.bf16.mxu0 %v8464_v28 }
 0x919   :  { %6957 = vmatpush3.bf16.msra.mxu1 %v8467_v44 }
 0x91a   :  { %6958 = vmatprep.subr.bf16.mxu1 %v7766_v38 }
 0x91b   :  { %6931 = vmatpush1.bf16.msra.mxu0 %v8473_v7 }
 0x91c   :  { %6933 = vmatprep.subr.bf16.mxu0 %v8477_v34 }
 0x91d   :  { %6960 = vmatpush3.bf16.msra.mxu1 %v8480_v58 }
 0x91e   :  { %6961 = vmatprep.subr.bf16.mxu1 %v7766_v38 }
 0x91f   :  { %6935 = vmatpush1.bf16.msra.mxu0 %v8484_v40 }
 0x920   :  { %6937 = vmatprep.subr.bf16.mxu0 %v8487_v46 }
 0x921   :  { %6963 = vmatpush3.bf16.msra.mxu1 %v8490_v59 }
 0x922   :  { %6964 = vmatprep.subr.bf16.mxu1 %v7766_v38 }
 0x923   :  { %6939 = vmatpush1.bf16.msra.mxu0 %v8494_v2 }
 0x924   :  { %6941 = vmatprep.subr.bf16.mxu0 %v8497_v6 }
 0x925   :  { %6966 = vmatpush3.bf16.msra.mxu1 %v8500_v23 }
 0x926   :  { %6967 = vmatprep.subr.bf16.mxu1 %v7766_v38 }
 0x927   :  { %6943 = vmatpush1.bf16.msra.mxu0 %v8504_v57 }
 0x928   :  { %6945 = vmatprep.subr.bf16.mxu0 %v8507_v10 }
 0x929   :  { %6969 = vmatpush3.bf16.msra.mxu1 %v8510_v35 }
 0x92a   :  { %6970 = vmatprep.subr.bf16.mxu1 %v7766_v38 }
 0x92b   :  { %6947 = vmatpush1.bf16.msra.mxu0 %v8514_v4 }
 0x92c   :  { %6949 = vmatprep.subr.bf16.mxu0 %v8517_v16 }
 0x92d   :  { %6972 = vmatpush3.bf16.msra.mxu1 %v8520_v49 }
 0x92e   :  { %6973 = vmatprep.subr.bf16.mxu1 %v7766_v38 }
 0x92f   :  { %6951 = vmatpush1.bf16.msra.mxu0 %v8524_v25 }
 0x930   :  { %6977 = vmatprep.subr.bf16.mxu0 %v8435_v17 }
 0x931   :  { %6975 = vmatpush3.bf16.msra.mxu1 %v8528_v32 }
 0x932   :  { %7008 = vmatprep.subr.bf16.mxu1 %v7766_v38 }
 0x9c5   :  { %v2769_v41 = vpop.f32.mrb[16].mxu0 }
 0x9c6   :  { %v2770_v62 = vadd.f32 %v2769_v41, %v2691_v60  ;;  %v2771_v8 = vpop.f32.mrb[17].mxu0 }
 0x9c7   :  { %v2772_v9 = vadd.f32 %v2771_v8, %v2695_v36  ;;  %v6028_v29 = vpop.f32.mrb[22].mxu1  ;;  %v8596_v8 = vrot.slane %v2909_v51, %v8043_v43 }
 0x9c8   :  { %2855 = vst [vmem:[#allocation2] sm:$0xff] %v2770_v62  ;;  %v2852_v31 = vadd.f32 %v6028_v29, %v2699_v24  ;;  %v2846_v48 = vpop.f32.mrb[23].mxu1 }
 0x9c9   :  { %2856 = vst [vmem:[#allocation2 + $0x8] sm:$0xff] %v2772_v9  ;;  %v2847_v37 = vadd.f32 %v2846_v48, %v2699_v24  ;;  %v2775_v47 = vpop.f32.mrb[18].mxu0 }
 0x9ca   :  { %2860 = vst [vmem:[#allocation2 + $0x28] sm:$0xff] %v2852_v31  ;;  %v2776_v50 = vadd.f32 %v2775_v47, %v2691_v60  ;;  %v2777_v55 = vpop.f32.mrb[19].mxu0 }
 0x9cb   :  { %2857 = vst [vmem:[#allocation2 + $0x10] sm:$0xff] %v2847_v37  ;;  %v2778_v56 = vadd.f32 %v2777_v55, %v2695_v36 }
 0x9cc   :  { %2858 = vst [vmem:[#allocation2 + $0x18] sm:$0xff] %v2776_v50 }
 0x9cd   :  { %2859 = vst [vmem:[#allocation2 + $0x20] sm:$0xff] %v2778_v56 }
 0x9d2   :  { %v2926_v30 = vld [vmem:[#allocation2] ss:$8 sm:$0x7] }
 0x9d3   :  { %v3110_v36 = vrot.slane %v2926_v30, 1 }
 0x9d4   :  { %v2927_v61 = vld [vmem:[#allocation2 + $0x18] ss:$8 sm:$0x7] }
 0x9d5   :  { %v3111_v41 = vrot.slane %v2927_v61, 1 }
 0x9e5   :  { %v2994_v12 = vpop.f32.mrb[20].mxu0 }
 0x9e6   :  { %v2995_v15 = vadd.f32 %v2994_v12, %v8582_v1  ;;  %v2996_v19 = vpop.f32.mrb[21].mxu0 }
 0x9e7   :  { %v2997_v26 = vadd.f32 %v2996_v19, %v8585_v11  ;;  %v3065_v13 = vpop.f32.mrb[24].mxu1 }
 0x9e8   :  { %v3076_v18 = vrot.slane %v2995_v15, %v8055_v5  ;;  %v6063_v21 = vpop.f32.mrb[25].mxu1  ;;  %v3066_v37 = vadd.f32 %v3065_v13, %v8596_v8 }
 0x9e9   :  { %v3121_v39 = vrot.slane %v2997_v26, %v8055_v5  ;;  %v3180_v21 = vrot.slane %v2926_v30, 2 }
 0x9ea   :  { %v3077_v22 = vcombine.high %v3076_v18, %v3076_v18  ;;  %v3084_v27 = vrot.slane %v3076_v18, %v8055_v5  ;;  %v3160_v56 = vrot.slane %v3066_v37, %v8055_v5 }
 0x9eb   :  { %v3122_v54 = vcombine.high %v3121_v39, %v3121_v39  ;;  %v3129_v60 = vrot.slane %v3121_v39, %v8055_v5  ;;  %v3181_v39 = vrot.slane %v2927_v61, 2 }
 0x9ec   :  { %v3091_v42 = vrot.slane %v3077_v22, %v8055_v5  ;;  %v3094_v33 = vadd.f32 %v3084_v27, %v2926_v30  ;;  %v3161_v12 = vcombine.high %v3160_v56, %v3160_v56  ;;  %v3168_v15 = vrot.slane %v3160_v56, %v8055_v5 }
 0x9ed   :  { %v3136_v24 = vrot.slane %v3122_v54, %v8055_v5  ;;  %v3139_v62 = vadd.f32 %v3129_v60, %v3110_v36 }
 0x9ee   :  { %v3095_v20 = vadd.f32 %v3091_v42, %v2927_v61  ;;  %v5363_v52 = vmul.f32 -1.442695, %v3094_v33  ;;  %v3175_v51 = vrot.slane %v3161_v12, %v8055_v5 }
 0x9ef   :  { %v3140_v9 = vadd.f32 %v3136_v24, %v3111_v41  ;;  %v5365_v29 = vmul.f32 -1.442695, %v3139_v62 }
 0x9f0   :  { %7506 = vpow2.f32 %v5363_v52  ;;  %v5364_v3 = vmul.f32 -1.442695, %v3095_v20 }
 0x9f1   :  { %v5366_v48 = vmul.f32 -1.442695, %v3140_v9 }
 0x9f2   :  { %7508 = vpow2.f32 %v5364_v3 }
 0x9f3   :  { %7510 = vpow2.f32 %v5365_v29 }
 0x9fa   :  { %v7507_v31 = vpop.eup %7506 }
 0x9fb   :  { %v3102_v47 = vadd.f32 1.0, %v7507_v31 }
 0x9fc   :  { %v7509_v50 = vpop.eup %7508 }
 0x9fd   :  { %v3103_v55 = vadd.f32 1.0, %v7509_v50  ;;  %7512 = vrcp.f32 %v3102_v47  ;;  %v7511_v43 = vpop.eup %7510 }
 0x9fe   :  { %7514 = vpow2.f32 %v5366_v48  ;;  %v3147_v22 = vadd.f32 1.0, %v7511_v43 }
 0x9ff   :  { %7516 = vrcp.f32 %v3103_v55 }
 0xa07   :  { %v7513_v19 = vpop.eup %7512 }
 0xa08   :  { %v7515_v26 = vpop.eup %7514  ;;  %v3178_v18 = vmul.f32 %v7513_v19, %v3168_v15  ;;  %v3194_v19 = vld [vmem:[#allocation2 + $0x1] ss:$8 sm:$0x7] }
 0xa09   :  { %v7517_v13 = vpop.eup %7516  ;;  %v3148_v33 = vadd.f32 1.0, %v7515_v26 }
 0xa0a   :  { %v3179_v27 = vmul.f32 %v7517_v13, %v3175_v51  ;;  %v3184_v42 = vadd.f32 %v3180_v21, %v3178_v18  ;;  %v3195_v21 = vld [vmem:[#allocation2 + $0x19] ss:$8 sm:$0x7] }
 0xa0c   :  { %v3185_v20 = vadd.f32 %v3181_v39, %v3179_v27  ;;  %7518 = vtanh.f32 %v3184_v42 }
 0xa0d   :  { %7520 = vrcp.f32 %v3147_v22 }
 0xa0e   :  { %7522 = vtanh.f32 %v3185_v20 }
 0xa0f   :  { %7524 = vrcp.f32 %v3148_v33  ;;  %v3396_v33 = vrot.slane %v3194_v19, 1 }
 0xa16   :  { %v7519_v52 = vpop.eup %7518 }
 0xa17   :  { %v7521_v54 = vpop.eup %7520  ;;  %v3188_v3 = vsub.f32 0.0, %v7519_v52 }
 0xa18   :  { %v7523_v60 = vpop.eup %7522 }
 0xa19   :  { %v3189_v36 = vsub.f32 0.0, %v7523_v60  ;;  %v3190_v24 = vmul.f32 %v7521_v54, %v3188_v3  ;;  %v7525_v41 = vpop.eup %7524 }
 0xa1b   :  { %v3191_v62 = vmul.f32 %v7525_v41, %v3189_v36  ;;  %v8602_v30 = vadd.f32 %v7519_v52, %v3190_v24  ;;  %v3397_v52 = vrot.slane %v3195_v21, 1 }
 0xa1d   :  { %v8604_v9 = vadd.f32 %v7523_v60, %v3191_v62 }
 0xa1f   :  { %v3198_v61 = vcombine.low %v8602_v30, %v8604_v9 }
 0xa21   :  { %v3205_v29 = vrot.slane %v3198_v61, %v8055_v5 }
 0xa23   :  { %v3212_v31 = vrot.slane %v3205_v29, %v8055_v5 }
 0xa25   :  { %3279 = vmatmul.mubr.f32.vlgmr.msra.gmra.mrb[22].mxu0 %v3212_v31  ;;  %6097 = vmatmul.mubr.f32.vlgmr.msra.gmra.mrb[26].mxu1 %v3212_v31 }
 0xa26   :  { %6979 = vmatpush1.bf16.msra.mxu0 %v8453_v45  ;;  %7010 = vmatpush3.bf16.msra.mxu1 %v8457_v53 }
 0xa27   :  { %6981 = vmatprep.subr.bf16.mxu0 %v8455_v14  ;;  %7011 = vmatprep.subr.bf16.mxu1 %v7766_v38 }
 0xa28   :  { %3564 = vmatprep.mubr.f32.mxu0 %v7765_v0  ;;  %6131 = vmatprep.mubr.msk.f32.mxu1 %vm7767_vm1, %v7765_v0 }
 0xa2a   :  { %6983 = vmatpush1.bf16.msra.mxu0 %v8461_v63  ;;  %7013 = vmatpush3.bf16.msra.mxu1 %v8467_v44 }
 0xa2b   :  { %6985 = vmatprep.subr.bf16.mxu0 %v8464_v28  ;;  %7014 = vmatprep.subr.bf16.mxu1 %v7766_v38 }
 0xa2e   :  { %6987 = vmatpush1.bf16.msra.mxu0 %v8473_v7  ;;  %7016 = vmatpush3.bf16.msra.mxu1 %v8480_v58 }
 0xa2f   :  { %6989 = vmatprep.subr.bf16.mxu0 %v8477_v34  ;;  %7017 = vmatprep.subr.bf16.mxu1 %v7766_v38 }
 0xa32   :  { %6991 = vmatpush1.bf16.msra.mxu0 %v8484_v40  ;;  %7019 = vmatpush3.bf16.msra.mxu1 %v8490_v59 }
 0xa33   :  { %6993 = vmatprep.subr.bf16.mxu0 %v8487_v46  ;;  %7020 = vmatprep.subr.bf16.mxu1 %v7766_v38 }
 0xa36   :  { %6995 = vmatpush1.bf16.msra.mxu0 %v8494_v2  ;;  %7022 = vmatpush3.bf16.msra.mxu1 %v8500_v23 }
 0xa37   :  { %6997 = vmatprep.subr.bf16.mxu0 %v8497_v6  ;;  %7023 = vmatprep.subr.bf16.mxu1 %v7766_v38 }
 0xa3a   :  { %6999 = vmatpush1.bf16.msra.mxu0 %v8504_v57  ;;  %7025 = vmatpush3.bf16.msra.mxu1 %v8510_v35 }
 0xa3b   :  { %7001 = vmatprep.subr.bf16.mxu0 %v8507_v10  ;;  %7026 = vmatprep.subr.bf16.mxu1 %v7766_v38 }
 0xa3e   :  { %7003 = vmatpush1.bf16.msra.mxu0 %v8514_v4  ;;  %7028 = vmatpush3.bf16.msra.mxu1 %v8520_v49 }
 0xa3f   :  { %7005 = vmatprep.subr.bf16.mxu0 %v8517_v16  ;;  %7029 = vmatprep.subr.bf16.mxu1 %v7766_v38 }
 0xa42   :  { %7007 = vmatpush1.bf16.msra.mxu0 %v8524_v25  ;;  %7031 = vmatpush3.bf16.msra.mxu1 %v8528_v32 }
 0xa43   :  { %7033 = vmatprep.subr.bf16.mxu0 %v8435_v17  ;;  %7064 = vmatprep.subr.bf16.mxu1 %v7766_v38 }
 0xaf8   :  { %v3280_v48 = vpop.f32.mrb[22].mxu0  ;;  %v3351_v37 = vpop.f32.mrb[26].mxu1 }
 0xaf9   :  { %v3281_v47 = vadd.f32 %v3280_v48, %v8582_v1  ;;  %v3282_v50 = vpop.f32.mrb[23].mxu0  ;;  %v6098_v55 = vpop.f32.mrb[27].mxu1  ;;  %v3352_v61 = vadd.f32 %v3351_v37, %v8596_v8 }
 0xafa   :  { %v3283_v56 = vadd.f32 %v3282_v50, %v8585_v11 }
 0xafb   :  { %v3362_v12 = vrot.slane %v3281_v47, %v8055_v5  ;;  %v3446_v31 = vrot.slane %v3352_v61, %v8055_v5 }
 0xafc   :  { %v3407_v51 = vrot.slane %v3283_v56, %v8055_v5 }
 0xafd   :  { %v3363_v15 = vcombine.high %v3362_v12, %v3362_v12  ;;  %v3370_v43 = vrot.slane %v3362_v12, %v8055_v5  ;;  %v3447_v48 = vcombine.high %v3446_v31, %v3446_v31  ;;  %v3454_v50 = vrot.slane %v3446_v31, %v8055_v5 }
 0xafe   :  { %v3408_v27 = vcombine.high %v3407_v51, %v3407_v51  ;;  %v3415_v42 = vrot.slane %v3407_v51, %v8055_v5 }
 0xaff   :  { %v3377_v26 = vrot.slane %v3363_v15, %v8055_v5  ;;  %v3380_v18 = vadd.f32 %v3370_v43, %v3194_v19  ;;  %v3461_v12 = vrot.slane %v3447_v48, %v8055_v5  ;;  %v3466_v43 = vrot.slane %v3194_v19, 2 }
 0xb00   :  { %v3422_v20 = vrot.slane %v3408_v27, %v8055_v5  ;;  %v3425_v54 = vadd.f32 %v3415_v42, %v3396_v33 }
 0xb01   :  { %v3381_v13 = vadd.f32 %v3377_v26, %v3195_v21  ;;  %v5367_v22 = vmul.f32 -1.442695, %v3380_v18  ;;  %v3467_v18 = vrot.slane %v3195_v21, 2 }
 0xb02   :  { %v3426_v3 = vadd.f32 %v3422_v20, %v3397_v52  ;;  %v5369_v60 = vmul.f32 -1.442695, %v3425_v54 }
 0xb03   :  { %7526 = vpow2.f32 %v5367_v22  ;;  %v5368_v39 = vmul.f32 -1.442695, %v3381_v13 }
 0xb04   :  { %v5370_v24 = vmul.f32 -1.442695, %v3426_v3 }
 0xb05   :  { %7528 = vpow2.f32 %v5368_v39 }
 0xb06   :  { %7530 = vpow2.f32 %v5369_v60 }
 0xb0d   :  { %v7527_v36 = vpop.eup %7526 }
 0xb0e   :  { %v3388_v41 = vadd.f32 1.0, %v7527_v36 }
 0xb0f   :  { %v7529_v62 = vpop.eup %7528 }
 0xb10   :  { %v3389_v29 = vadd.f32 1.0, %v7529_v62  ;;  %7532 = vrcp.f32 %v3388_v41  ;;  %v7531_v47 = vpop.eup %7530 }
 0xb11   :  { %7534 = vpow2.f32 %v5370_v24  ;;  %v3433_v26 = vadd.f32 1.0, %v7531_v47 }
 0xb12   :  { %7536 = vrcp.f32 %v3389_v29 }
 0xb1a   :  { %v7533_v55 = vpop.eup %7532 }
 0xb1b   :  { %v7535_v56 = vpop.eup %7534  ;;  %v3464_v15 = vmul.f32 %v7533_v55, %v3454_v50 }
 0xb1c   :  { %v7537_v51 = vpop.eup %7536  ;;  %v3434_v27 = vadd.f32 1.0, %v7535_v56  ;;  %v3480_v56 = vld [vmem:[#allocation2 + $0x2] ss:$8 sm:$0x7] }
 0xb1d   :  { %v3465_v37 = vmul.f32 %v7537_v51, %v3461_v12  ;;  %v3470_v13 = vadd.f32 %v3466_v43, %v3464_v15  ;;  %v3481_v43 = vld [vmem:[#allocation2 + $0x1a] ss:$8 sm:$0x7] }
 0xb1f   :  { %v3471_v22 = vadd.f32 %v3467_v18, %v3465_v37  ;;  %7538 = vtanh.f32 %v3470_v13 }
 0xb20   :  { %7540 = vrcp.f32 %v3433_v26 }
 0xb21   :  { %7542 = vtanh.f32 %v3471_v22  ;;  %v3682_v22 = vrot.slane %v3480_v56, 1 }
 0xb22   :  { %7544 = vrcp.f32 %v3434_v27 }
 0xb29   :  { %v7539_v39 = vpop.eup %7538 }
 0xb2a   :  { %v7541_v42 = vpop.eup %7540  ;;  %v3474_v33 = vsub.f32 %v8602_v30, %v7539_v39 }
 0xb2b   :  { %v7543_v20 = vpop.eup %7542 }
 0xb2c   :  { %v3475_v52 = vsub.f32 %v8604_v9, %v7543_v20  ;;  %v3476_v54 = vmul.f32 %v7541_v42, %v3474_v33  ;;  %v7545_v19 = vpop.eup %7544 }
 0xb2e   :  { %v3477_v3 = vmul.f32 %v7545_v19, %v3475_v52  ;;  %v8659_v60 = vadd.f32 %v7539_v39, %v3476_v54  ;;  %v3683_v39 = vrot.slane %v3481_v43, 1 }
 0xb30   :  { %v8661_v21 = vadd.f32 %v7543_v20, %v3477_v3 }
 0xb32   :  { %v3484_v36 = vcombine.low %v8659_v60, %v8661_v21 }
 0xb34   :  { %v3491_v24 = vrot.slane %v3484_v36, %v8055_v5 }
 0xb36   :  { %v3498_v41 = vrot.slane %v3491_v24, %v8055_v5 }
 0xb38   :  { %3565 = vmatmul.mubr.f32.vlgmr.msra.gmra.mrb[24].mxu0 %v3498_v41  ;;  %6132 = vmatmul.mubr.f32.vlgmr.msra.gmra.mrb[28].mxu1 %v3498_v41 }
 0xb39   :  { %7035 = vmatpush1.bf16.msra.mxu0 %v8453_v45  ;;  %7066 = vmatpush3.bf16.msra.mxu1 %v8457_v53 }
 0xb3a   :  { %7037 = vmatprep.subr.bf16.mxu0 %v8455_v14  ;;  %7067 = vmatprep.subr.bf16.mxu1 %v7766_v38 }
 0xb3b   :  { %3850 = vmatprep.mubr.f32.mxu0 %v7765_v0  ;;  %6166 = vmatprep.mubr.msk.f32.mxu1 %vm7767_vm1, %v7765_v0 }
 0xb3d   :  { %7039 = vmatpush1.bf16.msra.mxu0 %v8461_v63  ;;  %7069 = vmatpush3.bf16.msra.mxu1 %v8467_v44 }
 0xb3e   :  { %7041 = vmatprep.subr.bf16.mxu0 %v8464_v28  ;;  %7070 = vmatprep.subr.bf16.mxu1 %v7766_v38 }
 0xb41   :  { %7043 = vmatpush1.bf16.msra.mxu0 %v8473_v7  ;;  %7072 = vmatpush3.bf16.msra.mxu1 %v8480_v58 }
 0xb42   :  { %7045 = vmatprep.subr.bf16.mxu0 %v8477_v34  ;;  %7073 = vmatprep.subr.bf16.mxu1 %v7766_v38 }
 0xb45   :  { %7047 = vmatpush1.bf16.msra.mxu0 %v8484_v40  ;;  %7075 = vmatpush3.bf16.msra.mxu1 %v8490_v59 }
 0xb46   :  { %7049 = vmatprep.subr.bf16.mxu0 %v8487_v46  ;;  %7076 = vmatprep.subr.bf16.mxu1 %v7766_v38 }
 0xb49   :  { %7051 = vmatpush1.bf16.msra.mxu0 %v8494_v2  ;;  %7078 = vmatpush3.bf16.msra.mxu1 %v8500_v23 }
 0xb4a   :  { %7053 = vmatprep.subr.bf16.mxu0 %v8497_v6  ;;  %7079 = vmatprep.subr.bf16.mxu1 %v7766_v38 }
 0xb4d   :  { %7055 = vmatpush1.bf16.msra.mxu0 %v8504_v57  ;;  %7081 = vmatpush3.bf16.msra.mxu1 %v8510_v35 }
 0xb4e   :  { %7057 = vmatprep.subr.bf16.mxu0 %v8507_v10  ;;  %7082 = vmatprep.subr.bf16.mxu1 %v7766_v38 }
 0xb51   :  { %7059 = vmatpush1.bf16.msra.mxu0 %v8514_v4  ;;  %7084 = vmatpush3.bf16.msra.mxu1 %v8520_v49 }
 0xb52   :  { %7061 = vmatprep.subr.bf16.mxu0 %v8517_v16  ;;  %7085 = vmatprep.subr.bf16.mxu1 %v7766_v38 }
 0xb55   :  { %7063 = vmatpush1.bf16.msra.mxu0 %v8524_v25  ;;  %7087 = vmatpush3.bf16.msra.mxu1 %v8528_v32 }
 0xb56   :  { %7089 = vmatprep.subr.bf16.mxu0 %v8435_v17  ;;  %7120 = vmatprep.subr.bf16.mxu1 %v7766_v38 }
 0xc0b   :  { %v3566_v30 = vpop.f32.mrb[24].mxu0  ;;  %v3637_v9 = vpop.f32.mrb[28].mxu1 }
 0xc0c   :  { %v3567_v62 = vadd.f32 %v3566_v30, %v8582_v1  ;;  %v3568_v61 = vpop.f32.mrb[25].mxu0  ;;  %v6133_v29 = vpop.f32.mrb[29].mxu1  ;;  %v3638_v36 = vadd.f32 %v3637_v9, %v8596_v8 }
 0xc0d   :  { %v3569_v31 = vadd.f32 %v3568_v61, %v8585_v11 }
 0xc0e   :  { %v3648_v48 = vrot.slane %v3567_v62, %v8055_v5  ;;  %v3732_v41 = vrot.slane %v3638_v36, %v8055_v5 }
 0xc0f   :  { %v3693_v55 = vrot.slane %v3569_v31, %v8055_v5 }
 0xc10   :  { %v3649_v47 = vcombine.high %v3648_v48, %v3648_v48  ;;  %v3656_v50 = vrot.slane %v3648_v48, %v8055_v5  ;;  %v3733_v30 = vcombine.high %v3732_v41, %v3732_v41  ;;  %v3740_v61 = vrot.slane %v3732_v41, %v8055_v5 }
 0xc11   :  { %v3694_v37 = vcombine.high %v3693_v55, %v3693_v55  ;;  %v3701_v13 = vrot.slane %v3693_v55, %v8055_v5 }
 0xc12   :  { %v3663_v12 = vrot.slane %v3649_v47, %v8055_v5  ;;  %v3666_v15 = vadd.f32 %v3656_v50, %v3480_v56  ;;  %v3747_v48 = vrot.slane %v3733_v30, %v8055_v5  ;;  %v3752_v50 = vrot.slane %v3480_v56, 2 }
 0xc13   :  { %v3708_v27 = vrot.slane %v3694_v37, %v8055_v5  ;;  %v3711_v42 = vadd.f32 %v3701_v13, %v3682_v22 }
 0xc14   :  { %v3667_v51 = vadd.f32 %v3663_v12, %v3481_v43  ;;  %v5371_v26 = vmul.f32 -1.442695, %v3666_v15  ;;  %v3753_v15 = vrot.slane %v3481_v43, 2 }
 0xc15   :  { %v3712_v33 = vadd.f32 %v3708_v27, %v3683_v39  ;;  %v5373_v20 = vmul.f32 -1.442695, %v3711_v42 }
 0xc16   :  { %7546 = vpow2.f32 %v5371_v26  ;;  %v5372_v18 = vmul.f32 -1.442695, %v3667_v51 }
 0xc17   :  { %v5374_v54 = vmul.f32 -1.442695, %v3712_v33 }
 0xc18   :  { %7548 = vpow2.f32 %v5372_v18 }
 0xc19   :  { %7550 = vpow2.f32 %v5373_v20 }
 0xc20   :  { %v7547_v52 = vpop.eup %7546 }
 0xc21   :  { %v3674_v19 = vadd.f32 1.0, %v7547_v52 }
 0xc22   :  { %v7549_v3 = vpop.eup %7548 }
 0xc23   :  { %v3675_v24 = vadd.f32 1.0, %v7549_v3  ;;  %7552 = vrcp.f32 %v3674_v19  ;;  %v7551_v62 = vpop.eup %7550 }
 0xc24   :  { %7554 = vpow2.f32 %v5374_v54  ;;  %v3719_v12 = vadd.f32 1.0, %v7551_v62 }
 0xc25   :  { %7556 = vrcp.f32 %v3675_v24 }
 0xc2d   :  { %v7553_v29 = vpop.eup %7552 }
 0xc2e   :  { %v7555_v31 = vpop.eup %7554  ;;  %v3750_v47 = vmul.f32 %v7553_v29, %v3740_v61 }
 0xc2f   :  { %v7557_v55 = vpop.eup %7556  ;;  %v3720_v37 = vadd.f32 1.0, %v7555_v31  ;;  %v3766_v31 = vld [vmem:[#allocation2 + $0x3] ss:$8 sm:$0x7] }
 0xc30   :  { %v3751_v9 = vmul.f32 %v7557_v55, %v3747_v48  ;;  %v3756_v51 = vadd.f32 %v3752_v50, %v3750_v47  ;;  %v3767_v50 = vld [vmem:[#allocation2 + $0x1b] ss:$8 sm:$0x7] }
 0xc32   :  { %v3757_v26 = vadd.f32 %v3753_v15, %v3751_v9  ;;  %7558 = vtanh.f32 %v3756_v51 }
 0xc33   :  { %7560 = vrcp.f32 %v3719_v12 }
 0xc34   :  { %7562 = vtanh.f32 %v3757_v26  ;;  %v3968_v26 = vrot.slane %v3766_v31, 1 }
 0xc35   :  { %7564 = vrcp.f32 %v3720_v37 }
 0xc3c   :  { %v7559_v18 = vpop.eup %7558 }
 0xc3d   :  { %v7561_v13 = vpop.eup %7560  ;;  %v3760_v22 = vsub.f32 %v8659_v60, %v7559_v18 }
 0xc3e   :  { %v7563_v27 = vpop.eup %7562 }
 0xc3f   :  { %v3761_v39 = vsub.f32 %v8661_v21, %v7563_v27  ;;  %v3762_v42 = vmul.f32 %v7561_v13, %v3760_v22  ;;  %v7565_v56 = vpop.eup %7564 }
 0xc41   :  { %v3763_v33 = vmul.f32 %v7565_v56, %v3761_v39  ;;  %v8716_v20 = vadd.f32 %v7559_v18, %v3762_v42  ;;  %v3969_v18 = vrot.slane %v3767_v50, 1 }
 0xc43   :  { %v8718_v43 = vadd.f32 %v7563_v27, %v3763_v33 }
 0xc45   :  { %v3770_v52 = vcombine.low %v8716_v20, %v8718_v43 }
 0xc47   :  { %v3777_v54 = vrot.slane %v3770_v52, %v8055_v5 }
 0xc49   :  { %v3784_v19 = vrot.slane %v3777_v54, %v8055_v5 }
 0xc4b   :  { %3851 = vmatmul.mubr.f32.vlgmr.msra.gmra.mrb[26].mxu0 %v3784_v19  ;;  %6167 = vmatmul.mubr.f32.vlgmr.msra.gmra.mrb[30].mxu1 %v3784_v19 }
 0xc4c   :  { %7091 = vmatpush1.bf16.msra.mxu0 %v8453_v45  ;;  %7122 = vmatpush3.bf16.msra.mxu1 %v8457_v53 }
 0xc4d   :  { %7093 = vmatprep.subr.bf16.mxu0 %v8455_v14  ;;  %7123 = vmatprep.subr.bf16.mxu1 %v7766_v38 }
 0xc4e   :  { %4136 = vmatprep.mubr.f32.mxu0 %v7765_v0  ;;  %6201 = vmatprep.mubr.msk.f32.mxu1 %vm7767_vm1, %v7765_v0 }
 0xc50   :  { %7095 = vmatpush1.bf16.msra.mxu0 %v8461_v63  ;;  %7125 = vmatpush3.bf16.msra.mxu1 %v8467_v44 }
 0xc51   :  { %7097 = vmatprep.subr.bf16.mxu0 %v8464_v28  ;;  %7126 = vmatprep.subr.bf16.mxu1 %v7766_v38 }
 0xc54   :  { %7099 = vmatpush1.bf16.msra.mxu0 %v8473_v7  ;;  %7128 = vmatpush3.bf16.msra.mxu1 %v8480_v58 }
 0xc55   :  { %7101 = vmatprep.subr.bf16.mxu0 %v8477_v34  ;;  %7129 = vmatprep.subr.bf16.mxu1 %v7766_v38 }
 0xc58   :  { %7103 = vmatpush1.bf16.msra.mxu0 %v8484_v40  ;;  %7131 = vmatpush3.bf16.msra.mxu1 %v8490_v59 }
 0xc59   :  { %7105 = vmatprep.subr.bf16.mxu0 %v8487_v46  ;;  %7132 = vmatprep.subr.bf16.mxu1 %v7766_v38 }
 0xc5c   :  { %7107 = vmatpush1.bf16.msra.mxu0 %v8494_v2  ;;  %7134 = vmatpush3.bf16.msra.mxu1 %v8500_v23 }
 0xc5d   :  { %7109 = vmatprep.subr.bf16.mxu0 %v8497_v6  ;;  %7135 = vmatprep.subr.bf16.mxu1 %v7766_v38 }
 0xc60   :  { %7111 = vmatpush1.bf16.msra.mxu0 %v8504_v57  ;;  %7137 = vmatpush3.bf16.msra.mxu1 %v8510_v35 }
 0xc61   :  { %7113 = vmatprep.subr.bf16.mxu0 %v8507_v10  ;;  %7138 = vmatprep.subr.bf16.mxu1 %v7766_v38 }
 0xc64   :  { %7115 = vmatpush1.bf16.msra.mxu0 %v8514_v4  ;;  %7140 = vmatpush3.bf16.msra.mxu1 %v8520_v49 }
 0xc65   :  { %7117 = vmatprep.subr.bf16.mxu0 %v8517_v16  ;;  %7141 = vmatprep.subr.bf16.mxu1 %v7766_v38 }
 0xc68   :  { %7119 = vmatpush1.bf16.msra.mxu0 %v8524_v25  ;;  %7143 = vmatpush3.bf16.msra.mxu1 %v8528_v32 }
 0xc69   :  { %7145 = vmatprep.subr.bf16.mxu0 %v8435_v17  ;;  %7176 = vmatprep.subr.bf16.mxu1 %v7766_v38 }
 0xd1e   :  { %v3852_v60 = vpop.f32.mrb[26].mxu0  ;;  %v3923_v21 = vpop.f32.mrb[30].mxu1 }
 0xd1f   :  { %v3853_v3 = vadd.f32 %v3852_v60, %v8582_v1  ;;  %v3854_v36 = vpop.f32.mrb[27].mxu0  ;;  %v6168_v24 = vpop.f32.mrb[31].mxu1  ;;  %v3924_v52 = vadd.f32 %v3923_v21, %v8596_v8 }
 0xd20   :  { %v3855_v41 = vadd.f32 %v3854_v36, %v8585_v11 }
 0xd21   :  { %v3934_v30 = vrot.slane %v3853_v3, %v8055_v5  ;;  %v4018_v19 = vrot.slane %v3924_v52, %v8055_v5 }
 0xd22   :  { %v3979_v29 = vrot.slane %v3855_v41, %v8055_v5 }
 0xd23   :  { %v3935_v62 = vcombine.high %v3934_v30, %v3934_v30  ;;  %v3942_v61 = vrot.slane %v3934_v30, %v8055_v5  ;;  %v4019_v60 = vcombine.high %v4018_v19, %v4018_v19  ;;  %v4026_v36 = vrot.slane %v4018_v19, %v8055_v5 }
 0xd24   :  { %v3980_v9 = vcombine.high %v3979_v29, %v3979_v29  ;;  %v3987_v51 = vrot.slane %v3979_v29, %v8055_v5 }
 0xd25   :  { %v3949_v48 = vrot.slane %v3935_v62, %v8055_v5  ;;  %v3952_v47 = vadd.f32 %v3942_v61, %v3766_v31  ;;  %v4033_v30 = vrot.slane %v4019_v60, %v8055_v5  ;;  %v4038_v61 = vrot.slane %v3766_v31, 2 }
 0xd26   :  { %v3994_v37 = vrot.slane %v3980_v9, %v8055_v5  ;;  %v3997_v13 = vadd.f32 %v3987_v51, %v3968_v26 }
 0xd27   :  { %v3953_v55 = vadd.f32 %v3949_v48, %v3767_v50  ;;  %v5375_v12 = vmul.f32 -1.442695, %v3952_v47  ;;  %v4039_v47 = vrot.slane %v3767_v50, 2 }
 0xd28   :  { %v3998_v22 = vadd.f32 %v3994_v37, %v3969_v18  ;;  %v5377_v27 = vmul.f32 -1.442695, %v3997_v13 }
 0xd29   :  { %7566 = vpow2.f32 %v5375_v12  ;;  %v5376_v15 = vmul.f32 -1.442695, %v3953_v55 }
 0xd2a   :  { %v5378_v42 = vmul.f32 -1.442695, %v3998_v22 }
 0xd2b   :  { %7568 = vpow2.f32 %v5376_v15 }
 0xd2c   :  { %7570 = vpow2.f32 %v5377_v27 }
 0xd33   :  { %v7567_v39 = vpop.eup %7566 }
 0xd34   :  { %v3960_v56 = vadd.f32 1.0, %v7567_v39 }
 0xd35   :  { %v7569_v33 = vpop.eup %7568 }
 0xd36   :  { %v3961_v54 = vadd.f32 1.0, %v7569_v33  ;;  %7572 = vrcp.f32 %v3960_v56  ;;  %v7571_v3 = vpop.eup %7570 }
 0xd37   :  { %7574 = vpow2.f32 %v5378_v42  ;;  %v4005_v48 = vadd.f32 1.0, %v7571_v3 }
 0xd38   :  { %7576 = vrcp.f32 %v3961_v54 }
 0xd40   :  { %v7573_v24 = vpop.eup %7572 }
 0xd41   :  { %v7575_v41 = vpop.eup %7574  ;;  %v4036_v62 = vmul.f32 %v7573_v24, %v4026_v36 }
 0xd42   :  { %v7577_v29 = vpop.eup %7576  ;;  %v4006_v9 = vadd.f32 1.0, %v7575_v41  ;;  %v4052_v41 = vld [vmem:[#allocation2 + $0x4] ss:$8 sm:$0x7] }
 0xd43   :  { %v4037_v21 = vmul.f32 %v7577_v29, %v4033_v30  ;;  %v4042_v55 = vadd.f32 %v4038_v61, %v4036_v62  ;;  %v4053_v61 = vld [vmem:[#allocation2 + $0x1c] ss:$8 sm:$0x7] }
 0xd45   :  { %v4043_v12 = vadd.f32 %v4039_v47, %v4037_v21  ;;  %7578 = vtanh.f32 %v4042_v55 }
 0xd46   :  { %7580 = vrcp.f32 %v4005_v48 }
 0xd47   :  { %7582 = vtanh.f32 %v4043_v12  ;;  %v4254_v12 = vrot.slane %v4052_v41, 1 }
 0xd48   :  { %7584 = vrcp.f32 %v4006_v9 }
 0xd4f   :  { %v7579_v15 = vpop.eup %7578 }
 0xd50   :  { %v7581_v51 = vpop.eup %7580  ;;  %v4046_v26 = vsub.f32 %v8716_v20, %v7579_v15 }
 0xd51   :  { %v7583_v37 = vpop.eup %7582 }
 0xd52   :  { %v4047_v18 = vsub.f32 %v8718_v43, %v7583_v37  ;;  %v4048_v13 = vmul.f32 %v7581_v51, %v4046_v26  ;;  %v7585_v31 = vpop.eup %7584 }
 0xd54   :  { %v4049_v22 = vmul.f32 %v7585_v31, %v4047_v18  ;;  %v8773_v27 = vadd.f32 %v7579_v15, %v4048_v13  ;;  %v4255_v15 = vrot.slane %v4053_v61, 1 }
 0xd56   :  { %v8775_v50 = vadd.f32 %v7583_v37, %v4049_v22 }
 0xd58   :  { %v4056_v39 = vcombine.low %v8773_v27, %v8775_v50 }
 0xd5a   :  { %v4063_v42 = vrot.slane %v4056_v39, %v8055_v5 }
 0xd5c   :  { %v4070_v56 = vrot.slane %v4063_v42, %v8055_v5 }
 0xd5e   :  { %4137 = vmatmul.mubr.f32.vlgmr.msra.gmra.mrb[28].mxu0 %v4070_v56  ;;  %6202 = vmatmul.mubr.f32.vlgmr.msra.gmra.mrb[32].mxu1 %v4070_v56 }
 0xd5f   :  { %7147 = vmatpush1.bf16.msra.mxu0 %v8453_v45  ;;  %7178 = vmatpush3.bf16.msra.mxu1 %v8457_v53 }
 0xd60   :  { %7149 = vmatprep.subr.bf16.mxu0 %v8455_v14  ;;  %7179 = vmatprep.subr.bf16.mxu1 %v7766_v38 }
 0xd61   :  { %4422 = vmatprep.mubr.f32.mxu0 %v7765_v0  ;;  %6236 = vmatprep.mubr.msk.f32.mxu1 %vm7767_vm1, %v7765_v0 }
 0xd63   :  { %7151 = vmatpush1.bf16.msra.mxu0 %v8461_v63  ;;  %7181 = vmatpush3.bf16.msra.mxu1 %v8467_v44 }
 0xd64   :  { %7153 = vmatprep.subr.bf16.mxu0 %v8464_v28  ;;  %7182 = vmatprep.subr.bf16.mxu1 %v7766_v38 }
 0xd67   :  { %7155 = vmatpush1.bf16.msra.mxu0 %v8473_v7  ;;  %7184 = vmatpush3.bf16.msra.mxu1 %v8480_v58 }
 0xd68   :  { %7157 = vmatprep.subr.bf16.mxu0 %v8477_v34  ;;  %7185 = vmatprep.subr.bf16.mxu1 %v7766_v38 }
 0xd6b   :  { %7159 = vmatpush1.bf16.msra.mxu0 %v8484_v40  ;;  %7187 = vmatpush3.bf16.msra.mxu1 %v8490_v59 }
 0xd6c   :  { %7161 = vmatprep.subr.bf16.mxu0 %v8487_v46  ;;  %7188 = vmatprep.subr.bf16.mxu1 %v7766_v38 }
 0xd6f   :  { %7163 = vmatpush1.bf16.msra.mxu0 %v8494_v2  ;;  %7190 = vmatpush3.bf16.msra.mxu1 %v8500_v23 }
 0xd70   :  { %7165 = vmatprep.subr.bf16.mxu0 %v8497_v6  ;;  %7191 = vmatprep.subr.bf16.mxu1 %v7766_v38 }
 0xd73   :  { %7167 = vmatpush1.bf16.msra.mxu0 %v8504_v57  ;;  %7193 = vmatpush3.bf16.msra.mxu1 %v8510_v35 }
 0xd74   :  { %7169 = vmatprep.subr.bf16.mxu0 %v8507_v10  ;;  %7194 = vmatprep.subr.bf16.mxu1 %v7766_v38 }
 0xd77   :  { %7171 = vmatpush1.bf16.msra.mxu0 %v8514_v4  ;;  %7196 = vmatpush3.bf16.msra.mxu1 %v8520_v49 }
 0xd78   :  { %7173 = vmatprep.subr.bf16.mxu0 %v8517_v16  ;;  %7197 = vmatprep.subr.bf16.mxu1 %v7766_v38 }
 0xd7b   :  { %7175 = vmatpush1.bf16.msra.mxu0 %v8524_v25  ;;  %7199 = vmatpush3.bf16.msra.mxu1 %v8528_v32 }
 0xd7c   :  { %7201 = vmatprep.subr.bf16.mxu0 %v8435_v17  ;;  %7232 = vmatprep.subr.bf16.mxu1 %v7766_v38 }
 0xe31   :  { %v4138_v20 = vpop.f32.mrb[28].mxu0  ;;  %v4209_v43 = vpop.f32.mrb[32].mxu1 }
 0xe32   :  { %v4139_v33 = vadd.f32 %v4138_v20, %v8582_v1  ;;  %v4140_v52 = vpop.f32.mrb[29].mxu0  ;;  %v6203_v54 = vpop.f32.mrb[33].mxu1  ;;  %v4210_v39 = vadd.f32 %v4209_v43, %v8596_v8 }
 0xe33   :  { %v4141_v19 = vadd.f32 %v4140_v52, %v8585_v11 }
 0xe34   :  { %v4220_v60 = vrot.slane %v4139_v33, %v8055_v5  ;;  %v4304_v56 = vrot.slane %v4210_v39, %v8055_v5 }
 0xe35   :  { %v4265_v24 = vrot.slane %v4141_v19, %v8055_v5 }
 0xe36   :  { %v4221_v3 = vcombine.high %v4220_v60, %v4220_v60  ;;  %v4228_v36 = vrot.slane %v4220_v60, %v8055_v5  ;;  %v4305_v20 = vcombine.high %v4304_v56, %v4304_v56  ;;  %v4312_v52 = vrot.slane %v4304_v56, %v8055_v5 }
 0xe37   :  { %v4266_v21 = vcombine.high %v4265_v24, %v4265_v24  ;;  %v4273_v55 = vrot.slane %v4265_v24, %v8055_v5 }
 0xe38   :  { %v4235_v30 = vrot.slane %v4221_v3, %v8055_v5  ;;  %v4238_v62 = vadd.f32 %v4228_v36, %v4052_v41  ;;  %v4319_v60 = vrot.slane %v4305_v20, %v8055_v5  ;;  %v4324_v36 = vrot.slane %v4052_v41, 2 }
 0xe39   :  { %v4280_v9 = vrot.slane %v4266_v21, %v8055_v5  ;;  %v4283_v51 = vadd.f32 %v4273_v55, %v4254_v12 }
 0xe3a   :  { %v4239_v29 = vadd.f32 %v4235_v30, %v4053_v61  ;;  %v5379_v48 = vmul.f32 -1.442695, %v4238_v62  ;;  %v4325_v62 = vrot.slane %v4053_v61, 2 }
 0xe3b   :  { %v4284_v26 = vadd.f32 %v4280_v9, %v4255_v15  ;;  %v5381_v37 = vmul.f32 -1.442695, %v4283_v51 }
 0xe3c   :  { %7586 = vpow2.f32 %v5379_v48  ;;  %v5380_v47 = vmul.f32 -1.442695, %v4239_v29 }
 0xe3d   :  { %v5382_v13 = vmul.f32 -1.442695, %v4284_v26 }
 0xe3e   :  { %7588 = vpow2.f32 %v5380_v47 }
 0xe3f   :  { %7590 = vpow2.f32 %v5381_v37 }
 0xe46   :  { %v7587_v18 = vpop.eup %7586 }
 0xe47   :  { %v4246_v31 = vadd.f32 1.0, %v7587_v18 }
 0xe48   :  { %v7589_v22 = vpop.eup %7588 }
 0xe49   :  { %v4247_v42 = vadd.f32 1.0, %v7589_v22  ;;  %7592 = vrcp.f32 %v4246_v31  ;;  %v7591_v33 = vpop.eup %7590 }
 0xe4a   :  { %7594 = vpow2.f32 %v5382_v13  ;;  %v4291_v30 = vadd.f32 1.0, %v7591_v33 }
 0xe4b   :  { %7596 = vrcp.f32 %v4247_v42 }
 0xe53   :  { %v7593_v54 = vpop.eup %7592 }
 0xe54   :  { %v7595_v19 = vpop.eup %7594  ;;  %v4322_v3 = vmul.f32 %v7593_v54, %v4312_v52 }
 0xe55   :  { %v7597_v24 = vpop.eup %7596  ;;  %v4292_v21 = vadd.f32 1.0, %v7595_v19  ;;  %v4338_v19 = vld [vmem:[#allocation2 + $0x5] ss:$8 sm:$0x7] }
 0xe56   :  { %v4323_v43 = vmul.f32 %v7597_v24, %v4319_v60  ;;  %v4328_v29 = vadd.f32 %v4324_v36, %v4322_v3  ;;  %v4339_v3 = vld [vmem:[#allocation2 + $0x1d] ss:$8 sm:$0x7] }
 0xe58   :  { %v4329_v48 = vadd.f32 %v4325_v62, %v4323_v43  ;;  %7598 = vtanh.f32 %v4328_v29  ;;  %v4540_v29 = vrot.slane %v4338_v19, 1 }
 0xe59   :  { %7600 = vrcp.f32 %v4291_v30 }
 0xe5a   :  { %7602 = vtanh.f32 %v4329_v48 }
 0xe5b   :  { %7604 = vrcp.f32 %v4292_v21  ;;  %v4541_v21 = vrot.slane %v4339_v3, 1 }
 0xe62   :  { %v7599_v47 = vpop.eup %7598 }
 0xe63   :  { %v7601_v55 = vpop.eup %7600  ;;  %v4332_v12 = vsub.f32 %v8773_v27, %v7599_v47 }
 0xe64   :  { %v7603_v9 = vpop.eup %7602 }
 0xe65   :  { %v4333_v15 = vsub.f32 %v8775_v50, %v7603_v9  ;;  %v4334_v51 = vmul.f32 %v7601_v55, %v4332_v12  ;;  %v7605_v41 = vpop.eup %7604 }
 0xe67   :  { %v4335_v26 = vmul.f32 %v7605_v41, %v4333_v15  ;;  %v8830_v37 = vadd.f32 %v7599_v47, %v4334_v51 }
 0xe69   :  { %v8832_v61 = vadd.f32 %v7603_v9, %v4335_v26 }
 0xe6b   :  { %v4342_v18 = vcombine.low %v8830_v37, %v8832_v61 }
 0xe6d   :  { %v4349_v13 = vrot.slane %v4342_v18, %v8055_v5 }
 0xe6f   :  { %v4356_v31 = vrot.slane %v4349_v13, %v8055_v5 }
 0xe71   :  { %4423 = vmatmul.mubr.f32.vlgmr.msra.gmra.mrb[30].mxu0 %v4356_v31  ;;  %6237 = vmatmul.mubr.f32.vlgmr.msra.gmra.mrb[34].mxu1 %v4356_v31 }
 0xe72   :  { %7203 = vmatpush1.bf16.msra.mxu0 %v8453_v45  ;;  %7234 = vmatpush3.bf16.msra.mxu1 %v8457_v53 }
 0xe73   :  { %7205 = vmatprep.subr.bf16.mxu0 %v8455_v14  ;;  %7235 = vmatprep.subr.bf16.mxu1 %v7766_v38 }
 0xe74   :  { %4708 = vmatprep.mubr.f32.mxu0 %v7765_v0  ;;  %6271 = vmatprep.mubr.msk.f32.mxu1 %vm7767_vm1, %v7765_v0 }
 0xe76   :  { %7207 = vmatpush1.bf16.msra.mxu0 %v8461_v63  ;;  %7237 = vmatpush3.bf16.msra.mxu1 %v8467_v44 }
 0xe77   :  { %7209 = vmatprep.subr.bf16.mxu0 %v8464_v28  ;;  %7238 = vmatprep.subr.bf16.mxu1 %v7766_v38 }
 0xe7a   :  { %7211 = vmatpush1.bf16.msra.mxu0 %v8473_v7  ;;  %7240 = vmatpush3.bf16.msra.mxu1 %v8480_v58 }
 0xe7b   :  { %7213 = vmatprep.subr.bf16.mxu0 %v8477_v34  ;;  %7241 = vmatprep.subr.bf16.mxu1 %v7766_v38 }
 0xe7e   :  { %7215 = vmatpush1.bf16.msra.mxu0 %v8484_v40  ;;  %7243 = vmatpush3.bf16.msra.mxu1 %v8490_v59 }
 0xe7f   :  { %7217 = vmatprep.subr.bf16.mxu0 %v8487_v46  ;;  %7244 = vmatprep.subr.bf16.mxu1 %v7766_v38 }
 0xe82   :  { %7219 = vmatpush1.bf16.msra.mxu0 %v8494_v2  ;;  %7246 = vmatpush3.bf16.msra.mxu1 %v8500_v23 }
 0xe83   :  { %7221 = vmatprep.subr.bf16.mxu0 %v8497_v6  ;;  %7247 = vmatprep.subr.bf16.mxu1 %v7766_v38 }
 0xe86   :  { %7223 = vmatpush1.bf16.msra.mxu0 %v8504_v57  ;;  %7249 = vmatpush3.bf16.msra.mxu1 %v8510_v35 }
 0xe87   :  { %7225 = vmatprep.subr.bf16.mxu0 %v8507_v10  ;;  %7250 = vmatprep.subr.bf16.mxu1 %v7766_v38 }
 0xe8a   :  { %7227 = vmatpush1.bf16.msra.mxu0 %v8514_v4  ;;  %7252 = vmatpush3.bf16.msra.mxu1 %v8520_v49 }
 0xe8b   :  { %7229 = vmatprep.subr.bf16.mxu0 %v8517_v16  ;;  %7253 = vmatprep.subr.bf16.mxu1 %v7766_v38 }
 0xe8e   :  { %7231 = vmatpush1.bf16.msra.mxu0 %v8524_v25  ;;  %7255 = vmatpush3.bf16.msra.mxu1 %v8528_v32 }
 0xe8f   :  { %7257 = vmatprep.subr.bf16.mxu0 %v8435_v17  ;;  %7288 = vmatprep.subr.bf16.mxu1 %v7766_v38 }
 0xf44   :  { %v4424_v27 = vpop.f32.mrb[30].mxu0  ;;  %v4495_v50 = vpop.f32.mrb[34].mxu1 }
 0xf45   :  { %v4425_v22 = vadd.f32 %v4424_v27, %v8582_v1  ;;  %v4426_v39 = vpop.f32.mrb[31].mxu0  ;;  %v6238_v42 = vpop.f32.mrb[35].mxu1  ;;  %v4496_v26 = vadd.f32 %v4495_v50, %v8596_v8 }
 0xf46   :  { %v4427_v56 = vadd.f32 %v4426_v39, %v8585_v11 }
 0xf47   :  { %v4506_v20 = vrot.slane %v4425_v22, %v8055_v5  ;;  %v4590_v13 = vrot.slane %v4496_v26, %v8055_v5 }
 0xf48   :  { %v4551_v54 = vrot.slane %v4427_v56, %v8055_v5 }
 0xf49   :  { %v4507_v33 = vcombine.high %v4506_v20, %v4506_v20  ;;  %v4514_v52 = vrot.slane %v4506_v20, %v8055_v5  ;;  %v4591_v31 = vcombine.high %v4590_v13, %v4590_v13  ;;  %v4598_v22 = vrot.slane %v4590_v13, %v8055_v5 }
 0xf4a   :  { %v4552_v30 = vcombine.high %v4551_v54, %v4551_v54  ;;  %v4559_v62 = vrot.slane %v4551_v54, %v8055_v5 }
 0xf4b   :  { %v4521_v17 = vrot.slane %v4507_v33, %v8055_v5  ;;  %v4524_v60 = vadd.f32 %v4514_v52, %v4338_v19  ;;  %v4605_v56 = vrot.slane %v4591_v31, %v8055_v5  ;;  %v4610_v33 = vrot.slane %v4338_v19, 2 }
 0xf4c   :  { %v4566_v48 = vrot.slane %v4552_v30, %v8055_v5  ;;  %v4569_v47 = vadd.f32 %v4559_v62, %v4540_v29 }
 0xf4d   :  { %v4525_v36 = vadd.f32 %v4521_v17, %v4339_v3  ;;  %v5383_v24 = vmul.f32 -1.442695, %v4524_v60  ;;  %v4611_v17 = vrot.slane %v4339_v3, 2 }
 0xf4e   :  { %v4570_v55 = vadd.f32 %v4566_v48, %v4541_v21  ;;  %v5385_v12 = vmul.f32 -1.442695, %v4569_v47 }
 0xf4f   :  { %7606 = vpow2.f32 %v5383_v24  ;;  %v5384_v43 = vmul.f32 -1.442695, %v4525_v36 }
 0xf50   :  { %v5386_v15 = vmul.f32 -1.442695, %v4570_v55 }
 0xf51   :  { %7608 = vpow2.f32 %v5384_v43 }
 0xf52   :  { %7610 = vpow2.f32 %v5385_v12 }
 0xf59   :  { %v7607_v9 = vpop.eup %7606 }
 0xf5a   :  { %v4532_v51 = vadd.f32 1.0, %v7607_v9 }
 0xf5b   :  { %v7609_v41 = vpop.eup %7608 }
 0xf5c   :  { %v4533_v18 = vadd.f32 1.0, %v7609_v41  ;;  %7612 = vrcp.f32 %v4532_v51  ;;  %v7611_v27 = vpop.eup %7610 }
 0xf5d   :  { %7614 = vpow2.f32 %v5386_v15  ;;  %v4577_v54 = vadd.f32 1.0, %v7611_v27 }
 0xf5e   :  { %7616 = vrcp.f32 %v4533_v18 }
 0xf66   :  { %v7613_v39 = vpop.eup %7612 }
 0xf67   :  { %v7615_v42 = vpop.eup %7614  ;;  %v4608_v20 = vmul.f32 %v7613_v39, %v4598_v22 }
 0xf68   :  { %v7617_v52 = vpop.eup %7616  ;;  %v4578_v24 = vadd.f32 1.0, %v7615_v42 }
 0xf69   :  { %v4609_v50 = vmul.f32 %v7617_v52, %v4605_v56  ;;  %v4614_v60 = vadd.f32 %v4610_v33, %v4608_v20 }
 0xf6b   :  { %v4615_v36 = vadd.f32 %v4611_v17, %v4609_v50  ;;  %7618 = vtanh.f32 %v4614_v60 }
 0xf6c   :  { %7620 = vrcp.f32 %v4577_v54 }
 0xf6d   :  { %7622 = vtanh.f32 %v4615_v36 }
 0xf6e   :  { %7624 = vrcp.f32 %v4578_v24 }
 0xf75   :  { %v7619_v30 = vpop.eup %7618 }
 0xf76   :  { %v7621_v43 = vpop.eup %7620  ;;  %v4618_v62 = vsub.f32 %v8830_v37, %v7619_v30 }
 0xf77   :  { %v7623_v29 = vpop.eup %7622 }
 0xf78   :  { %v4619_v48 = vsub.f32 %v8832_v61, %v7623_v29  ;;  %v4620_v21 = vmul.f32 %v7621_v43, %v4618_v62  ;;  %v7625_v19 = vpop.eup %7624 }
 0xf7a   :  { %v4621_v47 = vmul.f32 %v7625_v19, %v4619_v48  ;;  %v8887_v55 = vadd.f32 %v7619_v30, %v4620_v21 }
 0xf7c   :  { %v8889_v3 = vadd.f32 %v7623_v29, %v4621_v47 }
 0xf7e   :  { %v4628_v12 = vcombine.low %v8887_v55, %v8889_v3 }
 0xf80   :  { %v4635_v9 = vrot.slane %v4628_v12, %v8055_v5 }
 0xf82   :  { %v4642_v15 = vrot.slane %v4635_v9, %v8055_v5 }
 0xf84   :  { %4709 = vmatmul.mubr.f32.vlgmr.msra.gmra.mrb[32].mxu0 %v4642_v15  ;;  %6272 = vmatmul.mubr.f32.vlgmr.msra.gmra.mrb[36].mxu1 %v4642_v15 }
 0xf85   :  { %7259 = vmatpush1.bf16.msra.mxu0 %v8453_v45  ;;  %7290 = vmatpush3.bf16.msra.mxu1 %v8457_v53 }
 0xf86   :  { %7261 = vmatprep.subr.bf16.mxu0 %v8455_v14  ;;  %7291 = vmatprep.subr.bf16.mxu1 %v7766_v38 }
 0xf87   :  { %4994 = vmatprep.mubr.f32.mxu0 %v7765_v0  ;;  %6306 = vmatprep.mubr.msk.f32.mxu1 %vm7767_vm1, %v7765_v0 }
 0xf89   :  { %7263 = vmatpush1.bf16.msra.mxu0 %v8461_v63  ;;  %7293 = vmatpush3.bf16.msra.mxu1 %v8467_v44 }
 0xf8a   :  { %7265 = vmatprep.subr.bf16.mxu0 %v8464_v28  ;;  %7294 = vmatprep.subr.bf16.mxu1 %v7766_v38 }
 0xf8d   :  { %7267 = vmatpush1.bf16.msra.mxu0 %v8473_v7  ;;  %7296 = vmatpush3.bf16.msra.mxu1 %v8480_v58 }
 0xf8e   :  { %7269 = vmatprep.subr.bf16.mxu0 %v8477_v34  ;;  %7297 = vmatprep.subr.bf16.mxu1 %v7766_v38 }
 0xf91   :  { %7271 = vmatpush1.bf16.msra.mxu0 %v8484_v40  ;;  %7299 = vmatpush3.bf16.msra.mxu1 %v8490_v59 }
 0xf92   :  { %7273 = vmatprep.subr.bf16.mxu0 %v8487_v46  ;;  %7300 = vmatprep.subr.bf16.mxu1 %v7766_v38  ;;  %v4624_v46 = vld [vmem:[#allocation2 + $0x6] ss:$8 sm:$0x7] }
 0xf93   :  { %v4896_v54 = vrot.slane %v4624_v46, 2 }
 0xf95   :  { %7275 = vmatpush1.bf16.msra.mxu0 %v8494_v2  ;;  %7302 = vmatpush3.bf16.msra.mxu1 %v8500_v23 }
 0xf96   :  { %7277 = vmatprep.subr.bf16.mxu0 %v8497_v6  ;;  %7303 = vmatprep.subr.bf16.mxu1 %v7766_v38  ;;  %v4625_v6 = vld [vmem:[#allocation2 + $0x1e] ss:$8 sm:$0x7] }
 0xf97   :  { %v4897_v36 = vrot.slane %v4625_v6, 2 }
 0xf99   :  { %7279 = vmatpush1.bf16.msra.mxu0 %v8504_v57  ;;  %7305 = vmatpush3.bf16.msra.mxu1 %v8510_v35 }
 0xf9a   :  { %7281 = vmatprep.subr.bf16.mxu0 %v8507_v10  ;;  %7306 = vmatprep.subr.bf16.mxu1 %v7766_v38 }
 0xf9d   :  { %7283 = vmatpush1.bf16.msra.mxu0 %v8514_v4  ;;  %7308 = vmatpush3.bf16.msra.mxu1 %v8520_v49 }
 0xf9e   :  { %7285 = vmatprep.subr.bf16.mxu0 %v8517_v16  ;;  %7309 = vmatprep.subr.bf16.mxu1 %v7766_v38  ;;  %v4826_v16 = vrot.slane %v4624_v46, 1 }
 0xfa1   :  { %7287 = vmatpush1.bf16.msra.mxu0 %v8524_v25  ;;  %7311 = vmatpush3.bf16.msra.mxu1 %v8528_v32  ;;  %v4827_v25 = vrot.slane %v4625_v6, 1 }
 0xfa2   :  { %7312 = vmatprep.subr.bf16.mxu0 %v7766_v38 }
0x1057   :  { %v4710_v45 = vpop.f32.mrb[32].mxu0  ;;  %v4781_v14 = vpop.f32.mrb[36].mxu1 }
0x1058   :  { %v4711_v53 = vadd.f32 %v4710_v45, %v8582_v1  ;;  %v4712_v63 = vpop.f32.mrb[33].mxu0  ;;  %v6273_v28 = vpop.f32.mrb[37].mxu1  ;;  %v4782_v13 = vadd.f32 %v4781_v14, %v8596_v8 }
0x1059   :  { %v4713_v44 = vadd.f32 %v4712_v63, %v8585_v11  ;;  %v5200_v28 = vld [vmem:[%s9048_s9 + $0x10] sm:$0xff] }
0x105a   :  { %v4792_v7 = vrot.slane %v4711_v53, %v8055_v5  ;;  %v4876_v27 = vrot.slane %v4782_v13, %v8055_v5 }
0x105b   :  { %v4837_v40 = vrot.slane %v4713_v44, %v8055_v5 }
0x105c   :  { %v4793_v34 = vcombine.high %v4792_v7, %v4792_v7  ;;  %v4800_v58 = vrot.slane %v4792_v7, %v8055_v5  ;;  %v4877_v22 = vcombine.high %v4876_v27, %v4876_v27  ;;  %v4884_v42 = vrot.slane %v4876_v27, %v8055_v5  ;;  %v5201_v7 = vld [vmem:[%s9048_s9 + $0x18] sm:$0xff] }
0x105d   :  { %v4838_v10 = vcombine.high %v4837_v40, %v4837_v40  ;;  %v4845_v4 = vrot.slane %v4837_v40, %v8055_v5 }
0x105e   :  { %v4807_v59 = vrot.slane %v4793_v34, %v8055_v5  ;;  %v4810_v2 = vadd.f32 %v4800_v58, %v4624_v46  ;;  %v4891_v33 = vrot.slane %v4877_v22, %v8055_v5  ;;  %v7316_v34 = vpack.c.bf16 %v5201_v7, %v5200_v28  ;;  %v5203_v58 = vld [vmem:[%s9048_s9 + $0x28] sm:$0xff]  ;;  %v5204_v46 = vld [vmem:[%s9048_s9 + $0x30] sm:$0xff] }
0x105f   :  { %v4852_v49 = vrot.slane %v4838_v10, %v8055_v5  ;;  %v4855_v32 = vadd.f32 %v4845_v4, %v4826_v16  ;;  %v5208_v10 = vld [vmem:[%s9048_s9 + $0x50] sm:$0xff]  ;;  %v5210_v16 = vld [vmem:[%s9048_s9 + $0x60] sm:$0xff] }
0x1060   :  { %v4811_v23 = vadd.f32 %v4807_v59, %v4625_v6  ;;  %v5387_v57 = vmul.f32 -1.442695, %v4810_v2  ;;  %v5205_v59 = vld [vmem:[%s9048_s9 + $0x38] sm:$0xff]  ;;  %v5206_v6 = vld [vmem:[%s9048_s9 + $0x40] sm:$0xff] }
0x1061   :  { %v4856_v37 = vadd.f32 %v4852_v49, %v4827_v25  ;;  %v5389_v61 = vmul.f32 -1.442695, %v4855_v32  ;;  %v7322_v2 = vpack.c.bf16 %v5205_v59, %v5204_v46  ;;  %v5211_v49 = vld [vmem:[%s9048_s9 + $0x68] sm:$0xff]  ;;  %v5212_v32 = vld [vmem:[%s9048_s9 + $0x70] sm:$0xff] }
0x1062   :  { %7626 = vpow2.f32 %v5387_v57  ;;  %v5388_v35 = vmul.f32 -1.442695, %v4811_v23  ;;  %v5207_v23 = vld [vmem:[%s9048_s9 + $0x48] sm:$0xff]  ;;  %v7331_v25 = vpack.c.bf16 %v5211_v49, %v5210_v16 }
0x1063   :  { %v5390_v41 = vmul.f32 -1.442695, %v4856_v37  ;;  %v7325_v57 = vpack.c.bf16 %v5207_v23, %v5206_v6  ;;  %v5213_v37 = vld [vmem:[%s9048_s9 + $0x78] sm:$0xff] }
0x1064   :  { %7628 = vpow2.f32 %v5388_v35  ;;  %v5209_v35 = vld [vmem:[%s9048_s9 + $0x58] sm:$0xff] }
0x1065   :  { %7630 = vpow2.f32 %v5389_v61  ;;  %v7328_v4 = vpack.c.bf16 %v5209_v35, %v5208_v10  ;;  %v7334_v61 = vpack.c.bf16 %v5213_v37, %v5212_v32 }
0x106c   :  { %v7627_v51 = vpop.eup %7626 }
0x106d   :  { %v4818_v26 = vadd.f32 1.0, %v7627_v51 }
0x106e   :  { %v7629_v18 = vpop.eup %7628 }
0x106f   :  { %v4819_v31 = vadd.f32 1.0, %v7629_v18  ;;  %7632 = vrcp.f32 %v4818_v26  ;;  %v7631_v39 = vpop.eup %7630 }
0x1070   :  { %7634 = vpow2.f32 %v5390_v41  ;;  %v4863_v17 = vadd.f32 1.0, %v7631_v39 }
0x1071   :  { %7636 = vrcp.f32 %v4819_v31 }
0x1079   :  { %v7633_v56 = vpop.eup %7632 }
0x107a   :  { %v7635_v20 = vpop.eup %7634  ;;  %v4894_v52 = vmul.f32 %v7633_v56, %v4884_v42  ;;  %v4910_v56 = vld [vmem:[#allocation2 + $0x7] ss:$8 sm:$0x7] }
0x107b   :  { %v7637_v50 = vpop.eup %7636  ;;  %v4864_v43 = vadd.f32 1.0, %v7635_v20 }
0x107c   :  { %v4895_v60 = vmul.f32 %v7637_v50, %v4891_v33  ;;  %v4900_v24 = vadd.f32 %v4896_v54, %v4894_v52  ;;  %v4911_v33 = vld [vmem:[#allocation2 + $0x1f] ss:$8 sm:$0x7] }
0x107e   :  { %v4901_v30 = vadd.f32 %v4897_v36, %v4895_v60  ;;  %7638 = vtanh.f32 %v4900_v24  ;;  %v5113_v36 = vrot.slane %v4911_v33, 1 }
0x107f   :  { %7640 = vrcp.f32 %v4863_v17 }
0x1080   :  { %7642 = vtanh.f32 %v4901_v30 }
0x1081   :  { %7644 = vrcp.f32 %v4864_v43 }
0x1088   :  { %v7639_v62 = vpop.eup %7638 }
0x1089   :  { %v7641_v29 = vpop.eup %7640  ;;  %v4904_v48 = vsub.f32 %v8887_v55, %v7639_v62  ;;  %v5198_v55 = vld [vmem:[%s9048_s9] sm:$0xff] }
0x108a   :  { %v7643_v21 = vpop.eup %7642 }
0x108b   :  { %v4905_v19 = vsub.f32 %v8889_v3, %v7643_v21  ;;  %v4906_v47 = vmul.f32 %v7641_v29, %v4904_v48  ;;  %v7645_v12 = vpop.eup %7644  ;;  %v5199_v3 = vld [vmem:[%s9048_s9 + $0x8] sm:$0xff] }
0x108c   :  { %v7313_v44 = vpack.c.bf16 %v5199_v3, %v5198_v55 }
0x108d   :  { %v4907_v9 = vmul.f32 %v7645_v12, %v4905_v19  ;;  %v8943_v15 = vadd.f32 %v7639_v62, %v4906_v47 }
0x108f   :  { %v8945_v45 = vadd.f32 %v7643_v21, %v4907_v9 }
0x1091   :  { %v4914_v14 = vcombine.low %v8943_v15, %v8945_v45 }
0x1093   :  { %v4921_v53 = vrot.slane %v4914_v14, %v8055_v5 }
0x1095   :  { %v4928_v63 = vrot.slane %v4921_v53, %v8055_v5 }
0x1097   :  { %4995 = vmatmul.mubr.f32.vlgmr.msra.gmra.mrb[34].mxu0 %v4928_v63  ;;  %6307 = vmatmul.mubr.f32.vlgmr.msra.gmra.mrb[38].mxu1 %v4928_v63 }
0x1098   :  { %6341 = vmatprep.mubr.msk.f32.mxu0 %vm7767_vm1, %v7765_v0  ;;  %7314 = vmatpush3.bf16.msra.mxu0 %v7313_v44  ;;  %v5202_v0 = vld [vmem:[%s9048_s9 + $0x20] sm:$0xff]  ;;  %v5182_v44 = vrot.slane %v4910_v56, 2 }
0x1099   :  { %7315 = vmatprep.subr.bf16.mxu0 %v7766_v38  ;;  %v7319_v40 = vpack.c.bf16 %v5203_v58, %v5202_v0  ;;  %v5183_v0 = vrot.slane %v4911_v33, 2 }
0x109c   :  { %7317 = vmatpush3.bf16.msra.mxu0 %v7316_v34 }
0x109d   :  { %7318 = vmatprep.subr.bf16.mxu0 %v7766_v38 }
0x10a0   :  { %7320 = vmatpush3.bf16.msra.mxu0 %v7319_v40 }
0x10a1   :  { %7321 = vmatprep.subr.bf16.mxu0 %v7766_v38 }
0x10a4   :  { %7323 = vmatpush3.bf16.msra.mxu0 %v7322_v2 }
0x10a5   :  { %7324 = vmatprep.subr.bf16.mxu0 %v7766_v38 }
0x10a8   :  { %7326 = vmatpush3.bf16.msra.mxu0 %v7325_v57 }
0x10a9   :  { %7327 = vmatprep.subr.bf16.mxu0 %v7766_v38 }
0x10ac   :  { %7329 = vmatpush3.bf16.msra.mxu0 %v7328_v4 }
0x10ad   :  { %7330 = vmatprep.subr.bf16.mxu0 %v7766_v38 }
0x10b0   :  { %7332 = vmatpush3.bf16.msra.mxu0 %v7331_v25 }
0x10b1   :  { %7333 = vmatprep.subr.bf16.mxu0 %v7766_v38 }
0x10b4   :  { %7335 = vmatpush3.bf16.msra.mxu0 %v7334_v61 }
0x116a   :  { %v4996_v51 = vpop.f32.mrb[34].mxu0  ;;  %v5067_v41 = vpop.f32.mrb[38].mxu1 }
0x116b   :  { %v4997_v26 = vadd.f32 %v4996_v51, %v8582_v1  ;;  %v4998_v18 = vpop.f32.mrb[35].mxu0  ;;  %v6308_v13 = vpop.f32.mrb[39].mxu1  ;;  %v5068_v19 = vadd.f32 %v5067_v41, %v8596_v8 }
0x116c   :  { %v4999_v31 = vadd.f32 %v4998_v18, %v8585_v11  ;;  %v5112_v11 = vrot.slane %v4910_v56, 1 }
0x116d   :  { %v5078_v27 = vrot.slane %v4997_v26, %v8055_v5  ;;  %v5162_v12 = vrot.slane %v5068_v19, %v8055_v5 }
0x116e   :  { %v5123_v42 = vrot.slane %v4999_v31, %v8055_v5 }
0x116f   :  { %v5079_v22 = vcombine.high %v5078_v27, %v5078_v27  ;;  %v5086_v39 = vrot.slane %v5078_v27, %v8055_v5  ;;  %v5163_v9 = vcombine.high %v5162_v12, %v5162_v12  ;;  %v5170_v53 = vrot.slane %v5162_v12, %v8055_v5 }
0x1170   :  { %v5124_v50 = vcombine.high %v5123_v42, %v5123_v42  ;;  %v5131_v17 = vrot.slane %v5123_v42, %v8055_v5 }
0x1171   :  { %v5093_v20 = vrot.slane %v5079_v22, %v8055_v5  ;;  %v5096_v38 = vadd.f32 %v5086_v39, %v4910_v56  ;;  %v5177_v3 = vrot.slane %v5163_v9, %v8055_v5 }
0x1172   :  { %v5138_v60 = vrot.slane %v5124_v50, %v8055_v5  ;;  %v5141_v24 = vadd.f32 %v5131_v17, %v5112_v11 }
0x1173   :  { %v5097_v52 = vadd.f32 %v5093_v20, %v4911_v33  ;;  %v5391_v54 = vmul.f32 -1.442695, %v5096_v38 }
0x1174   :  { %v5142_v30 = vadd.f32 %v5138_v60, %v5113_v36  ;;  %v5393_v43 = vmul.f32 -1.442695, %v5141_v24 }
0x1175   :  { %7646 = vpow2.f32 %v5391_v54  ;;  %v5392_v1 = vmul.f32 -1.442695, %v5097_v52 }
0x1176   :  { %v5394_v29 = vmul.f32 -1.442695, %v5142_v30 }
0x1177   :  { %7648 = vpow2.f32 %v5392_v1 }
0x1178   :  { %7650 = vpow2.f32 %v5393_v43 }
0x117f   :  { %v7647_v62 = vpop.eup %7646 }
0x1180   :  { %v5104_v48 = vadd.f32 1.0, %v7647_v62 }
0x1181   :  { %v7649_v21 = vpop.eup %7648 }
0x1182   :  { %v5105_v47 = vadd.f32 1.0, %v7649_v21  ;;  %7652 = vrcp.f32 %v5104_v48  ;;  %v7651_v14 = vpop.eup %7650 }
0x1183   :  { %7654 = vpow2.f32 %v5394_v29  ;;  %v5149_v34 = vadd.f32 1.0, %v7651_v14 }
0x1184   :  { %7656 = vrcp.f32 %v5105_v47 }
0x118c   :  { %v7653_v63 = vpop.eup %7652 }
0x118d   :  { %v7655_v55 = vpop.eup %7654  ;;  %v5180_v28 = vmul.f32 %v7653_v63, %v5170_v53 }
0x118e   :  { %v7657_v7 = vpop.eup %7656  ;;  %v5150_v46 = vadd.f32 1.0, %v7655_v55 }
0x118f   :  { %v5181_v8 = vmul.f32 %v7657_v7, %v5177_v3  ;;  %v5186_v58 = vadd.f32 %v5182_v44, %v5180_v28 }
0x1191   :  { %v5187_v40 = vadd.f32 %v5183_v0, %v5181_v8  ;;  %7658 = vtanh.f32 %v5186_v58 }
0x1192   :  { %7660 = vrcp.f32 %v5149_v34 }
0x1193   :  { %7662 = vtanh.f32 %v5187_v40 }
0x1194   :  { %7664 = vrcp.f32 %v5150_v46 }
0x119b   :  { %v7659_v59 = vpop.eup %7658 }
0x119c   :  { %v7661_v2 = vpop.eup %7660  ;;  %v5190_v6 = vsub.f32 %v8943_v15, %v7659_v59  ;;  %v5395_v15 = vld [vmem:[%s9049_s10] ss:$0 sm:$0xff] }
0x119d   :  { %v7663_v23 = vpop.eup %7662 }
0x119e   :  { %v5191_v57 = vsub.f32 %v8945_v45, %v7663_v23  ;;  %v5192_v10 = vmul.f32 %v7661_v2, %v5190_v6  ;;  %v7665_v35 = vpop.eup %7664 }
0x11a0   :  { %v5193_v4 = vmul.f32 %v7665_v35, %v5191_v57  ;;  %v5194_v16 = vadd.f32 %v7659_v59, %v5192_v10 }
0x11a2   :  { %v5195_v49 = vadd.f32 %v7663_v23, %v5193_v4  ;;  %v5196_v25 = vmax.f32 %v5194_v16, 0.0 }
0x11a4   :  { %v5197_v32 = vmax.f32 %v5195_v49, 0.0 }
0x11a6   :  { %v5223_v37 = vcombine.low %v5196_v25, %v5197_v32 }
0x11a8   :  { %v5230_v61 = vrot.slane %v5223_v37, %v8055_v5 }
0x11aa   :  { %v5237_v51 = vrot.slane %v5230_v61, %v8055_v5 }
0x11ac   :  { %6342 = vmatmul.mubr.f32.vlgmr.msra.gmra.mrb[36].mxu0 %v5237_v51 }
0x127f   :  { %v5305_v45 = vpop.f32.mrb[36].mxu0 }
0x1280   :  { %v5306_v41 = vadd.f32 %v5395_v15, %v5305_v45  ;;  %v6343_v26 = vpop.f32.mrb[37].mxu0 }
0x1282   :  { %5310 = vst.msk [vmem:[#allocation10] sm:$0x3] %vm5309_vm2, %v5306_v41 }
0x1283   :  { %7743 = shalt.err (!%p7740_p0)
}
0x1284   :  { %s7744_s22 = scalar_lea.hbm %s9050_s11, 32 }
0x1285   :  { %p7745_p1 = scmp.ne.s32.totalorder %s9050_s11, %s7744_s22  ;;  %p7748_p2 = scmp.lt.u32.totalorder %s7744_s22, %s9050_s11 }
0x1287   :  { %p7750_p3 = pnand %p7748_p2, %p7745_p1 }
0x1289   :  { %7753 = shalt.err (!%p7750_p3)
}
0x128a   :  { %5320 = dma.vmem_to_hbm [thread:$0]  %s5318_s30, 32, %s9050_s11, [#allocation6]  }
0x128b   :  { %7758 = dma.done.wait [#allocation6], 32  }
0x128c   :  { %7759 = vsyncadd [#allocation6], 4294967264 }
0x128d   :  { %5324 = vsyncpa [#allocation5], 1 }
0x128e   :  { %5325 = vsyncpa [#allocation8], 1 }
0x128f   :  { %5326 = vsyncpa [#allocation6], 1 }

</bundles_post_ra>
